<compile_context>
chip_gen: v6e
topology: v6e:2x2x1
jax: 0.10.0
libtpu: 0.0.40
codegen_flags: <defaults>
</compile_context>

<pallas_src>
import functools

import numpy as np
import jax
import jax.numpy as jnp
from jax.experimental import pallas as pl
from jax.experimental.pallas import tpu as pltpu

EPS = 1e-5          # BatchNorm / LayerNorm eps (PyTorch default)
NEG_SLOPE = 0.01    # LeakyReLU default negative_slope


def _round_up(x, m):
    return ((x + m - 1) // m) * m


def _lrelu(y):
    return jnp.where(y >= 0.0, y, NEG_SLOPE * y)


# ---------------------------------------------------------------------------
# Kernel 1: fused spectral chain (3 matmuls) + merged branch 1x1 convs.
# ---------------------------------------------------------------------------

def _spec_c1_kernel(x_ref,
                    w1_ref, s1_ref, b1_ref,
                    w2_ref, s2_ref, b2_ref,
                    w3_ref, s3_ref, b3_ref,
                    w4_ref, s4_ref, b4_ref,
                    o_ref):
    h = x_ref[...]                                   # bf16 activations
    for w_ref, s_ref, b_ref in ((w1_ref, s1_ref, b1_ref),
                                (w2_ref, s2_ref, b2_ref),
                                (w3_ref, s3_ref, b3_ref),
                                (w4_ref, s4_ref, b4_ref)):
        y = jnp.dot(h.astype(jnp.bfloat16), w_ref[...],
                    preferred_element_type=jnp.float32)
        y = y * s_ref[...] + b_ref[...]              # folded BN affine (f32)
        h = _lrelu(y)
    o_ref[...] = h.astype(o_ref.dtype)               # bf16 store (half HBM traffic)


def spectral_c1(x2d, layers):
    """x2d: (N, Cin) bf16.  layers: 4x (w_bf16, scale_f32, bias_f32)."""
    n, cin = x2d.shape
    cout = layers[-1][0].shape[1]
    # Big row tiles amortize the ~0.35us per-grid-step overhead; keep >= 2
    # grid steps at small N so the auto-pipeline has something to overlap.
    if n >= 16384:
        tile = 2048
    elif n >= 1024:
        tile = 512
    else:
        tile = 256
    n_pad = _round_up(n, tile)
    if n_pad != n:
        x2d = jnp.pad(x2d, ((0, n_pad - n), (0, 0)))
    in_specs = [pl.BlockSpec((tile, cin), lambda i: (i, 0))]
    args = [x2d]
    for w, s, b in layers:
        kw, kn = w.shape
        in_specs += [pl.BlockSpec((kw, kn), lambda i: (0, 0)),
                     pl.BlockSpec((1, kn), lambda i: (0, 0)),
                     pl.BlockSpec((1, kn), lambda i: (0, 0))]
        args += [w, s.reshape(1, kn), b.reshape(1, kn)]
    out = pl.pallas_call(
        _spec_c1_kernel,
        out_shape=jax.ShapeDtypeStruct((n_pad, cout), jnp.bfloat16),
        grid=(n_pad // tile,),
        in_specs=in_specs,
        out_specs=pl.BlockSpec((tile, cout), lambda i: (i, 0)),
        compiler_params=pltpu.CompilerParams(dimension_semantics=("parallel",)),
    )(*args)
    return out[:n]


# ---------------------------------------------------------------------------
# Kernels 2/3: merged kxk conv + folded BN + LeakyReLU + MaxPool2d(2,2,1),
#              all fused.  One grid step = one (batch, pooled-output-row).
# ---------------------------------------------------------------------------

def _make_conv_pool_kernel(K, H, W, Wo):
    def kernel(x_ref, w_ref, s_ref, b_ref, o_ref):
        # x_ref: (Hp, Wp, Cin) bf16 -- whole zero-padded image of one batch elt
        # w_ref: (K*K*Cin, Cout) bf16 im2col weights (tap-major, ci-minor)
        # s_ref/b_ref: (1, Cout) f32 folded-BN affine
        # o_ref: (Wo, Cout) bf16 -- ONE pooled output row
        o = pl.program_id(1)
        # MaxPool2d(2,2,1): pooled row o = max(conv rows 2o-1, 2o).  Clamping
        # the out-of-range row to the valid one is equivalent (max(a, a) = a).
        r_lo = jnp.maximum(2 * o - 1, 0)
        r_hi = jnp.minimum(2 * o, H - 1)

        def row_im2col(r):
            # In-kernel im2col of one conv output row: K*K shifted (W, Cin)
            # patches concatenated on the lane axis -> deep MXU contraction.
            parts = []
            for dh in range(K):
                xrow = x_ref[r + dh]                    # (Wp, Cin) bf16
                for dw in range(K):
                    parts.append(xrow[dw:dw + W, :])    # static sublane slice
            return jnp.concatenate(parts, axis=-1)      # (W, K*K*Cin)

        patch = jnp.concatenate([row_im2col(r_lo), row_im2col(r_hi)], axis=0)
        y = jnp.dot(patch, w_ref[...], preferred_element_type=jnp.float32)
        y = _lrelu(y * s_ref[...] + b_ref[...])          # (2W, Cout) f32
        rmax = jnp.maximum(y[:W, :], y[W:, :])           # row-pair max (W, Cout)

        # Column pooling: pooled col q = max(conv cols 2q-1, 2q), clamped.
        cols = []
        for q in range(Wo):
            lo = max(2 * q - 1, 0)
            hi = min(2 * q, W - 1)
            cols.append(jnp.maximum(rmax[lo:lo + 1, :], rmax[hi:hi + 1, :]))
        o_ref[...] = jnp.concatenate(cols, axis=0).astype(o_ref.dtype)
    return kernel


def conv_kxk_bn_lrelu_pool(x_nhwc, w_taps, scale, bias, K):
    """Fused KxK conv (pad=(K-1)//2) + BN affine + LeakyReLU + MaxPool2d(2,2,1).

    x_nhwc: (B, H, W, Cin) bf16.  w_taps: (K*K, Cin, Cout) bf16.
    Returns (B, Ho, Wo, Cout) bf16 with Ho = H//2 + 1, Wo = W//2 + 1.
    """
    b, h, w, cin = x_nhwc.shape
    pad = (K - 1) // 2
    hp, wp = h + 2 * pad, w + 2 * pad
    ho, wo = h // 2 + 1, w // 2 + 1                  # matches MaxPool2d(2,2,1)
    cout = w_taps.shape[2]
    xp = jnp.pad(x_nhwc, ((0, 0), (pad, pad), (pad, pad), (0, 0)))
    w2d = w_taps.reshape(K * K * cin, cout)          # matches im2col tap order
    return pl.pallas_call(
        _make_conv_pool_kernel(K, h, w, wo),
        out_shape=jax.ShapeDtypeStruct((b, ho, wo, cout), jnp.bfloat16),
        grid=(b, ho),                                # B*Ho steps -> real pipelining
        in_specs=[
            # Whole padded image per batch element; constant over the row axis,
            # so it is only re-DMA'd when the batch index changes.
            pl.BlockSpec((None, hp, wp, cin), lambda i, j: (i, 0, 0, 0)),
            pl.BlockSpec((K * K * cin, cout), lambda i, j: (0, 0)),
            pl.BlockSpec((1, cout), lambda i, j: (0, 0)),
            pl.BlockSpec((1, cout), lambda i, j: (0, 0)),
        ],
        out_specs=pl.BlockSpec((None, None, wo, cout), lambda i, j: (i, j, 0, 0)),
        compiler_params=pltpu.CompilerParams(
            dimension_semantics=("parallel", "parallel")),
    )(xp, w2d, scale.reshape(1, cout), bias.reshape(1, cout))


# ---------------------------------------------------------------------------
# Kernel 4: projection 1x1 conv + folded BN + LeakyReLU + LayerNorm fused.
# ---------------------------------------------------------------------------

def _proj_ln_kernel(x_ref, w_ref, s_ref, b_ref, g_ref, bt_ref, o_ref):
    y = jnp.dot(x_ref[...], w_ref[...], preferred_element_type=jnp.float32)
    y = _lrelu(y * s_ref[...] + b_ref[...])
    mu = jnp.mean(y, axis=-1, keepdims=True)
    var = jnp.mean(jnp.square(y - mu), axis=-1, keepdims=True)
    o_ref[...] = (y - mu) * jax.lax.rsqrt(var + EPS) * g_ref[...] + bt_ref[...]


def proj_layernorm(x2d, w, scale, bias, gamma, beta):
    """x2d: (N, 2*dim) bf16.  Returns (N, dim) f32 (module output)."""
    n, k = x2d.shape
    m = w.shape[1]
    if n >= 4096:
        tile = 512
    elif n >= 512:
        tile = 256
    else:
        tile = 128
    n_pad = _round_up(n, tile)
    if n_pad != n:
        x2d = jnp.pad(x2d, ((0, n_pad - n), (0, 0)))
    out = pl.pallas_call(
        _proj_ln_kernel,
        out_shape=jax.ShapeDtypeStruct((n_pad, m), jnp.float32),
        grid=(n_pad // tile,),
        in_specs=[pl.BlockSpec((tile, k), lambda i: (i, 0)),
                  pl.BlockSpec((k, m), lambda i: (0, 0)),
                  pl.BlockSpec((1, m), lambda i: (0, 0)),
                  pl.BlockSpec((1, m), lambda i: (0, 0)),
                  pl.BlockSpec((1, m), lambda i: (0, 0)),
                  pl.BlockSpec((1, m), lambda i: (0, 0))],
        out_specs=pl.BlockSpec((tile, m), lambda i: (i, 0)),
        compiler_params=pltpu.CompilerParams(dimension_semantics=("parallel",)),
    )(x2d, w, scale.reshape(1, m), bias.reshape(1, m),
      gamma.reshape(1, m), beta.reshape(1, m))
    return out[:n]


# --------------------- parameter setup / weight lowering -------------------

def _bn_params(rng, c):
    gamma = (1.0 + 0.1 * rng.standard_normal(c)).astype(np.float32)
    beta = (0.05 * rng.standard_normal(c)).astype(np.float32)
    mean = (0.05 * rng.standard_normal(c)).astype(np.float32)
    var = (1.0 + 0.1 * np.abs(rng.standard_normal(c))).astype(np.float32)
    return gamma, beta, mean, var


def _fold_bn(conv_bias, bn):
    gamma, beta, mean, var = bn
    s = (gamma / np.sqrt(var + EPS)).astype(np.float32)
    b = ((conv_bias - mean) * s + beta).astype(np.float32)
    return s, b


def _lower_conv1d_bn(wc, bc, stride, pad, d_in, bn):
    """Conv3d with kernel (k,1,1) (per-pixel 1-D conv along the spectral axis)
    lowered to a dense matmul matrix + folded-BN column scale/bias."""
    c_out, c_in, k = wc.shape
    d_out = (d_in + 2 * pad - k) // stride + 1
    m = np.zeros((c_in * d_in, c_out * d_out), np.float32)
    for co in range(c_out):
        for ci in range(c_in):
            for do in range(d_out):
                for kd in range(k):
                    di = do * stride + kd - pad
                    if 0 <= di < d_in:
                        m[ci * d_in + di, co * d_out + do] = wc[co, ci, kd]
    gamma, beta, mean, var = bn
    s_ch = gamma / np.sqrt(var + EPS)
    col_scale = np.repeat(s_ch, d_out).astype(np.float32)
    col_bias = np.repeat((bc - mean) * s_ch + beta, d_out).astype(np.float32)
    return m, col_scale, col_bias, d_out


def _merge_tap_weights(w3, b3c, bn3, w5, b5c, bn5, K=5):
    """Merge the 3x3 (pad 1) and 5x5 (pad 2) branch convs into one
    block-diagonal (K*K, Cin1+Cin2, Cout1+Cout2) tap-weight tensor."""
    c3o, c3i, k3, _ = w3.shape
    c5o, c5i, k5, _ = w5.shape
    assert k5 == K
    wm = np.zeros((K * K, c3i + c5i, c3o + c5o), np.float32)
    off = (K - k3) // 2
    for dh in range(k3):
        for dw in range(k3):
            wm[(dh + off) * K + (dw + off), :c3i, :c3o] = w3[:, :, dh, dw].T
    for dh in range(K):
        for dw in range(K):
            wm[dh * K + dw, c3i:, c3o:] = w5[:, :, dh, dw].T
    s3, bb3 = _fold_bn(b3c, bn3)
    s5, bb5 = _fold_bn(b5c, bn5)
    return wm, np.concatenate([s3, s5]), np.concatenate([bb3, bb5])


def init_patch_embed_params(img_size, in_channels, dim, seed=0):
    rng = np.random.RandomState(seed)

    def conv_w(*shape):
        fan_in = int(np.prod(shape[1:]))
        return (rng.standard_normal(shape) / np.sqrt(fan_in)).astype(np.float32)

    def conv_b(c):
        return (0.02 * rng.standard_normal(c)).astype(np.float32)

    # ---- base_con3d_{1,2,3}: Conv3d(k,1,1) + BN3d + LeakyReLU -> matmuls ----
    d0 = in_channels
    m1, s1, b1, d1 = _lower_conv1d_bn(conv_w(8, 1, 7), conv_b(8), 2, 0, d0,
                                      _bn_params(rng, 8))
    m2, s2, b2, d2 = _lower_conv1d_bn(conv_w(8, 8, 5), conv_b(8), 1, 0, d1,
                                      _bn_params(rng, 8))
    m3, s3, b3, d3 = _lower_conv1d_bn(conv_w(8, 8, 3), conv_b(8), 1, 1, d2,
                                      _bn_params(rng, 8))
    flattened = 8 * d3                      # == self.flattened_size

    # ---- both branches' 1x1 convs, merged along output channels ----
    w1_c1, b1_c1, bn1_c1 = conv_w(dim // 4, flattened, 1, 1), conv_b(dim // 4), _bn_params(rng, dim // 4)
    w2_c1, b2_c1, bn2_c1 = conv_w(dim // 4, flattened, 1, 1), conv_b(dim // 4), _bn_params(rng, dim // 4)
    wc1 = np.concatenate([w1_c1[:, :, 0, 0].T, w2_c1[:, :, 0, 0].T], axis=1)
    s1c, bb1c = _fold_bn(b1_c1, bn1_c1)
    s2c, bb2c = _fold_bn(b2_c1, bn2_c1)
    sc1, bc1 = np.concatenate([s1c, s2c]), np.concatenate([bb1c, bb2c])

    # ---- "c2": 3x3 (branch1) and 5x5 (branch2) merged block-diagonally ----
    wc2, sc2, bc2 = _merge_tap_weights(
        conv_w(dim // 2, dim // 4, 3, 3), conv_b(dim // 2), _bn_params(rng, dim // 2),
        conv_w(dim // 2, dim // 4, 5, 5), conv_b(dim // 2), _bn_params(rng, dim // 2))

    # ---- "c3": 3x3 (branch1) and 5x5 (branch2) merged block-diagonally ----
    wc3, sc3, bc3 = _merge_tap_weights(
        conv_w(dim, dim // 2, 3, 3), conv_b(dim), _bn_params(rng, dim),
        conv_w(dim, dim // 2, 5, 5), conv_b(dim), _bn_params(rng, dim))

    # ---- pro_j: 1x1 conv (2*dim -> dim) + BN + LeakyReLU ----
    wp_, bp_, bnp = conv_w(dim, 2 * dim, 1, 1), conv_b(dim), _bn_params(rng, dim)
    sp_, bbp = _fold_bn(bp_, bnp)
    wproj = wp_[:, :, 0, 0].T               # (2*dim, dim)

    bf = lambda a: jnp.asarray(a, jnp.bfloat16)
    f32 = lambda a: jnp.asarray(a, jnp.float32)
    return {
        'dim': dim,
        'flattened': flattened,
        'spec_c1': [(bf(m1), f32(s1), f32(b1)),
                    (bf(m2), f32(s2), f32(b2)),
                    (bf(m3), f32(s3), f32(b3)),
                    (bf(wc1), f32(sc1), f32(bc1))],
        'c2': (bf(wc2), f32(sc2), f32(bc2)),
        'c3': (bf(wc3), f32(sc3), f32(bc3)),
        'proj': (bf(wproj), f32(sp_), f32(bbp)),
        'ln_gamma': jnp.ones((dim,), jnp.float32),   # nn.LayerNorm default init
        'ln_beta': jnp.zeros((dim,), jnp.float32),
    }


# --------------------------------- forward ---------------------------------

def patch_embed_forward(params, x_nchw):
    b, cin, h, w = x_nchw.shape
    dim = params['dim']

    # spectral chain + merged branch 1x1 convs (one fused kernel, bf16 out)
    # TODO(synk): the NCHW->NHWC transpose of the raw input is still a host-
    # side XLA op (single small pass); not folded into the kernel.
    x2d = jnp.transpose(x_nchw, (0, 2, 3, 1)).reshape(b * h * w, cin)
    y = spectral_c1(x2d.astype(jnp.bfloat16), params['spec_c1'])
    y = y.reshape(b, h, w, dim // 2)          # [branch1 c1 | branch2 c1], bf16

    # stage "c2": merged 3x3/5x5 conv + BN + LReLU + MaxPool2d(2,2,1), fused
    wc2, sc2, bc2 = params['c2']
    y = conv_kxk_bn_lrelu_pool(y, wc2, sc2, bc2, K=5)   # (b, h1, w1, dim) bf16

    # stage "c3": merged 3x3/5x5 conv + BN + LReLU + MaxPool2d(2,2,1), fused
    wc3, sc3, bc3 = params['c3']
    y = conv_kxk_bn_lrelu_pool(y, wc3, sc3, bc3, K=5)   # (b, h2, w2, 2*dim) bf16

    # projection 1x1 conv + folded BN + LeakyReLU + LayerNorm (one kernel)
    bb, h2, w2, cc = y.shape
    n2 = bb * h2 * w2
    wpj, spj, bpj = params['proj']
    out = proj_layernorm(y.reshape(n2, cc), wpj, spj, bpj,
                         params['ln_gamma'], params['ln_beta'])
    # rows are already in 'B m H W -> B (H W) m' order
    return out.reshape(bb, h2 * w2, dim)


if __name__ == "__main__":
    # in_channels must be >= 15 for the spectral conv chain to be valid.
    B, C_IN, IMG, DIM = 2, 16, 16, 32
    params = init_patch_embed_params(IMG, C_IN, DIM, seed=0)

    key = jax.random.PRNGKey(0)
    x = jax.random.normal(key, (B, C_IN, IMG, IMG), dtype=jnp.float32)  # NCHW

    fwd = jax.jit(functools.partial(patch_embed_forward, params))
    out = jax.block_until_ready(fwd(x))

    seq_side = (IMG // 2 + 1) // 2 + 1        # two MaxPool2d(2,2,1): 16 -> 9 -> 5
    assert out.shape == (B, seq_side * seq_side, DIM), out.shape
    assert bool(jnp.all(jnp.isfinite(out)))
    print("KERNEL_OK")
</pallas_src>

<mosaic_0001>
module attributes {stable_mosaic.version = 11 : i64} {
  func.func @_spec_c1_kernel(%arg0: i32, %arg1: memref<256x16xbf16, #tpu.memory_space<vmem>>, %arg2: memref<16x40xbf16, #tpu.memory_space<vmem>>, %arg3: memref<1x40xf32, #tpu.memory_space<vmem>>, %arg4: memref<1x40xf32, #tpu.memory_space<vmem>>, %arg5: memref<40x8xbf16, #tpu.memory_space<vmem>>, %arg6: memref<1x8xf32, #tpu.memory_space<vmem>>, %arg7: memref<1x8xf32, #tpu.memory_space<vmem>>, %arg8: memref<8x8xbf16, #tpu.memory_space<vmem>>, %arg9: memref<1x8xf32, #tpu.memory_space<vmem>>, %arg10: memref<1x8xf32, #tpu.memory_space<vmem>>, %arg11: memref<8x16xbf16, #tpu.memory_space<vmem>>, %arg12: memref<1x16xf32, #tpu.memory_space<vmem>>, %arg13: memref<1x16xf32, #tpu.memory_space<vmem>>, %arg14: memref<256x16xbf16, #tpu.memory_space<vmem>>) attributes {dimension_semantics = [#tpu.dimension_semantics<parallel>], iteration_bounds = array<i64: 2>, scalar_prefetch = 0 : i64, scratch_operands = 0 : i64, tpu.core_type = #tpu.core_type<tc>, window_params = [{transform_indices = @transform_0, window_bounds = array<i64: 256, 16>}, {pipeline_mode = #tpu.pipeline_mode<synchronous>, transform_indices = @transform_1, window_bounds = array<i64: 16, 40>}, {pipeline_mode = #tpu.pipeline_mode<synchronous>, transform_indices = @transform_2, window_bounds = array<i64: 1, 40>}, {pipeline_mode = #tpu.pipeline_mode<synchronous>, transform_indices = @transform_3, window_bounds = array<i64: 1, 40>}, {pipeline_mode = #tpu.pipeline_mode<synchronous>, transform_indices = @transform_4, window_bounds = array<i64: 40, 8>}, {pipeline_mode = #tpu.pipeline_mode<synchronous>, transform_indices = @transform_5, window_bounds = array<i64: 1, 8>}, {pipeline_mode = #tpu.pipeline_mode<synchronous>, transform_indices = @transform_6, window_bounds = array<i64: 1, 8>}, {pipeline_mode = #tpu.pipeline_mode<synchronous>, transform_indices = @transform_7, window_bounds = array<i64: 8, 8>}, {pipeline_mode = #tpu.pipeline_mode<synchronous>, transform_indices = @transform_8, window_bounds = array<i64: 1, 8>}, {pipeline_mode = #tpu.pipeline_mode<synchronous>, transform_indices = @transform_9, window_bounds = array<i64: 1, 8>}, {pipeline_mode = #tpu.pipeline_mode<synchronous>, transform_indices = @transform_10, window_bounds = array<i64: 8, 16>}, {pipeline_mode = #tpu.pipeline_mode<synchronous>, transform_indices = @transform_11, window_bounds = array<i64: 1, 16>}, {pipeline_mode = #tpu.pipeline_mode<synchronous>, transform_indices = @transform_12, window_bounds = array<i64: 1, 16>}, {transform_indices = @transform_13, window_bounds = array<i64: 256, 16>}]} {
    %c0 = arith.constant 0 : index
    %c0_0 = arith.constant 0 : index
    %0 = vector.load %arg1[%c0, %c0_0] : memref<256x16xbf16, #tpu.memory_space<vmem>>, vector<256x16xbf16>
    %c0_1 = arith.constant 0 : index
    %c0_2 = arith.constant 0 : index
    %1 = vector.load %arg2[%c0_1, %c0_2] : memref<16x40xbf16, #tpu.memory_space<vmem>>, vector<16x40xbf16>
    %cst = arith.constant dense<0.000000e+00> : vector<256x40xf32>
    %2 = tpu.matmul %0, %1, %cst {dimension_numbers = #tpu.dot_dimension_numbers<[1], [0], [0], [1], [0, 0, 1, 1], [], []>} : vector<256x16xbf16>, vector<16x40xbf16>, vector<256x40xf32> -> vector<256x40xf32>
    %c0_3 = arith.constant 0 : index
    %c0_4 = arith.constant 0 : index
    %3 = vector.load %arg3[%c0_3, %c0_4] : memref<1x40xf32, #tpu.memory_space<vmem>>, vector<1x40xf32>
    %4 = vector.broadcast %3 : vector<1x40xf32> to vector<256x40xf32>
    %5 = arith.mulf %2, %4 : vector<256x40xf32>
    %c0_5 = arith.constant 0 : index
    %c0_6 = arith.constant 0 : index
    %6 = vector.load %arg4[%c0_5, %c0_6] : memref<1x40xf32, #tpu.memory_space<vmem>>, vector<1x40xf32>
    %7 = vector.broadcast %6 : vector<1x40xf32> to vector<256x40xf32>
    %8 = arith.addf %5, %7 : vector<256x40xf32>
    %cst_7 = arith.constant 0.000000e+00 : f32
    %9 = vector.broadcast %cst_7 : f32 to vector<256x40xf32>
    %10 = arith.cmpf oge, %8, %9 : vector<256x40xf32>
    %cst_8 = arith.constant 0.00999999977 : f32
    %11 = vector.broadcast %cst_8 : f32 to vector<256x40xf32>
    %12 = arith.mulf %11, %8 : vector<256x40xf32>
    %13 = arith.select %10, %8, %12 : vector<256x40xi1>, vector<256x40xf32>
    %14 = arith.truncf %13 : vector<256x40xf32> to vector<256x40xbf16>
    %c0_9 = arith.constant 0 : index
    %c0_10 = arith.constant 0 : index
    %15 = vector.load %arg5[%c0_9, %c0_10] : memref<40x8xbf16, #tpu.memory_space<vmem>>, vector<40x8xbf16>
    %cst_11 = arith.constant dense<0.000000e+00> : vector<256x8xf32>
    %16 = tpu.matmul %14, %15, %cst_11 {dimension_numbers = #tpu.dot_dimension_numbers<[1], [0], [0], [1], [0, 0, 1, 1], [], []>} : vector<256x40xbf16>, vector<40x8xbf16>, vector<256x8xf32> -> vector<256x8xf32>
    %c0_12 = arith.constant 0 : index
    %c0_13 = arith.constant 0 : index
    %17 = vector.load %arg6[%c0_12, %c0_13] : memref<1x8xf32, #tpu.memory_space<vmem>>, vector<1x8xf32>
    %18 = vector.broadcast %17 : vector<1x8xf32> to vector<256x8xf32>
    %19 = arith.mulf %16, %18 : vector<256x8xf32>
    %c0_14 = arith.constant 0 : index
    %c0_15 = arith.constant 0 : index
    %20 = vector.load %arg7[%c0_14, %c0_15] : memref<1x8xf32, #tpu.memory_space<vmem>>, vector<1x8xf32>
    %21 = vector.broadcast %20 : vector<1x8xf32> to vector<256x8xf32>
    %22 = arith.addf %19, %21 : vector<256x8xf32>
    %cst_16 = arith.constant 0.000000e+00 : f32
    %23 = vector.broadcast %cst_16 : f32 to vector<256x8xf32>
    %24 = arith.cmpf oge, %22, %23 : vector<256x8xf32>
    %cst_17 = arith.constant 0.00999999977 : f32
    %25 = vector.broadcast %cst_17 : f32 to vector<256x8xf32>
    %26 = arith.mulf %25, %22 : vector<256x8xf32>
    %27 = arith.select %24, %22, %26 : vector<256x8xi1>, vector<256x8xf32>
    %28 = arith.truncf %27 : vector<256x8xf32> to vector<256x8xbf16>
    %c0_18 = arith.constant 0 : index
    %c0_19 = arith.constant 0 : index
    %29 = vector.load %arg8[%c0_18, %c0_19] : memref<8x8xbf16, #tpu.memory_space<vmem>>, vector<8x8xbf16>
    %cst_20 = arith.constant dense<0.000000e+00> : vector<256x8xf32>
    %30 = tpu.matmul %28, %29, %cst_20 {dimension_numbers = #tpu.dot_dimension_numbers<[1], [0], [0], [1], [0, 0, 1, 1], [], []>} : vector<256x8xbf16>, vector<8x8xbf16>, vector<256x8xf32> -> vector<256x8xf32>
    %c0_21 = arith.constant 0 : index
    %c0_22 = arith.constant 0 : index
    %31 = vector.load %arg9[%c0_21, %c0_22] : memref<1x8xf32, #tpu.memory_space<vmem>>, vector<1x8xf32>
    %32 = vector.broadcast %31 : vector<1x8xf32> to vector<256x8xf32>
    %33 = arith.mulf %30, %32 : vector<256x8xf32>
    %c0_23 = arith.constant 0 : index
    %c0_24 = arith.constant 0 : index
    %34 = vector.load %arg10[%c0_23, %c0_24] : memref<1x8xf32, #tpu.memory_space<vmem>>, vector<1x8xf32>
    %35 = vector.broadcast %34 : vector<1x8xf32> to vector<256x8xf32>
    %36 = arith.addf %33, %35 : vector<256x8xf32>
    %cst_25 = arith.constant 0.000000e+00 : f32
    %37 = vector.broadcast %cst_25 : f32 to vector<256x8xf32>
    %38 = arith.cmpf oge, %36, %37 : vector<256x8xf32>
    %cst_26 = arith.constant 0.00999999977 : f32
    %39 = vector.broadcast %cst_26 : f32 to vector<256x8xf32>
    %40 = arith.mulf %39, %36 : vector<256x8xf32>
    %41 = arith.select %38, %36, %40 : vector<256x8xi1>, vector<256x8xf32>
    %42 = arith.truncf %41 : vector<256x8xf32> to vector<256x8xbf16>
    %c0_27 = arith.constant 0 : index
    %c0_28 = arith.constant 0 : index
    %43 = vector.load %arg11[%c0_27, %c0_28] : memref<8x16xbf16, #tpu.memory_space<vmem>>, vector<8x16xbf16>
    %cst_29 = arith.constant dense<0.000000e+00> : vector<256x16xf32>
    %44 = tpu.matmul %42, %43, %cst_29 {dimension_numbers = #tpu.dot_dimension_numbers<[1], [0], [0], [1], [0, 0, 1, 1], [], []>} : vector<256x8xbf16>, vector<8x16xbf16>, vector<256x16xf32> -> vector<256x16xf32>
    %c0_30 = arith.constant 0 : index
    %c0_31 = arith.constant 0 : index
    %45 = vector.load %arg12[%c0_30, %c0_31] : memref<1x16xf32, #tpu.memory_space<vmem>>, vector<1x16xf32>
    %46 = vector.broadcast %45 : vector<1x16xf32> to vector<256x16xf32>
    %47 = arith.mulf %44, %46 : vector<256x16xf32>
    %c0_32 = arith.constant 0 : index
    %c0_33 = arith.constant 0 : index
    %48 = vector.load %arg13[%c0_32, %c0_33] : memref<1x16xf32, #tpu.memory_space<vmem>>, vector<1x16xf32>
    %49 = vector.broadcast %48 : vector<1x16xf32> to vector<256x16xf32>
    %50 = arith.addf %47, %49 : vector<256x16xf32>
    %cst_34 = arith.constant 0.000000e+00 : f32
    %51 = vector.broadcast %cst_34 : f32 to vector<256x16xf32>
    %52 = arith.cmpf oge, %50, %51 : vector<256x16xf32>
    %cst_35 = arith.constant 0.00999999977 : f32
    %53 = vector.broadcast %cst_35 : f32 to vector<256x16xf32>
    %54 = arith.mulf %53, %50 : vector<256x16xf32>
    %55 = arith.select %52, %50, %54 : vector<256x16xi1>, vector<256x16xf32>
    %56 = arith.truncf %55 : vector<256x16xf32> to vector<256x16xbf16>
    %c0_36 = arith.constant 0 : index
    %c0_37 = arith.constant 0 : index
    %57 = vector.load %arg14[%c0_36, %c0_37] : memref<256x16xbf16, #tpu.memory_space<vmem>>, vector<256x16xbf16>
    tpu.vector_store %arg14[%c0_36, %c0_37], %56 {strides = array<i32>} : memref<256x16xbf16, #tpu.memory_space<vmem>>, vector<256x16xbf16>,
    return
  }
  func.func @transform_0(%arg0: i32) -> (i32, i32) {
    %c0_i32 = arith.constant 0 : i32
    %c0_i32_0 = arith.constant 0 : i32
    return %arg0, %c0_i32 : i32, i32
  }
  func.func @transform_1(%arg0: i32) -> (i32, i32) {
    %c0_i32 = arith.constant 0 : i32
    %c0_i32_0 = arith.constant 0 : i32
    %c0_i32_1 = arith.constant 0 : i32
    return %c0_i32, %c0_i32_0 : i32, i32
  }
  func.func @transform_2(%arg0: i32) -> (i32, i32) {
    %c0_i32 = arith.constant 0 : i32
    %c0_i32_0 = arith.constant 0 : i32
    %c0_i32_1 = arith.constant 0 : i32
    return %c0_i32, %c0_i32_0 : i32, i32
  }
  func.func @transform_3(%arg0: i32) -> (i32, i32) {
    %c0_i32 = arith.constant 0 : i32
    %c0_i32_0 = arith.constant 0 : i32
    %c0_i32_1 = arith.constant 0 : i32
    return %c0_i32, %c0_i32_0 : i32, i32
  }
  func.func @transform_4(%arg0: i32) -> (i32, i32) {
    %c0_i32 = arith.constant 0 : i32
    %c0_i32_0 = arith.constant 0 : i32
    %c0_i32_1 = arith.constant 0 : i32
    return %c0_i32, %c0_i32_0 : i32, i32
  }
  func.func @transform_5(%arg0: i32) -> (i32, i32) {
    %c0_i32 = arith.constant 0 : i32
    %c0_i32_0 = arith.constant 0 : i32
    %c0_i32_1 = arith.constant 0 : i32
    return %c0_i32, %c0_i32_0 : i32, i32
  }
  func.func @transform_6(%arg0: i32) -> (i32, i32) {
    %c0_i32 = arith.constant 0 : i32
    %c0_i32_0 = arith.constant 0 : i32
    %c0_i32_1 = arith.constant 0 : i32
    return %c0_i32, %c0_i32_0 : i32, i32
  }
  func.func @transform_7(%arg0: i32) -> (i32, i32) {
    %c0_i32 = arith.constant 0 : i32
    %c0_i32_0 = arith.constant 0 : i32
    %c0_i32_1 = arith.constant 0 : i32
    return %c0_i32, %c0_i32_0 : i32, i32
  }
  func.func @transform_8(%arg0: i32) -> (i32, i32) {
    %c0_i32 = arith.constant 0 : i32
    %c0_i32_0 = arith.constant 0 : i32
    %c0_i32_1 = arith.constant 0 : i32
    return %c0_i32, %c0_i32_0 : i32, i32
  }
  func.func @transform_9(%arg0: i32) -> (i32, i32) {
    %c0_i32 = arith.constant 0 : i32
    %c0_i32_0 = arith.constant 0 : i32
    %c0_i32_1 = arith.constant 0 : i32
    return %c0_i32, %c0_i32_0 : i32, i32
  }
  func.func @transform_10(%arg0: i32) -> (i32, i32) {
    %c0_i32 = arith.constant 0 : i32
    %c0_i32_0 = arith.constant 0 : i32
    %c0_i32_1 = arith.constant 0 : i32
    return %c0_i32, %c0_i32_0 : i32, i32
  }
  func.func @transform_11(%arg0: i32) -> (i32, i32) {
    %c0_i32 = arith.constant 0 : i32
    %c0_i32_0 = arith.constant 0 : i32
    %c0_i32_1 = arith.constant 0 : i32
    return %c0_i32, %c0_i32_0 : i32, i32
  }
  func.func @transform_12(%arg0: i32) -> (i32, i32) {
    %c0_i32 = arith.constant 0 : i32
    %c0_i32_0 = arith.constant 0 : i32
    %c0_i32_1 = arith.constant 0 : i32
    return %c0_i32, %c0_i32_0 : i32, i32
  }
  func.func @transform_13(%arg0: i32) -> (i32, i32) {
    %c0_i32 = arith.constant 0 : i32
    %c0_i32_0 = arith.constant 0 : i32
    return %arg0, %c0_i32 : i32, i32
  }
}

module attributes {stable_mosaic.version = 11 : i64} {
  func.func @kernel(%arg0: i32, %arg1: i32, %arg2: memref<1x20x20x16xbf16, #tpu.memory_space<vmem>>, %arg3: memref<400x32xbf16, #tpu.memory_space<vmem>>, %arg4: memref<1x32xf32, #tpu.memory_space<vmem>>, %arg5: memref<1x32xf32, #tpu.memory_space<vmem>>, %arg6: memref<1x1x9x32xbf16, #tpu.memory_space<vmem>>) attributes {dimension_semantics = [#tpu.dimension_semantics<parallel>, #tpu.dimension_semantics<parallel>], iteration_bounds = array<i64: 2, 9>, scalar_prefetch = 0 : i64, scratch_operands = 0 : i64, tpu.core_type = #tpu.core_type<tc>, window_params = [{transform_indices = @transform_0, window_bounds = array<i64: 1, 20, 20, 16>}, {pipeline_mode = #tpu.pipeline_mode<synchronous>, transform_indices = @transform_1, window_bounds = array<i64: 400, 32>}, {pipeline_mode = #tpu.pipeline_mode<synchronous>, transform_indices = @transform_2, window_bounds = array<i64: 1, 32>}, {pipeline_mode = #tpu.pipeline_mode<synchronous>, transform_indices = @transform_3, window_bounds = array<i64: 1, 32>}, {transform_indices = @transform_4, window_bounds = array<i64: 1, 1, 9, 32>}]} {
    %c2_i32 = arith.constant 2 : i32
    %0 = arith.muli %c2_i32, %arg1 : i32
    %c1_i32 = arith.constant 1 : i32
    %1 = arith.subi %0, %c1_i32 : i32
    %c0_i32 = arith.constant 0 : i32
    %2 = arith.maxsi %1, %c0_i32 : i32
    %c2_i32_0 = arith.constant 2 : i32
    %3 = arith.muli %c2_i32_0, %arg1 : i32
    %c15_i32 = arith.constant 15 : i32
    %4 = arith.minsi %3, %c15_i32 : i32
    %c0_i32_1 = arith.constant 0 : i32
    %5 = arith.addi %2, %c0_i32_1 : i32
    %c0 = arith.constant 0 : index
    %6 = arith.index_cast %5 : i32 to index
    %c0_2 = arith.constant 0 : index
    %c0_3 = arith.constant 0 : index
    %7 = vector.load %arg2[%c0, %6, %c0_2, %c0_3] : memref<1x20x20x16xbf16, #tpu.memory_space<vmem>>, vector<1x1x20x16xbf16>
    %8 = vector.shape_cast %7 : vector<1x1x20x16xbf16> to vector<20x16xbf16>
    %9 = vector.extract_strided_slice %8 {offsets = [0, 0], sizes = [16, 16], strides = [1, 1]} : vector<20x16xbf16> to vector<16x16xbf16>
    %10 = vector.extract_strided_slice %8 {offsets = [1, 0], sizes = [16, 16], strides = [1, 1]} : vector<20x16xbf16> to vector<16x16xbf16>
    %11 = vector.extract_strided_slice %8 {offsets = [2, 0], sizes = [16, 16], strides = [1, 1]} : vector<20x16xbf16> to vector<16x16xbf16>
    %12 = vector.extract_strided_slice %8 {offsets = [3, 0], sizes = [16, 16], strides = [1, 1]} : vector<20x16xbf16> to vector<16x16xbf16>
    %13 = vector.extract_strided_slice %8 {offsets = [4, 0], sizes = [16, 16], strides = [1, 1]} : vector<20x16xbf16> to vector<16x16xbf16>
    %c1_i32_4 = arith.constant 1 : i32
    %14 = arith.addi %2, %c1_i32_4 : i32
    %c0_5 = arith.constant 0 : index
    %15 = arith.index_cast %14 : i32 to index
    %c0_6 = arith.constant 0 : index
    %c0_7 = arith.constant 0 : index
    %16 = vector.load %arg2[%c0_5, %15, %c0_6, %c0_7] : memref<1x20x20x16xbf16, #tpu.memory_space<vmem>>, vector<1x1x20x16xbf16>
    %17 = vector.shape_cast %16 : vector<1x1x20x16xbf16> to vector<20x16xbf16>
    %18 = vector.extract_strided_slice %17 {offsets = [0, 0], sizes = [16, 16], strides = [1, 1]} : vector<20x16xbf16> to vector<16x16xbf16>
    %19 = vector.extract_strided_slice %17 {offsets = [1, 0], sizes = [16, 16], strides = [1, 1]} : vector<20x16xbf16> to vector<16x16xbf16>
    %20 = vector.extract_strided_slice %17 {offsets = [2, 0], sizes = [16, 16], strides = [1, 1]} : vector<20x16xbf16> to vector<16x16xbf16>
    %21 = vector.extract_strided_slice %17 {offsets = [3, 0], sizes = [16, 16], strides = [1, 1]} : vector<20x16xbf16> to vector<16x16xbf16>
    %22 = vector.extract_strided_slice %17 {offsets = [4, 0], sizes = [16, 16], strides = [1, 1]} : vector<20x16xbf16> to vector<16x16xbf16>
    %c2_i32_8 = arith.constant 2 : i32
    %23 = arith.addi %2, %c2_i32_8 : i32
    %c0_9 = arith.constant 0 : index
    %24 = arith.index_cast %23 : i32 to index
    %c0_10 = arith.constant 0 : index
    %c0_11 = arith.constant 0 : index
    %25 = vector.load %arg2[%c0_9, %24, %c0_10, %c0_11] : memref<1x20x20x16xbf16, #tpu.memory_space<vmem>>, vector<1x1x20x16xbf16>
    %26 = vector.shape_cast %25 : vector<1x1x20x16xbf16> to vector<20x16xbf16>
    %27 = vector.extract_strided_slice %26 {offsets = [0, 0], sizes = [16, 16], strides = [1, 1]} : vector<20x16xbf16> to vector<16x16xbf16>
    %28 = vector.extract_strided_slice %26 {offsets = [1, 0], sizes = [16, 16], strides = [1, 1]} : vector<20x16xbf16> to vector<16x16xbf16>
    %29 = vector.extract_strided_slice %26 {offsets = [2, 0], sizes = [16, 16], strides = [1, 1]} : vector<20x16xbf16> to vector<16x16xbf16>
    %30 = vector.extract_strided_slice %26 {offsets = [3, 0], sizes = [16, 16], strides = [1, 1]} : vector<20x16xbf16> to vector<16x16xbf16>
    %31 = vector.extract_strided_slice %26 {offsets = [4, 0], sizes = [16, 16], strides = [1, 1]} : vector<20x16xbf16> to vector<16x16xbf16>
    %c3_i32 = arith.constant 3 : i32
    %32 = arith.addi %2, %c3_i32 : i32
    %c0_12 = arith.constant 0 : index
    %33 = arith.index_cast %32 : i32 to index
    %c0_13 = arith.constant 0 : index
    %c0_14 = arith.constant 0 : index
    %34 = vector.load %arg2[%c0_12, %33, %c0_13, %c0_14] : memref<1x20x20x16xbf16, #tpu.memory_space<vmem>>, vector<1x1x20x16xbf16>
    %35 = vector.shape_cast %34 : vector<1x1x20x16xbf16> to vector<20x16xbf16>
    %36 = vector.extract_strided_slice %35 {offsets = [0, 0], sizes = [16, 16], strides = [1, 1]} : vector<20x16xbf16> to vector<16x16xbf16>
    %37 = vector.extract_strided_slice %35 {offsets = [1, 0], sizes = [16, 16], strides = [1, 1]} : vector<20x16xbf16> to vector<16x16xbf16>
    %38 = vector.extract_strided_slice %35 {offsets = [2, 0], sizes = [16, 16], strides = [1, 1]} : vector<20x16xbf16> to vector<16x16xbf16>
    %39 = vector.extract_strided_slice %35 {offsets = [3, 0], sizes = [16, 16], strides = [1, 1]} : vector<20x16xbf16> to vector<16x16xbf16>
    %40 = vector.extract_strided_slice %35 {offsets = [4, 0], sizes = [16, 16], strides = [1, 1]} : vector<20x16xbf16> to vector<16x16xbf16>
    %c4_i32 = arith.constant 4 : i32
    %41 = arith.addi %2, %c4_i32 : i32
    %c0_15 = arith.constant 0 : index
    %42 = arith.index_cast %41 : i32 to index
    %c0_16 = arith.constant 0 : index
    %c0_17 = arith.constant 0 : index
    %43 = vector.load %arg2[%c0_15, %42, %c0_16, %c0_17] : memref<1x20x20x16xbf16, #tpu.memory_space<vmem>>, vector<1x1x20x16xbf16>
    %44 = vector.shape_cast %43 : vector<1x1x20x16xbf16> to vector<20x16xbf16>
    %45 = vector.extract_strided_slice %44 {offsets = [0, 0], sizes = [16, 16], strides = [1, 1]} : vector<20x16xbf16> to vector<16x16xbf16>
    %46 = vector.extract_strided_slice %44 {offsets = [1, 0], sizes = [16, 16], strides = [1, 1]} : vector<20x16xbf16> to vector<16x16xbf16>
    %47 = vector.extract_strided_slice %44 {offsets = [2, 0], sizes = [16, 16], strides = [1, 1]} : vector<20x16xbf16> to vector<16x16xbf16>
    %48 = vector.extract_strided_slice %44 {offsets = [3, 0], sizes = [16, 16], strides = [1, 1]} : vector<20x16xbf16> to vector<16x16xbf16>
    %49 = vector.extract_strided_slice %44 {offsets = [4, 0], sizes = [16, 16], strides = [1, 1]} : vector<20x16xbf16> to vector<16x16xbf16>
    %50 = tpu.concatenate %9, %10, %11, %12, %13, %18, %19, %20, %21, %22, %27, %28, %29, %30, %31, %36 in 1 : vector<16x16xbf16>, vector<16x16xbf16>, vector<16x16xbf16>, vector<16x16xbf16>, vector<16x16xbf16>, vector<16x16xbf16>, vector<16x16xbf16>, vector<16x16xbf16>, vector<16x16xbf16>, vector<16x16xbf16>, vector<16x16xbf16>, vector<16x16xbf16>, vector<16x16xbf16>, vector<16x16xbf16>, vector<16x16xbf16>, vector<16x16xbf16> -> vector<16x256xbf16>
    %51 = tpu.concatenate %37, %38, %39, %40, %45, %46, %47, %48, %49 in 1 : vector<16x16xbf16>, vector<16x16xbf16>, vector<16x16xbf16>, vector<16x16xbf16>, vector<16x16xbf16>, vector<16x16xbf16>, vector<16x16xbf16>, vector<16x16xbf16>, vector<16x16xbf16> -> vector<16x144xbf16>
    %52 = tpu.concatenate %50, %51 in 1 : vector<16x256xbf16>, vector<16x144xbf16> -> vector<16x400xbf16>
    %c0_i32_18 = arith.constant 0 : i32
    %53 = arith.addi %4, %c0_i32_18 : i32
    %c0_19 = arith.constant 0 : index
    %54 = arith.index_cast %53 : i32 to index
    %c0_20 = arith.constant 0 : index
    %c0_21 = arith.constant 0 : index
    %55 = vector.load %arg2[%c0_19, %54, %c0_20, %c0_21] : memref<1x20x20x16xbf16, #tpu.memory_space<vmem>>, vector<1x1x20x16xbf16>
    %56 = vector.shape_cast %55 : vector<1x1x20x16xbf16> to vector<20x16xbf16>
    %57 = vector.extract_strided_slice %56 {offsets = [0, 0], sizes = [16, 16], strides = [1, 1]} : vector<20x16xbf16> to vector<16x16xbf16>
    %58 = vector.extract_strided_slice %56 {offsets = [1, 0], sizes = [16, 16], strides = [1, 1]} : vector<20x16xbf16> to vector<16x16xbf16>
    %59 = vector.extract_strided_slice %56 {offsets = [2, 0], sizes = [16, 16], strides = [1, 1]} : vector<20x16xbf16> to vector<16x16xbf16>
    %60 = vector.extract_strided_slice %56 {offsets = [3, 0], sizes = [16, 16], strides = [1, 1]} : vector<20x16xbf16> to vector<16x16xbf16>
    %61 = vector.extract_strided_slice %56 {offsets = [4, 0], sizes = [16, 16], strides = [1, 1]} : vector<20x16xbf16> to vector<16x16xbf16>
    %c1_i32_22 = arith.constant 1 : i32
    %62 = arith.addi %4, %c1_i32_22 : i32
    %c0_23 = arith.constant 0 : index
    %63 = arith.index_cast %62 : i32 to index
    %c0_24 = arith.constant 0 : index
    %c0_25 = arith.constant 0 : index
    %64 = vector.load %arg2[%c0_23, %63, %c0_24, %c0_25] : memref<1x20x20x16xbf16, #tpu.memory_space<vmem>>, vector<1x1x20x16xbf16>
    %65 = vector.shape_cast %64 : vector<1x1x20x16xbf16> to vector<20x16xbf16>
    %66 = vector.extract_strided_slice %65 {offsets = [0, 0], sizes = [16, 16], strides = [1, 1]} : vector<20x16xbf16> to vector<16x16xbf16>
    %67 = vector.extract_strided_slice %65 {offsets = [1, 0], sizes = [16, 16], strides = [1, 1]} : vector<20x16xbf16> to vector<16x16xbf16>
    %68 = vector.extract_strided_slice %65 {offsets = [2, 0], sizes = [16, 16], strides = [1, 1]} : vector<20x16xbf16> to vector<16x16xbf16>
    %69 = vector.extract_strided_slice %65 {offsets = [3, 0], sizes = [16, 16], strides = [1, 1]} : vector<20x16xbf16> to vector<16x16xbf16>
    %70 = vector.extract_strided_slice %65 {offsets = [4, 0], sizes = [16, 16], strides = [1, 1]} : vector<20x16xbf16> to vector<16x16xbf16>
    %c2_i32_26 = arith.constant 2 : i32
    %71 = arith.addi %4, %c2_i32_26 : i32
    %c0_27 = arith.constant 0 : index
    %72 = arith.index_cast %71 : i32 to index
    %c0_28 = arith.constant 0 : index
    %c0_29 = arith.constant 0 : index
    %73 = vector.load %arg2[%c0_27, %72, %c0_28, %c0_29] : memref<1x20x20x16xbf16, #tpu.memory_space<vmem>>, vector<1x1x20x16xbf16>
    %74 = vector.shape_cast %73 : vector<1x1x20x16xbf16> to vector<20x16xbf16>
    %75 = vector.extract_strided_slice %74 {offsets = [0, 0], sizes = [16, 16], strides = [1, 1]} : vector<20x16xbf16> to vector<16x16xbf16>
    %76 = vector.extract_strided_slice %74 {offsets = [1, 0], sizes = [16, 16], strides = [1, 1]} : vector<20x16xbf16> to vector<16x16xbf16>
    %77 = vector.extract_strided_slice %74 {offsets = [2, 0], sizes = [16, 16], strides = [1, 1]} : vector<20x16xbf16> to vector<16x16xbf16>
    %78 = vector.extract_strided_slice %74 {offsets = [3, 0], sizes = [16, 16], strides = [1, 1]} : vector<20x16xbf16> to vector<16x16xbf16>
    %79 = vector.extract_strided_slice %74 {offsets = [4, 0], sizes = [16, 16], strides = [1, 1]} : vector<20x16xbf16> to vector<16x16xbf16>
    %c3_i32_30 = arith.constant 3 : i32
    %80 = arith.addi %4, %c3_i32_30 : i32
    %c0_31 = arith.constant 0 : index
    %81 = arith.index_cast %80 : i32 to index
    %c0_32 = arith.constant 0 : index
    %c0_33 = arith.constant 0 : index
    %82 = vector.load %arg2[%c0_31, %81, %c0_32, %c0_33] : memref<1x20x20x16xbf16, #tpu.memory_space<vmem>>, vector<1x1x20x16xbf16>
    %83 = vector.shape_cast %82 : vector<1x1x20x16xbf16> to vector<20x16xbf16>
    %84 = vector.extract_strided_slice %83 {offsets = [0, 0], sizes = [16, 16], strides = [1, 1]} : vector<20x16xbf16> to vector<16x16xbf16>
    %85 = vector.extract_strided_slice %83 {offsets = [1, 0], sizes = [16, 16], strides = [1, 1]} : vector<20x16xbf16> to vector<16x16xbf16>
    %86 = vector.extract_strided_slice %83 {offsets = [2, 0], sizes = [16, 16], strides = [1, 1]} : vector<20x16xbf16> to vector<16x16xbf16>
    %87 = vector.extract_strided_slice %83 {offsets = [3, 0], sizes = [16, 16], strides = [1, 1]} : vector<20x16xbf16> to vector<16x16xbf16>
    %88 = vector.extract_strided_slice %83 {offsets = [4, 0], sizes = [16, 16], strides = [1, 1]} : vector<20x16xbf16> to vector<16x16xbf16>
    %c4_i32_34 = arith.constant 4 : i32
    %89 = arith.addi %4, %c4_i32_34 : i32
    %c0_35 = arith.constant 0 : index
    %90 = arith.index_cast %89 : i32 to index
    %c0_36 = arith.constant 0 : index
    %c0_37 = arith.constant 0 : index
    %91 = vector.load %arg2[%c0_35, %90, %c0_36, %c0_37] : memref<1x20x20x16xbf16, #tpu.memory_space<vmem>>, vector<1x1x20x16xbf16>
    %92 = vector.shape_cast %91 : vector<1x1x20x16xbf16> to vector<20x16xbf16>
    %93 = vector.extract_strided_slice %92 {offsets = [0, 0], sizes = [16, 16], strides = [1, 1]} : vector<20x16xbf16> to vector<16x16xbf16>
    %94 = vector.extract_strided_slice %92 {offsets = [1, 0], sizes = [16, 16], strides = [1, 1]} : vector<20x16xbf16> to vector<16x16xbf16>
    %95 = vector.extract_strided_slice %92 {offsets = [2, 0], sizes = [16, 16], strides = [1, 1]} : vector<20x16xbf16> to vector<16x16xbf16>
    %96 = vector.extract_strided_slice %92 {offsets = [3, 0], sizes = [16, 16], strides = [1, 1]} : vector<20x16xbf16> to vector<16x16xbf16>
    %97 = vector.extract_strided_slice %92 {offsets = [4, 0], sizes = [16, 16], strides = [1, 1]} : vector<20x16xbf16> to vector<16x16xbf16>
    %98 = tpu.concatenate %57, %58, %59, %60, %61, %66, %67, %68, %69, %70, %75, %76, %77, %78, %79, %84 in 1 : vector<16x16xbf16>, vector<16x16xbf16>, vector<16x16xbf16>, vector<16x16xbf16>, vector<16x16xbf16>, vector<16x16xbf16>, vector<16x16xbf16>, vector<16x16xbf16>, vector<16x16xbf16>, vector<16x16xbf16>, vector<16x16xbf16>, vector<16x16xbf16>, vector<16x16xbf16>, vector<16x16xbf16>, vector<16x16xbf16>, vector<16x16xbf16> -> vector<16x256xbf16>
    %99 = tpu.concatenate %85, %86, %87, %88, %93, %94, %95, %96, %97 in 1 : vector<16x16xbf16>, vector<16x16xbf16>, vector<16x16xbf16>, vector<16x16xbf16>, vector<16x16xbf16>, vector<16x16xbf16>, vector<16x16xbf16>, vector<16x16xbf16>, vector<16x16xbf16> -> vector<16x144xbf16>
    %100 = tpu.concatenate %98, %99 in 1 : vector<16x256xbf16>, vector<16x144xbf16> -> vector<16x400xbf16>
    %101 = tpu.concatenate %52, %100 in 0 : vector<16x400xbf16>, vector<16x400xbf16> -> vector<32x400xbf16>
    %c0_38 = arith.constant 0 : index
    %c0_39 = arith.constant 0 : index
    %102 = vector.load %arg3[%c0_38, %c0_39] : memref<400x32xbf16, #tpu.memory_space<vmem>>, vector<400x32xbf16>
    %cst = arith.constant dense<0.000000e+00> : vector<32x32xf32>
    %103 = tpu.matmul %101, %102, %cst {dimension_numbers = #tpu.dot_dimension_numbers<[1], [0], [0], [1], [0, 0, 1, 1], [], []>} : vector<32x400xbf16>, vector<400x32xbf16>, vector<32x32xf32> -> vector<32x32xf32>
    %c0_40 = arith.constant 0 : index
    %c0_41 = arith.constant 0 : index
    %104 = vector.load %arg4[%c0_40, %c0_41] : memref<1x32xf32, #tpu.memory_space<vmem>>, vector<1x32xf32>
    %105 = vector.broadcast %104 : vector<1x32xf32> to vector<32x32xf32>
    %106 = arith.mulf %103, %105 : vector<32x32xf32>
    %c0_42 = arith.constant 0 : index
    %c0_43 = arith.constant 0 : index
    %107 = vector.load %arg5[%c0_42, %c0_43] : memref<1x32xf32, #tpu.memory_space<vmem>>, vector<1x32xf32>
    %108 = vector.broadcast %107 : vector<1x32xf32> to vector<32x32xf32>
    %109 = arith.addf %106, %108 : vector<32x32xf32>
    %cst_44 = arith.constant 0.000000e+00 : f32
    %110 = vector.broadcast %cst_44 : f32 to vector<32x32xf32>
    %111 = arith.cmpf oge, %109, %110 : vector<32x32xf32>
    %cst_45 = arith.constant 0.00999999977 : f32
    %112 = vector.broadcast %cst_45 : f32 to vector<32x32xf32>
    %113 = arith.mulf %112, %109 : vector<32x32xf32>
    %114 = arith.select %111, %109, %113 : vector<32x32xi1>, vector<32x32xf32>
    %115 = vector.extract_strided_slice %114 {offsets = [0, 0], sizes = [16, 32], strides = [1, 1]} : vector<32x32xf32> to vector<16x32xf32>
    %116 = vector.extract_strided_slice %114 {offsets = [16, 0], sizes = [16, 32], strides = [1, 1]} : vector<32x32xf32> to vector<16x32xf32>
    %117 = arith.maximumf %115, %116 : vector<16x32xf32>
    %118 = vector.extract_strided_slice %117 {offsets = [0, 0], sizes = [1, 32], strides = [1, 1]} : vector<16x32xf32> to vector<1x32xf32>
    %119 = vector.extract_strided_slice %117 {offsets = [0, 0], sizes = [1, 32], strides = [1, 1]} : vector<16x32xf32> to vector<1x32xf32>
    %120 = arith.maximumf %118, %119 : vector<1x32xf32>
    %121 = vector.extract_strided_slice %117 {offsets = [1, 0], sizes = [1, 32], strides = [1, 1]} : vector<16x32xf32> to vector<1x32xf32>
    %122 = vector.extract_strided_slice %117 {offsets = [2, 0], sizes = [1, 32], strides = [1, 1]} : vector<16x32xf32> to vector<1x32xf32>
    %123 = arith.maximumf %121, %122 : vector<1x32xf32>
    %124 = vector.extract_strided_slice %117 {offsets = [3, 0], sizes = [1, 32], strides = [1, 1]} : vector<16x32xf32> to vector<1x32xf32>
    %125 = vector.extract_strided_slice %117 {offsets = [4, 0], sizes = [1, 32], strides = [1, 1]} : vector<16x32xf32> to vector<1x32xf32>
    %126 = arith.maximumf %124, %125 : vector<1x32xf32>
    %127 = vector.extract_strided_slice %117 {offsets = [5, 0], sizes = [1, 32], strides = [1, 1]} : vector<16x32xf32> to vector<1x32xf32>
    %128 = vector.extract_strided_slice %117 {offsets = [6, 0], sizes = [1, 32], strides = [1, 1]} : vector<16x32xf32> to vector<1x32xf32>
    %129 = arith.maximumf %127, %128 : vector<1x32xf32>
    %130 = vector.extract_strided_slice %117 {offsets = [7, 0], sizes = [1, 32], strides = [1, 1]} : vector<16x32xf32> to vector<1x32xf32>
    %131 = vector.extract_strided_slice %117 {offsets = [8, 0], sizes = [1, 32], strides = [1, 1]} : vector<16x32xf32> to vector<1x32xf32>
    %132 = arith.maximumf %130, %131 : vector<1x32xf32>
    %133 = vector.extract_strided_slice %117 {offsets = [9, 0], sizes = [1, 32], strides = [1, 1]} : vector<16x32xf32> to vector<1x32xf32>
    %134 = vector.extract_strided_slice %117 {offsets = [10, 0], sizes = [1, 32], strides = [1, 1]} : vector<16x32xf32> to vector<1x32xf32>
    %135 = arith.maximumf %133, %134 : vector<1x32xf32>
    %136 = vector.extract_strided_slice %117 {offsets = [11, 0], sizes = [1, 32], strides = [1, 1]} : vector<16x32xf32> to vector<1x32xf32>
    %137 = vector.extract_strided_slice %117 {offsets = [12, 0], sizes = [1, 32], strides = [1, 1]} : vector<16x32xf32> to vector<1x32xf32>
    %138 = arith.maximumf %136, %137 : vector<1x32xf32>
    %139 = vector.extract_strided_slice %117 {offsets = [13, 0], sizes = [1, 32], strides = [1, 1]} : vector<16x32xf32> to vector<1x32xf32>
    %140 = vector.extract_strided_slice %117 {offsets = [14, 0], sizes = [1, 32], strides = [1, 1]} : vector<16x32xf32> to vector<1x32xf32>
    %141 = arith.maximumf %139, %140 : vector<1x32xf32>
    %142 = vector.extract_strided_slice %117 {offsets = [15, 0], sizes = [1, 32], strides = [1, 1]} : vector<16x32xf32> to vector<1x32xf32>
    %143 = vector.extract_strided_slice %117 {offsets = [15, 0], sizes = [1, 32], strides = [1, 1]} : vector<16x32xf32> to vector<1x32xf32>
    %144 = arith.maximumf %142, %143 : vector<1x32xf32>
    %145 = tpu.concatenate %120, %123, %126, %129, %132, %135, %138, %141, %144 in 0 : vector<1x32xf32>, vector<1x32xf32>, vector<1x32xf32>, vector<1x32xf32>, vector<1x32xf32>, vector<1x32xf32>, vector<1x32xf32>, vector<1x32xf32>, vector<1x32xf32> -> vector<9x32xf32>
    %146 = arith.truncf %145 : vector<9x32xf32> to vector<9x32xbf16>
    %c0_46 = arith.constant 0 : index
    %c0_47 = arith.constant 0 : index
    %c0_48 = arith.constant 0 : index
    %c0_49 = arith.constant 0 : index
    %147 = vector.load %arg6[%c0_46, %c0_47, %c0_48, %c0_49] : memref<1x1x9x32xbf16, #tpu.memory_space<vmem>>, vector<1x1x9x32xbf16>
    %148 = vector.shape_cast %147 : vector<1x1x9x32xbf16> to vector<9x32xbf16>
    %149 = vector.shape_cast %146 : vector<9x32xbf16> to vector<1x1x9x32xbf16>
    tpu.vector_store %arg6[%c0_46, %c0_47, %c0_48, %c0_49], %149 {strides = array<i32>} : memref<1x1x9x32xbf16, #tpu.memory_space<vmem>>, vector<1x1x9x32xbf16>,
    return
  }
  func.func @transform_0(%arg0: i32, %arg1: i32) -> (i32, i32, i32, i32) {
    %c0_i32 = arith.constant 0 : i32
    %c0_i32_0 = arith.constant 0 : i32
    %c0_i32_1 = arith.constant 0 : i32
    %c0_i32_2 = arith.constant 0 : i32
    return %arg0, %c0_i32, %c0_i32_0, %c0_i32_1 : i32, i32, i32, i32
  }
  func.func @transform_1(%arg0: i32, %arg1: i32) -> (i32, i32) {
    %c0_i32 = arith.constant 0 : i32
    %c0_i32_0 = arith.constant 0 : i32
    %c0_i32_1 = arith.constant 0 : i32
    return %c0_i32, %c0_i32_0 : i32, i32
  }
  func.func @transform_2(%arg0: i32, %arg1: i32) -> (i32, i32) {
    %c0_i32 = arith.constant 0 : i32
    %c0_i32_0 = arith.constant 0 : i32
    %c0_i32_1 = arith.constant 0 : i32
    return %c0_i32, %c0_i32_0 : i32, i32
  }
  func.func @transform_3(%arg0: i32, %arg1: i32) -> (i32, i32) {
    %c0_i32 = arith.constant 0 : i32
    %c0_i32_0 = arith.constant 0 : i32
    %c0_i32_1 = arith.constant 0 : i32
    return %c0_i32, %c0_i32_0 : i32, i32
  }
  func.func @transform_4(%arg0: i32, %arg1: i32) -> (i32, i32, i32, i32) {
    %c0_i32 = arith.constant 0 : i32
    %c0_i32_0 = arith.constant 0 : i32
    %c0_i32_1 = arith.constant 0 : i32
    return %arg0, %arg1, %c0_i32, %c0_i32_0 : i32, i32, i32, i32
  }
}

module attributes {stable_mosaic.version = 11 : i64} {
  func.func @kernel(%arg0: i32, %arg1: i32, %arg2: memref<1x13x13x32xbf16, #tpu.memory_space<vmem>>, %arg3: memref<800x64xbf16, #tpu.memory_space<vmem>>, %arg4: memref<1x64xf32, #tpu.memory_space<vmem>>, %arg5: memref<1x64xf32, #tpu.memory_space<vmem>>, %arg6: memref<1x1x5x64xbf16, #tpu.memory_space<vmem>>) attributes {dimension_semantics = [#tpu.dimension_semantics<parallel>, #tpu.dimension_semantics<parallel>], iteration_bounds = array<i64: 2, 5>, scalar_prefetch = 0 : i64, scratch_operands = 0 : i64, tpu.core_type = #tpu.core_type<tc>, window_params = [{transform_indices = @transform_0, window_bounds = array<i64: 1, 13, 13, 32>}, {pipeline_mode = #tpu.pipeline_mode<synchronous>, transform_indices = @transform_1, window_bounds = array<i64: 800, 64>}, {pipeline_mode = #tpu.pipeline_mode<synchronous>, transform_indices = @transform_2, window_bounds = array<i64: 1, 64>}, {pipeline_mode = #tpu.pipeline_mode<synchronous>, transform_indices = @transform_3, window_bounds = array<i64: 1, 64>}, {transform_indices = @transform_4, window_bounds = array<i64: 1, 1, 5, 64>}]} {
    %c2_i32 = arith.constant 2 : i32
    %0 = arith.muli %c2_i32, %arg1 : i32
    %c1_i32 = arith.constant 1 : i32
    %1 = arith.subi %0, %c1_i32 : i32
    %c0_i32 = arith.constant 0 : i32
    %2 = arith.maxsi %1, %c0_i32 : i32
    %c2_i32_0 = arith.constant 2 : i32
    %3 = arith.muli %c2_i32_0, %arg1 : i32
    %c8_i32 = arith.constant 8 : i32
    %4 = arith.minsi %3, %c8_i32 : i32
    %c0_i32_1 = arith.constant 0 : i32
    %5 = arith.addi %2, %c0_i32_1 : i32
    %c0 = arith.constant 0 : index
    %6 = arith.index_cast %5 : i32 to index
    %c0_2 = arith.constant 0 : index
    %c0_3 = arith.constant 0 : index
    %7 = vector.load %arg2[%c0, %6, %c0_2, %c0_3] : memref<1x13x13x32xbf16, #tpu.memory_space<vmem>>, vector<1x1x13x32xbf16>
    %8 = vector.shape_cast %7 : vector<1x1x13x32xbf16> to vector<13x32xbf16>
    %9 = vector.extract_strided_slice %8 {offsets = [0, 0], sizes = [9, 32], strides = [1, 1]} : vector<13x32xbf16> to vector<9x32xbf16>
    %10 = vector.extract_strided_slice %8 {offsets = [1, 0], sizes = [9, 32], strides = [1, 1]} : vector<13x32xbf16> to vector<9x32xbf16>
    %11 = vector.extract_strided_slice %8 {offsets = [2, 0], sizes = [9, 32], strides = [1, 1]} : vector<13x32xbf16> to vector<9x32xbf16>
    %12 = vector.extract_strided_slice %8 {offsets = [3, 0], sizes = [9, 32], strides = [1, 1]} : vector<13x32xbf16> to vector<9x32xbf16>
    %13 = vector.extract_strided_slice %8 {offsets = [4, 0], sizes = [9, 32], strides = [1, 1]} : vector<13x32xbf16> to vector<9x32xbf16>
    %c1_i32_4 = arith.constant 1 : i32
    %14 = arith.addi %2, %c1_i32_4 : i32
    %c0_5 = arith.constant 0 : index
    %15 = arith.index_cast %14 : i32 to index
    %c0_6 = arith.constant 0 : index
    %c0_7 = arith.constant 0 : index
    %16 = vector.load %arg2[%c0_5, %15, %c0_6, %c0_7] : memref<1x13x13x32xbf16, #tpu.memory_space<vmem>>, vector<1x1x13x32xbf16>
    %17 = vector.shape_cast %16 : vector<1x1x13x32xbf16> to vector<13x32xbf16>
    %18 = vector.extract_strided_slice %17 {offsets = [0, 0], sizes = [9, 32], strides = [1, 1]} : vector<13x32xbf16> to vector<9x32xbf16>
    %19 = vector.extract_strided_slice %17 {offsets = [1, 0], sizes = [9, 32], strides = [1, 1]} : vector<13x32xbf16> to vector<9x32xbf16>
    %20 = vector.extract_strided_slice %17 {offsets = [2, 0], sizes = [9, 32], strides = [1, 1]} : vector<13x32xbf16> to vector<9x32xbf16>
    %21 = vector.extract_strided_slice %17 {offsets = [3, 0], sizes = [9, 32], strides = [1, 1]} : vector<13x32xbf16> to vector<9x32xbf16>
    %22 = vector.extract_strided_slice %17 {offsets = [4, 0], sizes = [9, 32], strides = [1, 1]} : vector<13x32xbf16> to vector<9x32xbf16>
    %c2_i32_8 = arith.constant 2 : i32
    %23 = arith.addi %2, %c2_i32_8 : i32
    %c0_9 = arith.constant 0 : index
    %24 = arith.index_cast %23 : i32 to index
    %c0_10 = arith.constant 0 : index
    %c0_11 = arith.constant 0 : index
    %25 = vector.load %arg2[%c0_9, %24, %c0_10, %c0_11] : memref<1x13x13x32xbf16, #tpu.memory_space<vmem>>, vector<1x1x13x32xbf16>
    %26 = vector.shape_cast %25 : vector<1x1x13x32xbf16> to vector<13x32xbf16>
    %27 = vector.extract_strided_slice %26 {offsets = [0, 0], sizes = [9, 32], strides = [1, 1]} : vector<13x32xbf16> to vector<9x32xbf16>
    %28 = vector.extract_strided_slice %26 {offsets = [1, 0], sizes = [9, 32], strides = [1, 1]} : vector<13x32xbf16> to vector<9x32xbf16>
    %29 = vector.extract_strided_slice %26 {offsets = [2, 0], sizes = [9, 32], strides = [1, 1]} : vector<13x32xbf16> to vector<9x32xbf16>
    %30 = vector.extract_strided_slice %26 {offsets = [3, 0], sizes = [9, 32], strides = [1, 1]} : vector<13x32xbf16> to vector<9x32xbf16>
    %31 = vector.extract_strided_slice %26 {offsets = [4, 0], sizes = [9, 32], strides = [1, 1]} : vector<13x32xbf16> to vector<9x32xbf16>
    %c3_i32 = arith.constant 3 : i32
    %32 = arith.addi %2, %c3_i32 : i32
    %c0_12 = arith.constant 0 : index
    %33 = arith.index_cast %32 : i32 to index
    %c0_13 = arith.constant 0 : index
    %c0_14 = arith.constant 0 : index
    %34 = vector.load %arg2[%c0_12, %33, %c0_13, %c0_14] : memref<1x13x13x32xbf16, #tpu.memory_space<vmem>>, vector<1x1x13x32xbf16>
    %35 = vector.shape_cast %34 : vector<1x1x13x32xbf16> to vector<13x32xbf16>
    %36 = vector.extract_strided_slice %35 {offsets = [0, 0], sizes = [9, 32], strides = [1, 1]} : vector<13x32xbf16> to vector<9x32xbf16>
    %37 = vector.extract_strided_slice %35 {offsets = [1, 0], sizes = [9, 32], strides = [1, 1]} : vector<13x32xbf16> to vector<9x32xbf16>
    %38 = vector.extract_strided_slice %35 {offsets = [2, 0], sizes = [9, 32], strides = [1, 1]} : vector<13x32xbf16> to vector<9x32xbf16>
    %39 = vector.extract_strided_slice %35 {offsets = [3, 0], sizes = [9, 32], strides = [1, 1]} : vector<13x32xbf16> to vector<9x32xbf16>
    %40 = vector.extract_strided_slice %35 {offsets = [4, 0], sizes = [9, 32], strides = [1, 1]} : vector<13x32xbf16> to vector<9x32xbf16>
    %c4_i32 = arith.constant 4 : i32
    %41 = arith.addi %2, %c4_i32 : i32
    %c0_15 = arith.constant 0 : index
    %42 = arith.index_cast %41 : i32 to index
    %c0_16 = arith.constant 0 : index
    %c0_17 = arith.constant 0 : index
    %43 = vector.load %arg2[%c0_15, %42, %c0_16, %c0_17] : memref<1x13x13x32xbf16, #tpu.memory_space<vmem>>, vector<1x1x13x32xbf16>
    %44 = vector.shape_cast %43 : vector<1x1x13x32xbf16> to vector<13x32xbf16>
    %45 = vector.extract_strided_slice %44 {offsets = [0, 0], sizes = [9, 32], strides = [1, 1]} : vector<13x32xbf16> to vector<9x32xbf16>
    %46 = vector.extract_strided_slice %44 {offsets = [1, 0], sizes = [9, 32], strides = [1, 1]} : vector<13x32xbf16> to vector<9x32xbf16>
    %47 = vector.extract_strided_slice %44 {offsets = [2, 0], sizes = [9, 32], strides = [1, 1]} : vector<13x32xbf16> to vector<9x32xbf16>
    %48 = vector.extract_strided_slice %44 {offsets = [3, 0], sizes = [9, 32], strides = [1, 1]} : vector<13x32xbf16> to vector<9x32xbf16>
    %49 = vector.extract_strided_slice %44 {offsets = [4, 0], sizes = [9, 32], strides = [1, 1]} : vector<13x32xbf16> to vector<9x32xbf16>
    %50 = tpu.concatenate %9, %10, %11, %12, %13, %18, %19, %20, %21, %22, %27, %28, %29, %30, %31, %36 in 1 : vector<9x32xbf16>, vector<9x32xbf16>, vector<9x32xbf16>, vector<9x32xbf16>, vector<9x32xbf16>, vector<9x32xbf16>, vector<9x32xbf16>, vector<9x32xbf16>, vector<9x32xbf16>, vector<9x32xbf16>, vector<9x32xbf16>, vector<9x32xbf16>, vector<9x32xbf16>, vector<9x32xbf16>, vector<9x32xbf16>, vector<9x32xbf16> -> vector<9x512xbf16>
    %51 = tpu.concatenate %37, %38, %39, %40, %45, %46, %47, %48, %49 in 1 : vector<9x32xbf16>, vector<9x32xbf16>, vector<9x32xbf16>, vector<9x32xbf16>, vector<9x32xbf16>, vector<9x32xbf16>, vector<9x32xbf16>, vector<9x32xbf16>, vector<9x32xbf16> -> vector<9x288xbf16>
    %52 = tpu.concatenate %50, %51 in 1 : vector<9x512xbf16>, vector<9x288xbf16> -> vector<9x800xbf16>
    %c0_i32_18 = arith.constant 0 : i32
    %53 = arith.addi %4, %c0_i32_18 : i32
    %c0_19 = arith.constant 0 : index
    %54 = arith.index_cast %53 : i32 to index
    %c0_20 = arith.constant 0 : index
    %c0_21 = arith.constant 0 : index
    %55 = vector.load %arg2[%c0_19, %54, %c0_20, %c0_21] : memref<1x13x13x32xbf16, #tpu.memory_space<vmem>>, vector<1x1x13x32xbf16>
    %56 = vector.shape_cast %55 : vector<1x1x13x32xbf16> to vector<13x32xbf16>
    %57 = vector.extract_strided_slice %56 {offsets = [0, 0], sizes = [9, 32], strides = [1, 1]} : vector<13x32xbf16> to vector<9x32xbf16>
    %58 = vector.extract_strided_slice %56 {offsets = [1, 0], sizes = [9, 32], strides = [1, 1]} : vector<13x32xbf16> to vector<9x32xbf16>
    %59 = vector.extract_strided_slice %56 {offsets = [2, 0], sizes = [9, 32], strides = [1, 1]} : vector<13x32xbf16> to vector<9x32xbf16>
    %60 = vector.extract_strided_slice %56 {offsets = [3, 0], sizes = [9, 32], strides = [1, 1]} : vector<13x32xbf16> to vector<9x32xbf16>
    %61 = vector.extract_strided_slice %56 {offsets = [4, 0], sizes = [9, 32], strides = [1, 1]} : vector<13x32xbf16> to vector<9x32xbf16>
    %c1_i32_22 = arith.constant 1 : i32
    %62 = arith.addi %4, %c1_i32_22 : i32
    %c0_23 = arith.constant 0 : index
    %63 = arith.index_cast %62 : i32 to index
    %c0_24 = arith.constant 0 : index
    %c0_25 = arith.constant 0 : index
    %64 = vector.load %arg2[%c0_23, %63, %c0_24, %c0_25] : memref<1x13x13x32xbf16, #tpu.memory_space<vmem>>, vector<1x1x13x32xbf16>
    %65 = vector.shape_cast %64 : vector<1x1x13x32xbf16> to vector<13x32xbf16>
    %66 = vector.extract_strided_slice %65 {offsets = [0, 0], sizes = [9, 32], strides = [1, 1]} : vector<13x32xbf16> to vector<9x32xbf16>
    %67 = vector.extract_strided_slice %65 {offsets = [1, 0], sizes = [9, 32], strides = [1, 1]} : vector<13x32xbf16> to vector<9x32xbf16>
    %68 = vector.extract_strided_slice %65 {offsets = [2, 0], sizes = [9, 32], strides = [1, 1]} : vector<13x32xbf16> to vector<9x32xbf16>
    %69 = vector.extract_strided_slice %65 {offsets = [3, 0], sizes = [9, 32], strides = [1, 1]} : vector<13x32xbf16> to vector<9x32xbf16>
    %70 = vector.extract_strided_slice %65 {offsets = [4, 0], sizes = [9, 32], strides = [1, 1]} : vector<13x32xbf16> to vector<9x32xbf16>
    %c2_i32_26 = arith.constant 2 : i32
    %71 = arith.addi %4, %c2_i32_26 : i32
    %c0_27 = arith.constant 0 : index
    %72 = arith.index_cast %71 : i32 to index
    %c0_28 = arith.constant 0 : index
    %c0_29 = arith.constant 0 : index
    %73 = vector.load %arg2[%c0_27, %72, %c0_28, %c0_29] : memref<1x13x13x32xbf16, #tpu.memory_space<vmem>>, vector<1x1x13x32xbf16>
    %74 = vector.shape_cast %73 : vector<1x1x13x32xbf16> to vector<13x32xbf16>
    %75 = vector.extract_strided_slice %74 {offsets = [0, 0], sizes = [9, 32], strides = [1, 1]} : vector<13x32xbf16> to vector<9x32xbf16>
    %76 = vector.extract_strided_slice %74 {offsets = [1, 0], sizes = [9, 32], strides = [1, 1]} : vector<13x32xbf16> to vector<9x32xbf16>
    %77 = vector.extract_strided_slice %74 {offsets = [2, 0], sizes = [9, 32], strides = [1, 1]} : vector<13x32xbf16> to vector<9x32xbf16>
    %78 = vector.extract_strided_slice %74 {offsets = [3, 0], sizes = [9, 32], strides = [1, 1]} : vector<13x32xbf16> to vector<9x32xbf16>
    %79 = vector.extract_strided_slice %74 {offsets = [4, 0], sizes = [9, 32], strides = [1, 1]} : vector<13x32xbf16> to vector<9x32xbf16>
    %c3_i32_30 = arith.constant 3 : i32
    %80 = arith.addi %4, %c3_i32_30 : i32
    %c0_31 = arith.constant 0 : index
    %81 = arith.index_cast %80 : i32 to index
    %c0_32 = arith.constant 0 : index
    %c0_33 = arith.constant 0 : index
    %82 = vector.load %arg2[%c0_31, %81, %c0_32, %c0_33] : memref<1x13x13x32xbf16, #tpu.memory_space<vmem>>, vector<1x1x13x32xbf16>
    %83 = vector.shape_cast %82 : vector<1x1x13x32xbf16> to vector<13x32xbf16>
    %84 = vector.extract_strided_slice %83 {offsets = [0, 0], sizes = [9, 32], strides = [1, 1]} : vector<13x32xbf16> to vector<9x32xbf16>
    %85 = vector.extract_strided_slice %83 {offsets = [1, 0], sizes = [9, 32], strides = [1, 1]} : vector<13x32xbf16> to vector<9x32xbf16>
    %86 = vector.extract_strided_slice %83 {offsets = [2, 0], sizes = [9, 32], strides = [1, 1]} : vector<13x32xbf16> to vector<9x32xbf16>
    %87 = vector.extract_strided_slice %83 {offsets = [3, 0], sizes = [9, 32], strides = [1, 1]} : vector<13x32xbf16> to vector<9x32xbf16>
    %88 = vector.extract_strided_slice %83 {offsets = [4, 0], sizes = [9, 32], strides = [1, 1]} : vector<13x32xbf16> to vector<9x32xbf16>
    %c4_i32_34 = arith.constant 4 : i32
    %89 = arith.addi %4, %c4_i32_34 : i32
    %c0_35 = arith.constant 0 : index
    %90 = arith.index_cast %89 : i32 to index
    %c0_36 = arith.constant 0 : index
    %c0_37 = arith.constant 0 : index
    %91 = vector.load %arg2[%c0_35, %90, %c0_36, %c0_37] : memref<1x13x13x32xbf16, #tpu.memory_space<vmem>>, vector<1x1x13x32xbf16>
    %92 = vector.shape_cast %91 : vector<1x1x13x32xbf16> to vector<13x32xbf16>
    %93 = vector.extract_strided_slice %92 {offsets = [0, 0], sizes = [9, 32], strides = [1, 1]} : vector<13x32xbf16> to vector<9x32xbf16>
    %94 = vector.extract_strided_slice %92 {offsets = [1, 0], sizes = [9, 32], strides = [1, 1]} : vector<13x32xbf16> to vector<9x32xbf16>
    %95 = vector.extract_strided_slice %92 {offsets = [2, 0], sizes = [9, 32], strides = [1, 1]} : vector<13x32xbf16> to vector<9x32xbf16>
    %96 = vector.extract_strided_slice %92 {offsets = [3, 0], sizes = [9, 32], strides = [1, 1]} : vector<13x32xbf16> to vector<9x32xbf16>
    %97 = vector.extract_strided_slice %92 {offsets = [4, 0], sizes = [9, 32], strides = [1, 1]} : vector<13x32xbf16> to vector<9x32xbf16>
    %98 = tpu.concatenate %57, %58, %59, %60, %61, %66, %67, %68, %69, %70, %75, %76, %77, %78, %79, %84 in 1 : vector<9x32xbf16>, vector<9x32xbf16>, vector<9x32xbf16>, vector<9x32xbf16>, vector<9x32xbf16>, vector<9x32xbf16>, vector<9x32xbf16>, vector<9x32xbf16>, vector<9x32xbf16>, vector<9x32xbf16>, vector<9x32xbf16>, vector<9x32xbf16>, vector<9x32xbf16>, vector<9x32xbf16>, vector<9x32xbf16>, vector<9x32xbf16> -> vector<9x512xbf16>
    %99 = tpu.concatenate %85, %86, %87, %88, %93, %94, %95, %96, %97 in 1 : vector<9x32xbf16>, vector<9x32xbf16>, vector<9x32xbf16>, vector<9x32xbf16>, vector<9x32xbf16>, vector<9x32xbf16>, vector<9x32xbf16>, vector<9x32xbf16>, vector<9x32xbf16> -> vector<9x288xbf16>
    %100 = tpu.concatenate %98, %99 in 1 : vector<9x512xbf16>, vector<9x288xbf16> -> vector<9x800xbf16>
    %101 = tpu.concatenate %52, %100 in 0 : vector<9x800xbf16>, vector<9x800xbf16> -> vector<18x800xbf16>
    %c0_38 = arith.constant 0 : index
    %c0_39 = arith.constant 0 : index
    %102 = vector.load %arg3[%c0_38, %c0_39] : memref<800x64xbf16, #tpu.memory_space<vmem>>, vector<800x64xbf16>
    %cst = arith.constant dense<0.000000e+00> : vector<18x64xf32>
    %103 = tpu.matmul %101, %102, %cst {dimension_numbers = #tpu.dot_dimension_numbers<[1], [0], [0], [1], [0, 0, 1, 1], [], []>} : vector<18x800xbf16>, vector<800x64xbf16>, vector<18x64xf32> -> vector<18x64xf32>
    %c0_40 = arith.constant 0 : index
    %c0_41 = arith.constant 0 : index
    %104 = vector.load %arg4[%c0_40, %c0_41] : memref<1x64xf32, #tpu.memory_space<vmem>>, vector<1x64xf32>
    %105 = vector.broadcast %104 : vector<1x64xf32> to vector<18x64xf32>
    %106 = arith.mulf %103, %105 : vector<18x64xf32>
    %c0_42 = arith.constant 0 : index
    %c0_43 = arith.constant 0 : index
    %107 = vector.load %arg5[%c0_42, %c0_43] : memref<1x64xf32, #tpu.memory_space<vmem>>, vector<1x64xf32>
    %108 = vector.broadcast %107 : vector<1x64xf32> to vector<18x64xf32>
    %109 = arith.addf %106, %108 : vector<18x64xf32>
    %cst_44 = arith.constant 0.000000e+00 : f32
    %110 = vector.broadcast %cst_44 : f32 to vector<18x64xf32>
    %111 = arith.cmpf oge, %109, %110 : vector<18x64xf32>
    %cst_45 = arith.constant 0.00999999977 : f32
    %112 = vector.broadcast %cst_45 : f32 to vector<18x64xf32>
    %113 = arith.mulf %112, %109 : vector<18x64xf32>
    %114 = arith.select %111, %109, %113 : vector<18x64xi1>, vector<18x64xf32>
    %115 = vector.extract_strided_slice %114 {offsets = [0, 0], sizes = [9, 64], strides = [1, 1]} : vector<18x64xf32> to vector<9x64xf32>
    %116 = vector.extract_strided_slice %114 {offsets = [9, 0], sizes = [9, 64], strides = [1, 1]} : vector<18x64xf32> to vector<9x64xf32>
    %117 = arith.maximumf %115, %116 : vector<9x64xf32>
    %118 = vector.extract_strided_slice %117 {offsets = [0, 0], sizes = [1, 64], strides = [1, 1]} : vector<9x64xf32> to vector<1x64xf32>
    %119 = vector.extract_strided_slice %117 {offsets = [0, 0], sizes = [1, 64], strides = [1, 1]} : vector<9x64xf32> to vector<1x64xf32>
    %120 = arith.maximumf %118, %119 : vector<1x64xf32>
    %121 = vector.extract_strided_slice %117 {offsets = [1, 0], sizes = [1, 64], strides = [1, 1]} : vector<9x64xf32> to vector<1x64xf32>
    %122 = vector.extract_strided_slice %117 {offsets = [2, 0], sizes = [1, 64], strides = [1, 1]} : vector<9x64xf32> to vector<1x64xf32>
    %123 = arith.maximumf %121, %122 : vector<1x64xf32>
    %124 = vector.extract_strided_slice %117 {offsets = [3, 0], sizes = [1, 64], strides = [1, 1]} : vector<9x64xf32> to vector<1x64xf32>
    %125 = vector.extract_strided_slice %117 {offsets = [4, 0], sizes = [1, 64], strides = [1, 1]} : vector<9x64xf32> to vector<1x64xf32>
    %126 = arith.maximumf %124, %125 : vector<1x64xf32>
    %127 = vector.extract_strided_slice %117 {offsets = [5, 0], sizes = [1, 64], strides = [1, 1]} : vector<9x64xf32> to vector<1x64xf32>
    %128 = vector.extract_strided_slice %117 {offsets = [6, 0], sizes = [1, 64], strides = [1, 1]} : vector<9x64xf32> to vector<1x64xf32>
    %129 = arith.maximumf %127, %128 : vector<1x64xf32>
    %130 = vector.extract_strided_slice %117 {offsets = [7, 0], sizes = [1, 64], strides = [1, 1]} : vector<9x64xf32> to vector<1x64xf32>
    %131 = vector.extract_strided_slice %117 {offsets = [8, 0], sizes = [1, 64], strides = [1, 1]} : vector<9x64xf32> to vector<1x64xf32>
    %132 = arith.maximumf %130, %131 : vector<1x64xf32>
    %133 = tpu.concatenate %120, %123, %126, %129, %132 in 0 : vector<1x64xf32>, vector<1x64xf32>, vector<1x64xf32>, vector<1x64xf32>, vector<1x64xf32> -> vector<5x64xf32>
    %134 = arith.truncf %133 : vector<5x64xf32> to vector<5x64xbf16>
    %c0_46 = arith.constant 0 : index
    %c0_47 = arith.constant 0 : index
    %c0_48 = arith.constant 0 : index
    %c0_49 = arith.constant 0 : index
    %135 = vector.load %arg6[%c0_46, %c0_47, %c0_48, %c0_49] : memref<1x1x5x64xbf16, #tpu.memory_space<vmem>>, vector<1x1x5x64xbf16>
    %136 = vector.shape_cast %135 : vector<1x1x5x64xbf16> to vector<5x64xbf16>
    %137 = vector.shape_cast %134 : vector<5x64xbf16> to vector<1x1x5x64xbf16>
    tpu.vector_store %arg6[%c0_46, %c0_47, %c0_48, %c0_49], %137 {strides = array<i32>} : memref<1x1x5x64xbf16, #tpu.memory_space<vmem>>, vector<1x1x5x64xbf16>,
    return
  }
  func.func @transform_0(%arg0: i32, %arg1: i32) -> (i32, i32, i32, i32) {
    %c0_i32 = arith.constant 0 : i32
    %c0_i32_0 = arith.constant 0 : i32
    %c0_i32_1 = arith.constant 0 : i32
    %c0_i32_2 = arith.constant 0 : i32
    return %arg0, %c0_i32, %c0_i32_0, %c0_i32_1 : i32, i32, i32, i32
  }
  func.func @transform_1(%arg0: i32, %arg1: i32) -> (i32, i32) {
    %c0_i32 = arith.constant 0 : i32
    %c0_i32_0 = arith.constant 0 : i32
    %c0_i32_1 = arith.constant 0 : i32
    return %c0_i32, %c0_i32_0 : i32, i32
  }
  func.func @transform_2(%arg0: i32, %arg1: i32) -> (i32, i32) {
    %c0_i32 = arith.constant 0 : i32
    %c0_i32_0 = arith.constant 0 : i32
    %c0_i32_1 = arith.constant 0 : i32
    return %c0_i32, %c0_i32_0 : i32, i32
  }
  func.func @transform_3(%arg0: i32, %arg1: i32) -> (i32, i32) {
    %c0_i32 = arith.constant 0 : i32
    %c0_i32_0 = arith.constant 0 : i32
    %c0_i32_1 = arith.constant 0 : i32
    return %c0_i32, %c0_i32_0 : i32, i32
  }
  func.func @transform_4(%arg0: i32, %arg1: i32) -> (i32, i32, i32, i32) {
    %c0_i32 = arith.constant 0 : i32
    %c0_i32_0 = arith.constant 0 : i32
    %c0_i32_1 = arith.constant 0 : i32
    return %arg0, %arg1, %c0_i32, %c0_i32_0 : i32, i32, i32, i32
  }
}

module attributes {stable_mosaic.version = 11 : i64} {
  func.func @_proj_ln_kernel(%arg0: i32, %arg1: memref<128x64xbf16, #tpu.memory_space<vmem>>, %arg2: memref<64x32xbf16, #tpu.memory_space<vmem>>, %arg3: memref<1x32xf32, #tpu.memory_space<vmem>>, %arg4: memref<1x32xf32, #tpu.memory_space<vmem>>, %arg5: memref<1x32xf32, #tpu.memory_space<vmem>>, %arg6: memref<1x32xf32, #tpu.memory_space<vmem>>, %arg7: memref<128x32xf32, #tpu.memory_space<vmem>>) attributes {dimension_semantics = [#tpu.dimension_semantics<parallel>], iteration_bounds = array<i64: 1>, scalar_prefetch = 0 : i64, scratch_operands = 0 : i64, tpu.core_type = #tpu.core_type<tc>, window_params = [{transform_indices = @transform_0, window_bounds = array<i64: 128, 64>}, {pipeline_mode = #tpu.pipeline_mode<synchronous>, transform_indices = @transform_1, window_bounds = array<i64: 64, 32>}, {pipeline_mode = #tpu.pipeline_mode<synchronous>, transform_indices = @transform_2, window_bounds = array<i64: 1, 32>}, {pipeline_mode = #tpu.pipeline_mode<synchronous>, transform_indices = @transform_3, window_bounds = array<i64: 1, 32>}, {pipeline_mode = #tpu.pipeline_mode<synchronous>, transform_indices = @transform_4, window_bounds = array<i64: 1, 32>}, {pipeline_mode = #tpu.pipeline_mode<synchronous>, transform_indices = @transform_5, window_bounds = array<i64: 1, 32>}, {transform_indices = @transform_6, window_bounds = array<i64: 128, 32>}]} {
    %c0 = arith.constant 0 : index
    %c0_0 = arith.constant 0 : index
    %0 = vector.load %arg1[%c0, %c0_0] : memref<128x64xbf16, #tpu.memory_space<vmem>>, vector<128x64xbf16>
    %c0_1 = arith.constant 0 : index
    %c0_2 = arith.constant 0 : index
    %1 = vector.load %arg2[%c0_1, %c0_2] : memref<64x32xbf16, #tpu.memory_space<vmem>>, vector<64x32xbf16>
    %cst = arith.constant dense<0.000000e+00> : vector<128x32xf32>
    %2 = tpu.matmul %0, %1, %cst {dimension_numbers = #tpu.dot_dimension_numbers<[1], [0], [0], [1], [0, 0, 1, 1], [], []>} : vector<128x64xbf16>, vector<64x32xbf16>, vector<128x32xf32> -> vector<128x32xf32>
    %c0_3 = arith.constant 0 : index
    %c0_4 = arith.constant 0 : index
    %3 = vector.load %arg3[%c0_3, %c0_4] : memref<1x32xf32, #tpu.memory_space<vmem>>, vector<1x32xf32>
    %4 = vector.broadcast %3 : vector<1x32xf32> to vector<128x32xf32>
    %5 = arith.mulf %2, %4 : vector<128x32xf32>
    %c0_5 = arith.constant 0 : index
    %c0_6 = arith.constant 0 : index
    %6 = vector.load %arg4[%c0_5, %c0_6] : memref<1x32xf32, #tpu.memory_space<vmem>>, vector<1x32xf32>
    %7 = vector.broadcast %6 : vector<1x32xf32> to vector<128x32xf32>
    %8 = arith.addf %5, %7 : vector<128x32xf32>
    %cst_7 = arith.constant 0.000000e+00 : f32
    %9 = vector.broadcast %cst_7 : f32 to vector<128x32xf32>
    %10 = arith.cmpf oge, %8, %9 : vector<128x32xf32>
    %cst_8 = arith.constant 0.00999999977 : f32
    %11 = vector.broadcast %cst_8 : f32 to vector<128x32xf32>
    %12 = arith.mulf %11, %8 : vector<128x32xf32>
    %13 = arith.select %10, %8, %12 : vector<128x32xi1>, vector<128x32xf32>
    %cst_9 = arith.constant dense<0.000000e+00> : vector<128xf32>
    %14 = vector.multi_reduction <add>, %13, %cst_9 [1] : vector<128x32xf32> to vector<128xf32>
    %15 = vector.shape_cast %14 : vector<128xf32> to vector<128x1xf32>
    %cst_10 = arith.constant 3.200000e+01 : f32
    %16 = vector.broadcast %cst_10 : f32 to vector<128x1xf32>
    %17 = arith.divf %15, %16 : vector<128x1xf32>
    %18 = vector.broadcast %17 : vector<128x1xf32> to vector<128x32xf32>
    %19 = arith.subf %13, %18 : vector<128x32xf32>
    %20 = arith.mulf %19, %19 : vector<128x32xf32>
    %cst_11 = arith.constant dense<0.000000e+00> : vector<128xf32>
    %21 = vector.multi_reduction <add>, %20, %cst_11 [1] : vector<128x32xf32> to vector<128xf32>
    %22 = vector.shape_cast %21 : vector<128xf32> to vector<128x1xf32>
    %cst_12 = arith.constant 3.200000e+01 : f32
    %23 = vector.broadcast %cst_12 : f32 to vector<128x1xf32>
    %24 = arith.divf %22, %23 : vector<128x1xf32>
    %25 = vector.broadcast %17 : vector<128x1xf32> to vector<128x32xf32>
    %26 = arith.subf %13, %25 : vector<128x32xf32>
    %cst_13 = arith.constant 9.99999974E-6 : f32
    %27 = vector.broadcast %cst_13 : f32 to vector<128x1xf32>
    %28 = arith.addf %24, %27 : vector<128x1xf32>
    %29 = math.rsqrt %28 : vector<128x1xf32>
    %30 = vector.broadcast %29 : vector<128x1xf32> to vector<128x32xf32>
    %31 = arith.mulf %26, %30 : vector<128x32xf32>
    %c0_14 = arith.constant 0 : index
    %c0_15 = arith.constant 0 : index
    %32 = vector.load %arg5[%c0_14, %c0_15] : memref<1x32xf32, #tpu.memory_space<vmem>>, vector<1x32xf32>
    %33 = vector.broadcast %32 : vector<1x32xf32> to vector<128x32xf32>
    %34 = arith.mulf %31, %33 : vector<128x32xf32>
    %c0_16 = arith.constant 0 : index
    %c0_17 = arith.constant 0 : index
    %35 = vector.load %arg6[%c0_16, %c0_17] : memref<1x32xf32, #tpu.memory_space<vmem>>, vector<1x32xf32>
    %36 = vector.broadcast %35 : vector<1x32xf32> to vector<128x32xf32>
    %37 = arith.addf %34, %36 : vector<128x32xf32>
    %c0_18 = arith.constant 0 : index
    %c0_19 = arith.constant 0 : index
    %38 = vector.load %arg7[%c0_18, %c0_19] : memref<128x32xf32, #tpu.memory_space<vmem>>, vector<128x32xf32>
    tpu.vector_store %arg7[%c0_18, %c0_19], %37 {strides = array<i32>} : memref<128x32xf32, #tpu.memory_space<vmem>>, vector<128x32xf32>,
    return
  }
  func.func @transform_0(%arg0: i32) -> (i32, i32) {
    %c0_i32 = arith.constant 0 : i32
    %c0_i32_0 = arith.constant 0 : i32
    return %arg0, %c0_i32 : i32, i32
  }
  func.func @transform_1(%arg0: i32) -> (i32, i32) {
    %c0_i32 = arith.constant 0 : i32
    %c0_i32_0 = arith.constant 0 : i32
    %c0_i32_1 = arith.constant 0 : i32
    return %c0_i32, %c0_i32_0 : i32, i32
  }
  func.func @transform_2(%arg0: i32) -> (i32, i32) {
    %c0_i32 = arith.constant 0 : i32
    %c0_i32_0 = arith.constant 0 : i32
    %c0_i32_1 = arith.constant 0 : i32
    return %c0_i32, %c0_i32_0 : i32, i32
  }
  func.func @transform_3(%arg0: i32) -> (i32, i32) {
    %c0_i32 = arith.constant 0 : i32
    %c0_i32_0 = arith.constant 0 : i32
    %c0_i32_1 = arith.constant 0 : i32
    return %c0_i32, %c0_i32_0 : i32, i32
  }
  func.func @transform_4(%arg0: i32) -> (i32, i32) {
    %c0_i32 = arith.constant 0 : i32
    %c0_i32_0 = arith.constant 0 : i32
    %c0_i32_1 = arith.constant 0 : i32
    return %c0_i32, %c0_i32_0 : i32, i32
  }
  func.func @transform_5(%arg0: i32) -> (i32, i32) {
    %c0_i32 = arith.constant 0 : i32
    %c0_i32_0 = arith.constant 0 : i32
    %c0_i32_1 = arith.constant 0 : i32
    return %c0_i32, %c0_i32_0 : i32, i32
  }
  func.func @transform_6(%arg0: i32) -> (i32, i32) {
    %c0_i32 = arith.constant 0 : i32
    %c0_i32_0 = arith.constant 0 : i32
    return %arg0, %c0_i32 : i32, i32
  }
}

</mosaic_0001>

<bundles_post_ra>
// kernel: patch_embed_forward.4
= control target key start
LH: loop header
LB: loop body
LE: loop exit
PB: predicated region body
PF: predicated region fallthrough
CT: control target
= control target key end

     0   :  { %s2883_s25 = smov 0   ;;  %s3375_s0 = inlined_call_operand.vmem [shape: bf16[512,16], index: 0, kind: input, shape index: {}]   ;;  %s3376_s1 = inlined_call_operand.vmem [shape: bf16[16,40], index: 1, kind: input, shape index: {}]   ;;  %s3377_s2 = inlined_call_operand.vmem [shape: f32[1,40], index: 2, kind: input, shape index: {}]   ;;  %s3378_s3 = inlined_call_operand.vmem [shape: f32[1,40], index: 3, kind: input, shape index: {}]   ;;  %s3379_s4 = inlined_call_operand.vmem [shape: bf16[40,8], index: 4, kind: input, shape index: {}]   ;;  %s3380_s5 = inlined_call_operand.vmem [shape: f32[1,8], index: 5, kind: input, shape index: {}]   ;;  %s3381_s6 = inlined_call_operand.vmem [shape: f32[1,8], index: 6, kind: input, shape index: {}]   ;;  %s3382_s7 = inlined_call_operand.vmem [shape: bf16[8,8], index: 7, kind: input, shape index: {}]   ;;  %s3383_s8 = inlined_call_operand.vmem [shape: f32[1,8], index: 8, kind: input, shape index: {}]   ;;  %s3384_s9 = inlined_call_operand.vmem [shape: f32[1,8], index: 9, kind: input, shape index: {}]   ;;  %s3385_s10 = inlined_call_operand.vmem [shape: bf16[8,16], index: 10, kind: input, shape index: {}]   ;;  %s3386_s11 = inlined_call_operand.vmem [shape: f32[1,16], index: 11, kind: input, shape index: {}]   ;;  %s3387_s12 = inlined_call_operand.vmem [shape: f32[1,16], index: 12, kind: input, shape index: {}]   ;;  %s3388_s13 = inlined_call_operand.vmem [shape: bf16[512,16], index: 13, kind: output, shape index: {}]  }
   0x1 LB: > { %s2397_s26 = sadd.s32 4294967295, %s2811_s25   ;;  %p2401_p0 = scmp.ge.s32.totalorder %s2811_s25, 1  ;;  %s2811_s25 = sphi %s2883_s25, %s23_s25  }
   0x2   : > { %p388_p1 = scmp.lt.s32.totalorder %s2811_s25, 3 }
   0x4   : > { %p389_p2 = pnand %p2401_p0, %p388_p1 }
   0x5   : > { %s2402_s29 = sshll.u32 (!%p389_p2), %s2397_s26, 5 }
   0x6   : > { %392 = sbr.rel (%p389_p2) target bundleno = 909 (0x38d), region = 72  ;;  %p433_p3 = scmp.lt.s32.totalorder (!%p389_p2), %s2402_s29, 63 }
   0xb   : > { %v2785_v0 = vld [vmem:[%s3376_s1] sm:$0xff]   ;;  %s3390_s29 = smov (!%p433_p3, %s2402_s29), 63  ;;  %vm565_vm0 = vcmask 130048   ;;  %v2802_v17 = vld [vmem:[%s3379_s4 + $0x10] ss:$0 sps:$4 sm:$0xff]   ;;  %vm1034_vm1 = vcmask 1043456  }
   0xc   : > { %2634 = vmatprep.subr.bf16.mxu0 %v2785_v0  ;;  %s2403_s30 = sshll.u32 %s3390_s29, 2  ;;  %2774 = vmatprep.subr.msk.bf16.mxu1 %vm1034_vm1, %v2802_v17  ;;  %v1036_v18 = vsel %vm1034_vm1, %v2802_v17, 0  ;;  %v2803_v19 = vld [vmem:[%s3379_s4 + $0x8] sm:$0xff]   ;;  %v2804_v20 = vld [vmem:[%s3379_s4] sm:$0xff]   ;;  %vm985_vm6 = vcmask 326656  }
   0xd   : > { %2635 = vmatpush3.bf16.msra.mxu0 %v2785_v0  ;;  %s2902_s16 = scalar_lea.vmem %s3375_s0, %s2403_s30  ;;  %2669 = vmatpush3.bf16.msra.mxu1 %v1036_v18  ;;  %v1389_v21 = vld [vmem:[%s3382_s7] sm:$0xf]  ;;  %s3247_s17 = scalar_lea.vmem %s3388_s13, %s2403_s30 }
   0xe   : > { %v2786_v1 = vld [vmem:[%s2902_s16] sm:$0xff]   ;;  %v2787_v2 = vld [vmem:[%s2902_s16 + $0x8] sm:$0xff]   ;;  %v2788_v3 = vld [vmem:[%s2902_s16 + $0x10] sm:$0xff]   ;;  %2670 = vmatprep.subr.bf16.mxu1 %v2803_v19  ;;  %2775 = vmatprep.subr.msk.bf16.mxu0 %vm1034_vm1, %v1389_v21  ;;  %v1440_v22 = vsel %vm1034_vm1, %v1389_v21, 0 }
   0xf   : > { %2636 = vmatprep.mubr.msk.bf16.mxu0 %vm565_vm0, %v2786_v1  ;;  %v2789_v4 = vld [vmem:[%s2902_s16 + $0x18] sm:$0xff]   ;;  %v2790_v5 = vld [vmem:[%s2902_s16 + $0x20] sm:$0xff]   ;;  %v2791_v6 = vld [vmem:[%s2902_s16 + $0x28] sm:$0xff]  }
  0x10   : > { %2637 = vmatmul.mubr.msk.bf16.vlgmr.msra.gmra.mxu0 %vm565_vm0, %v2787_v2  ;;  %v2792_v7 = vld [vmem:[%s2902_s16 + $0x30] sm:$0xff]   ;;  %v2793_v8 = vld [vmem:[%s2902_s16 + $0x38] sm:$0xff]   ;;  %v2794_v9 = vld [vmem:[%s2902_s16 + $0x40] sm:$0xff]  }
  0x11   : > { %2640 = vmatprep.mubr.msk.bf16.mxu0 %vm565_vm0, %v2788_v3  ;;  %v2795_v10 = vld [vmem:[%s2902_s16 + $0x48] sm:$0xff]   ;;  %v2796_v11 = vld [vmem:[%s2902_s16 + $0x50] sm:$0xff]   ;;  %v2797_v12 = vld [vmem:[%s2902_s16 + $0x58] sm:$0xff]   ;;  %2671 = vmatpush3.bf16.msra.mxu1 %v2803_v19 }
  0x12   : > { %v2798_v13 = vld [vmem:[%s2902_s16 + $0x60] sm:$0xff]   ;;  %v2799_v14 = vld [vmem:[%s2902_s16 + $0x68] sm:$0xff]   ;;  %v2800_v15 = vld [vmem:[%s2902_s16 + $0x70] sm:$0xff]   ;;  %2672 = vmatprep.subr.bf16.mxu1 %v2804_v20  ;;  %2707 = vmatpush3.bf16.msra.mxu0 %v1440_v22 }
  0x13   : > { %v2801_v16 = vld [vmem:[%s2902_s16 + $0x78] sm:$0xff]   ;;  %v2955_v24 = vld [vmem:[%s3377_s2] ss:$0 sm:$0xff] }
  0x14   : > { %v2962_v29 = vld [vmem:[%s3378_s3] ss:$0 sm:$0xff] }
  0x15   : > { %2673 = vmatpush3.bf16.msra.mxu1 %v2804_v20 }
  0x18   : > { %2641 = vmatmul.mubr.msk.bf16.gmra.mxu0 %vm565_vm0, %v2789_v4 }
  0x19   : > { %2644 = vmatprep.mubr.msk.bf16.mxu0 %vm565_vm0, %v2790_v5 }
  0x20   : > { %2645 = vmatmul.mubr.msk.bf16.gmra.mxu0 %vm565_vm0, %v2791_v6 }
  0x21   : > { %2648 = vmatprep.mubr.msk.bf16.mxu0 %vm565_vm0, %v2792_v7 }
  0x28   : > { %2649 = vmatmul.mubr.msk.bf16.gmra.mxu0 %vm565_vm0, %v2793_v8 }
  0x29   : > { %2652 = vmatprep.mubr.msk.bf16.mxu0 %vm565_vm0, %v2794_v9 }
  0x30   : > { %2653 = vmatmul.mubr.msk.bf16.gmra.mxu0 %vm565_vm0, %v2795_v10 }
  0x31   : > { %2656 = vmatprep.mubr.msk.bf16.mxu0 %vm565_vm0, %v2796_v11 }
  0x38   : > { %2657 = vmatmul.mubr.msk.bf16.gmra.mxu0 %vm565_vm0, %v2797_v12 }
  0x39   : > { %2660 = vmatprep.mubr.msk.bf16.mxu0 %vm565_vm0, %v2798_v13 }
  0x40   : > { %2661 = vmatmul.mubr.msk.bf16.gmra.mxu0 %vm565_vm0, %v2799_v14 }
  0x41   : > { %2664 = vmatprep.mubr.msk.bf16.mxu0 %vm565_vm0, %v2800_v15 }
  0x48   : > { %2665 = vmatmul.mubr.msk.bf16.gmra.mxu0 %vm565_vm0, %v2801_v16 }
  0xd0   : > { %v2638_v23 = vpop.f32.mrf.mxu0 }
  0xd1   : > { %v784_v27 = vmul.f32 %v2638_v23, %v2955_v24 }
  0xd2   : > { %v648_v25 = vpop.f32.mrf.mxu0 }
  0xd3   : > { %v782_v26 = vmul.f32 %v2955_v24, %v648_v25  ;;  %v823_v35 = vadd.f32 %v2962_v29, %v784_v27 }
  0xd4   : > { %v2639_v28 = vpop.f32.mrf.mxu0 }
  0xd5   : > { %v785_v30 = vmul.f32 %v2639_v28, %v2955_v24  ;;  %v821_v32 = vadd.f32 %v2962_v29, %v782_v26  ;;  %v887_v42 = vmul.f32 0.01, %v823_v35  ;;  %vm855_vm5 = vcmp.ge.f32.partialorder %v823_v35, 0.0 }
  0xd6   : > { %v651_v31 = vpop.f32.mrf.mxu0 }
  0xd7   : > { %v824_v33 = vadd.f32 %v2962_v29, %v785_v30  ;;  %v783_v34 = vmul.f32 %v2955_v24, %v651_v31  ;;  %v885_v41 = vmul.f32 0.01, %v821_v32  ;;  %vm853_vm4 = vcmp.ge.f32.partialorder %v821_v32, 0.0 }
  0xd8   : > { %v2642_v36 = vpop.f32.mrf.mxu0  ;;  %v919_v53 = vsel %vm855_vm5, %v823_v35, %v887_v42 }
  0xd9   : > { %v822_v37 = vadd.f32 %v2962_v29, %v783_v34  ;;  %v888_v38 = vmul.f32 0.01, %v824_v33  ;;  %vm856_vm2 = vcmp.ge.f32.partialorder %v824_v33, 0.0  ;;  %v788_v43 = vmul.f32 %v2642_v36, %v2955_v24 }
  0xda   : > { %v664_v39 = vpop.f32.mrf.mxu0  ;;  %v917_v52 = vsel %vm853_vm4, %v821_v32, %v885_v41 }
  0xdb   : > { %v786_v40 = vmul.f32 %v2955_v24, %v664_v39  ;;  %vm854_vm3 = vcmp.ge.f32.partialorder %v822_v37, 0.0  ;;  %v886_v45 = vmul.f32 0.01, %v822_v37  ;;  %v920_v47 = vsel %vm856_vm2, %v824_v33, %v888_v38 }
  0xdc   : > { %v2643_v44 = vpop.f32.mrf.mxu0  ;;  %v827_v54 = vadd.f32 %v2962_v29, %v788_v43  ;;  %v950_v58 = vpack.c.bf16 %v920_v47, %v919_v53 }
  0xdd   : > { %v789_v46 = vmul.f32 %v2643_v44, %v2955_v24  ;;  %v918_v49 = vsel %vm854_vm3, %v822_v37, %v886_v45  ;;  %v825_v50 = vadd.f32 %v2962_v29, %v786_v40 }
  0xde   : > { %v667_v48 = vpop.f32.mrf.mxu0  ;;  %v949_v57 = vpack.c.bf16 %v918_v49, %v917_v52  ;;  %v891_v1 = vmul.f32 0.01, %v827_v54  ;;  %vm859_vm10 = vcmp.ge.f32.partialorder %v827_v54, 0.0 }
  0xdf   : > { %v828_v51 = vadd.f32 %v2962_v29, %v789_v46  ;;  %v787_v55 = vmul.f32 %v2955_v24, %v667_v48  ;;  %v889_v62 = vmul.f32 0.01, %v825_v50  ;;  %vm857_vm8 = vcmp.ge.f32.partialorder %v825_v50, 0.0 }
  0xe0   : > { %v2646_v56 = vpop.f32.mrf.mxu0  ;;  %2674 = vmatprep.mubr.msk.bf16.mxu1 %vm985_vm6, %v949_v57  ;;  %v923_v12 = vsel %vm859_vm10, %v827_v54, %v891_v1 }
  0xe1   : > { %v892_v59 = vmul.f32 0.01, %v828_v51  ;;  %v826_v60 = vadd.f32 %v2962_v29, %v787_v55  ;;  %vm860_vm7 = vcmp.ge.f32.partialorder %v828_v51, 0.0  ;;  %v792_v63 = vmul.f32 %v2646_v56, %v2955_v24  ;;  %2675 = vmatmul.mubr.msk.bf16.vlgmr.msra.gmra.mxu1 %vm985_vm6, %v950_v58 }
  0xe2   : > { %v680_v61 = vpop.f32.mrf.mxu0  ;;  %v921_v8 = vsel %vm857_vm8, %v825_v50, %v889_v62 }
  0xe3   : > { %v790_v0 = vmul.f32 %v2955_v24, %v680_v61  ;;  %vm858_vm9 = vcmp.ge.f32.partialorder %v826_v60, 0.0  ;;  %v890_v2 = vmul.f32 0.01, %v826_v60  ;;  %v924_v5 = vsel %vm860_vm7, %v828_v51, %v892_v59 }
  0xe4   : > { %v2647_v3 = vpop.f32.mrf.mxu0  ;;  %v831_v9 = vadd.f32 %v2962_v29, %v792_v63  ;;  %v952_v16 = vpack.c.bf16 %v924_v5, %v923_v12 }
  0xe5   : > { %v793_v4 = vmul.f32 %v2647_v3, %v2955_v24  ;;  %v922_v6 = vsel %vm858_vm9, %v826_v60, %v890_v2  ;;  %v829_v10 = vadd.f32 %v2962_v29, %v790_v0 }
  0xe6   : > { %v683_v7 = vpop.f32.mrf.mxu0  ;;  %v951_v15 = vpack.c.bf16 %v922_v6, %v921_v8  ;;  %v895_v20 = vmul.f32 0.01, %v831_v9  ;;  %vm863_vm14 = vcmp.ge.f32.partialorder %v831_v9, 0.0 }
  0xe7   : > { %v832_v11 = vadd.f32 %v2962_v29, %v793_v4  ;;  %v791_v13 = vmul.f32 %v2955_v24, %v683_v7  ;;  %v893_v21 = vmul.f32 0.01, %v829_v10  ;;  %vm861_vm12 = vcmp.ge.f32.partialorder %v829_v10, 0.0 }
  0xe8   : > { %v2650_v14 = vpop.f32.mrf.mxu0  ;;  %2678 = vmatprep.mubr.msk.bf16.mxu1 %vm985_vm6, %v951_v15  ;;  %v927_v35 = vsel %vm863_vm14, %v831_v9, %v895_v20 }
  0xe9   : > { %v896_v17 = vmul.f32 0.01, %v832_v11  ;;  %v830_v18 = vadd.f32 %v2962_v29, %v791_v13  ;;  %vm864_vm11 = vcmp.ge.f32.partialorder %v832_v11, 0.0  ;;  %2679 = vmatmul.mubr.msk.bf16.gmra.mxu1 %vm985_vm6, %v952_v16  ;;  %v796_v25 = vmul.f32 %v2650_v14, %v2955_v24 }
  0xea   : > { %v696_v19 = vpop.f32.mrf.mxu0  ;;  %v925_v32 = vsel %vm861_vm12, %v829_v10, %v893_v21 }
  0xeb   : > { %v794_v22 = vmul.f32 %v2955_v24, %v696_v19  ;;  %vm862_vm13 = vcmp.ge.f32.partialorder %v830_v18, 0.0  ;;  %v894_v23 = vmul.f32 0.01, %v830_v18  ;;  %v928_v28 = vsel %vm864_vm11, %v832_v11, %v896_v17 }
  0xec   : > { %v2651_v26 = vpop.f32.mrf.mxu0  ;;  %v835_v36 = vadd.f32 %v2962_v29, %v796_v25  ;;  %v954_v40 = vpack.c.bf16 %v928_v28, %v927_v35 }
  0xed   : > { %v797_v27 = vmul.f32 %v2651_v26, %v2955_v24  ;;  %v926_v30 = vsel %vm862_vm13, %v830_v18, %v894_v23  ;;  %v833_v33 = vadd.f32 %v2962_v29, %v794_v22 }
  0xee   : > { %v699_v31 = vpop.f32.mrf.mxu0  ;;  %v953_v39 = vpack.c.bf16 %v926_v30, %v925_v32  ;;  %v899_v47 = vmul.f32 0.01, %v835_v36  ;;  %vm867_vm3 = vcmp.ge.f32.partialorder %v835_v36, 0.0 }
  0xef   : > { %v836_v34 = vadd.f32 %v2962_v29, %v797_v27  ;;  %v795_v37 = vmul.f32 %v2955_v24, %v699_v31  ;;  %v897_v44 = vmul.f32 0.01, %v833_v33  ;;  %vm865_vm0 = vcmp.ge.f32.partialorder %v833_v33, 0.0 }
  0xf0   : > { %v2654_v38 = vpop.f32.mrf.mxu0  ;;  %2682 = vmatprep.mubr.msk.bf16.mxu1 %vm985_vm6, %v953_v39  ;;  %v931_v58 = vsel %vm867_vm3, %v835_v36, %v899_v47 }
  0xf1   : > { %v900_v41 = vmul.f32 0.01, %v836_v34  ;;  %v834_v42 = vadd.f32 %v2962_v29, %v795_v37  ;;  %vm868_vm15 = vcmp.ge.f32.partialorder %v836_v34, 0.0  ;;  %v800_v45 = vmul.f32 %v2654_v38, %v2955_v24  ;;  %2683 = vmatmul.mubr.msk.bf16.gmra.mxu1 %vm985_vm6, %v954_v40 }
  0xf2   : > { %v712_v43 = vpop.f32.mrf.mxu0  ;;  %v929_v54 = vsel %vm865_vm0, %v833_v33, %v897_v44 }
  0xf3   : > { %v798_v46 = vmul.f32 %v2955_v24, %v712_v43  ;;  %vm866_vm2 = vcmp.ge.f32.partialorder %v834_v42, 0.0  ;;  %v898_v48 = vmul.f32 0.01, %v834_v42  ;;  %v932_v51 = vsel %vm868_vm15, %v836_v34, %v900_v41 }
  0xf4   : > { %v2655_v49 = vpop.f32.mrf.mxu0  ;;  %v839_v55 = vadd.f32 %v2962_v29, %v800_v45  ;;  %v956_v62 = vpack.c.bf16 %v932_v51, %v931_v58 }
  0xf5   : > { %v801_v50 = vmul.f32 %v2655_v49, %v2955_v24  ;;  %v930_v52 = vsel %vm866_vm2, %v834_v42, %v898_v48  ;;  %v837_v56 = vadd.f32 %v2962_v29, %v798_v46 }
  0xf6   : > { %v715_v53 = vpop.f32.mrf.mxu0  ;;  %v955_v61 = vpack.c.bf16 %v930_v52, %v929_v54  ;;  %v903_v2 = vmul.f32 0.01, %v839_v55  ;;  %vm871_vm8 = vcmp.ge.f32.partialorder %v839_v55, 0.0 }
  0xf7   : > { %v840_v57 = vadd.f32 %v2962_v29, %v801_v50  ;;  %v799_v59 = vmul.f32 %v2955_v24, %v715_v53  ;;  %v901_v3 = vmul.f32 0.01, %v837_v56  ;;  %vm869_vm5 = vcmp.ge.f32.partialorder %v837_v56, 0.0 }
  0xf8   : > { %v2658_v60 = vpop.f32.mrf.mxu0  ;;  %2686 = vmatprep.mubr.msk.bf16.mxu1 %vm985_vm6, %v955_v61  ;;  %v935_v15 = vsel %vm871_vm8, %v839_v55, %v903_v2 }
  0xf9   : > { %v904_v63 = vmul.f32 0.01, %v840_v57  ;;  %v838_v0 = vadd.f32 %v2962_v29, %v799_v59  ;;  %vm872_vm4 = vcmp.ge.f32.partialorder %v840_v57, 0.0  ;;  %2687 = vmatmul.mubr.msk.bf16.gmra.mxu1 %vm985_vm6, %v956_v62  ;;  %v804_v6 = vmul.f32 %v2658_v60, %v2955_v24 }
  0xfa   : > { %v728_v1 = vpop.f32.mrf.mxu0  ;;  %v933_v12 = vsel %vm869_vm5, %v837_v56, %v901_v3 }
  0xfb   : > { %v802_v4 = vmul.f32 %v2955_v24, %v728_v1  ;;  %vm870_vm7 = vcmp.ge.f32.partialorder %v838_v0, 0.0  ;;  %v902_v5 = vmul.f32 0.01, %v838_v0  ;;  %v936_v9 = vsel %vm872_vm4, %v840_v57, %v904_v63 }
  0xfc   : > { %v2659_v7 = vpop.f32.mrf.mxu0  ;;  %v843_v16 = vadd.f32 %v2962_v29, %v804_v6  ;;  %v958_v20 = vpack.c.bf16 %v936_v9, %v935_v15 }
  0xfd   : > { %v805_v8 = vmul.f32 %v2659_v7, %v2955_v24  ;;  %v934_v10 = vsel %vm870_vm7, %v838_v0, %v902_v5  ;;  %v841_v13 = vadd.f32 %v2962_v29, %v802_v4 }
  0xfe   : > { %v731_v11 = vpop.f32.mrf.mxu0  ;;  %v957_v19 = vpack.c.bf16 %v934_v10, %v933_v12  ;;  %v907_v28 = vmul.f32 0.01, %v843_v16  ;;  %vm875_vm12 = vcmp.ge.f32.partialorder %v843_v16, 0.0 }
  0xff   : > { %v844_v14 = vadd.f32 %v2962_v29, %v805_v8  ;;  %v803_v17 = vmul.f32 %v2955_v24, %v731_v11  ;;  %v905_v25 = vmul.f32 0.01, %v841_v13  ;;  %vm873_vm10 = vcmp.ge.f32.partialorder %v841_v13, 0.0 }
 0x100   : > { %v2662_v18 = vpop.f32.mrf.mxu0  ;;  %2690 = vmatprep.mubr.msk.bf16.mxu1 %vm985_vm6, %v957_v19  ;;  %v939_v40 = vsel %vm875_vm12, %v843_v16, %v907_v28 }
 0x101   : > { %v908_v21 = vmul.f32 0.01, %v844_v14  ;;  %v842_v22 = vadd.f32 %v2962_v29, %v803_v17  ;;  %vm876_vm9 = vcmp.ge.f32.partialorder %v844_v14, 0.0  ;;  %v808_v26 = vmul.f32 %v2662_v18, %v2955_v24  ;;  %2691 = vmatmul.mubr.msk.bf16.gmra.mxu1 %vm985_vm6, %v958_v20  ;;  %v3057_v18 = vld [vmem:[%s3381_s6] ss:$0 sm:$0xff] }
 0x102   : > { %v744_v23 = vpop.f32.mrf.mxu0  ;;  %v937_v36 = vsel %vm873_vm10, %v841_v13, %v905_v25 }
 0x103   : > { %v806_v27 = vmul.f32 %v2955_v24, %v744_v23  ;;  %vm874_vm11 = vcmp.ge.f32.partialorder %v842_v22, 0.0  ;;  %v906_v30 = vmul.f32 0.01, %v842_v22  ;;  %v940_v33 = vsel %vm876_vm9, %v844_v14, %v908_v21  ;;  %v3050_v14 = vld [vmem:[%s3380_s5] ss:$0 sm:$0xff] }
 0x104   : > { %v2663_v31 = vpop.f32.mrf.mxu0  ;;  %v847_v37 = vadd.f32 %v2962_v29, %v808_v26  ;;  %v960_v44 = vpack.c.bf16 %v940_v33, %v939_v40  ;;  %vm1390_vm9 = vcmask 64512  }
 0x105   : > { %v809_v32 = vmul.f32 %v2663_v31, %v2955_v24  ;;  %v938_v34 = vsel %vm874_vm11, %v842_v22, %v906_v30  ;;  %v845_v38 = vadd.f32 %v2962_v29, %v806_v27 }
 0x106   : > { %v747_v35 = vpop.f32.mrf.mxu0  ;;  %v959_v43 = vpack.c.bf16 %v938_v34, %v937_v36  ;;  %v911_v48 = vmul.f32 0.01, %v847_v37  ;;  %vm879_vm0 = vcmp.ge.f32.partialorder %v847_v37, 0.0 }
 0x107   : > { %v848_v39 = vadd.f32 %v2962_v29, %v809_v32  ;;  %v807_v41 = vmul.f32 %v2955_v24, %v747_v35  ;;  %v909_v49 = vmul.f32 0.01, %v845_v38  ;;  %vm877_vm14 = vcmp.ge.f32.partialorder %v845_v38, 0.0 }
 0x108   : > { %v2666_v42 = vpop.f32.mrf.mxu0  ;;  %2694 = vmatprep.mubr.msk.bf16.mxu1 %vm985_vm6, %v959_v43  ;;  %v943_v61 = vsel %vm879_vm0, %v847_v37, %v911_v48 }
 0x109   : > { %v912_v45 = vmul.f32 0.01, %v848_v39  ;;  %v846_v46 = vadd.f32 %v2962_v29, %v807_v41  ;;  %vm880_vm13 = vcmp.ge.f32.partialorder %v848_v39, 0.0  ;;  %2695 = vmatmul.mubr.msk.bf16.gmra.mxu1 %vm985_vm6, %v960_v44  ;;  %v812_v52 = vmul.f32 %v2666_v42, %v2955_v24 }
 0x10a   : > { %v760_v47 = vpop.f32.mrf.mxu0  ;;  %v941_v59 = vsel %vm877_vm14, %v845_v38, %v909_v49 }
 0x10b   : > { %v810_v50 = vmul.f32 %v2955_v24, %v760_v47  ;;  %vm878_vm15 = vcmp.ge.f32.partialorder %v846_v46, 0.0  ;;  %v910_v51 = vmul.f32 0.01, %v846_v46  ;;  %v944_v55 = vsel %vm880_vm13, %v848_v39, %v912_v45 }
 0x10c   : > { %v2667_v53 = vpop.f32.mrf.mxu0  ;;  %v851_v62 = vadd.f32 %v2962_v29, %v812_v52  ;;  %v962_v1 = vpack.c.bf16 %v944_v55, %v943_v61 }
 0x10d   : > { %v813_v54 = vmul.f32 %v2667_v53, %v2955_v24  ;;  %v942_v56 = vsel %vm878_vm15, %v846_v46, %v910_v51  ;;  %v849_v57 = vadd.f32 %v2962_v29, %v810_v50 }
 0x10e   : > { %v763_v58 = vpop.f32.mrf.mxu0  ;;  %v961_v0 = vpack.c.bf16 %v942_v56, %v941_v59  ;;  %v915_v5 = vmul.f32 0.01, %v851_v62  ;;  %vm883_vm5 = vcmp.ge.f32.partialorder %v851_v62, 0.0 }
 0x10f   : > { %v852_v60 = vadd.f32 %v2962_v29, %v813_v54  ;;  %v811_v63 = vmul.f32 %v2955_v24, %v763_v58  ;;  %v913_v2 = vmul.f32 0.01, %v849_v57  ;;  %vm881_vm2 = vcmp.ge.f32.partialorder %v849_v57, 0.0 }
 0x110   : > { %2698 = vmatprep.mubr.msk.bf16.mxu1 %vm985_vm6, %v961_v0  ;;  %v947_v10 = vsel %vm883_vm5, %v851_v62, %v915_v5 }
 0x111   : > { %v916_v3 = vmul.f32 0.01, %v852_v60  ;;  %v850_v4 = vadd.f32 %v2962_v29, %v811_v63  ;;  %vm884_vm3 = vcmp.ge.f32.partialorder %v852_v60, 0.0  ;;  %2699 = vmatmul.mubr.msk.bf16.gmra.mxu1 %vm985_vm6, %v962_v1  ;;  %v945_v7 = vsel %vm881_vm2, %v849_v57, %v913_v2  ;;  %v1793_v29 = vld [vmem:[%s3385_s10] sm:$0xf] }
 0x112   : > { %2776 = vmatprep.subr.msk.bf16.mxu1 %vm1034_vm1, %v1793_v29  ;;  %v1843_v12 = vsel %vm1034_vm1, %v1793_v29, 0 }
 0x113   : > { %vm882_vm4 = vcmp.ge.f32.partialorder %v850_v4, 0.0  ;;  %v914_v6 = vmul.f32 0.01, %v850_v4  ;;  %v948_v8 = vsel %vm884_vm3, %v852_v60, %v916_v3  ;;  %2741 = vmatpush3.bf16.msra.mxu1 %v1843_v12 }
 0x114   : > { %v964_v11 = vpack.c.bf16 %v948_v8, %v947_v10 }
 0x115   : > { %v946_v9 = vsel %vm882_vm4, %v850_v4, %v914_v6 }
 0x116   : > { %v963_v24 = vpack.c.bf16 %v946_v9, %v945_v7 }
 0x118   : > { %2702 = vmatprep.mubr.msk.bf16.mxu1 %vm985_vm6, %v963_v24 }
 0x119   : > { %2703 = vmatmul.mubr.msk.bf16.gmra.mxu1 %vm985_vm6, %v964_v11 }
 0x1a1   : > { %v2676_v13 = vpop.f32.mrf.mxu1 }
 0x1a2   : > { %v1208_v16 = vmul.f32 %v2676_v13, %v3050_v14 }
 0x1a3   : > { %v1072_v15 = vpop.f32.mrf.mxu1 }
 0x1a4   : > { %v1206_v17 = vmul.f32 %v3050_v14, %v1072_v15  ;;  %v1247_v22 = vadd.f32 %v3057_v18, %v1208_v16 }
 0x1a5   : > { %v2677_v19 = vpop.f32.mrf.mxu1 }
 0x1a6   : > { %v1209_v20 = vmul.f32 %v2677_v19, %v3050_v14  ;;  %v1245_v23 = vadd.f32 %v3057_v18, %v1206_v17  ;;  %v1311_v32 = vmul.f32 0.01, %v1247_v22  ;;  %vm1279_vm8 = vcmp.ge.f32.partialorder %v1247_v22, 0.0 }
 0x1a7   : > { %v1075_v21 = vpop.f32.mrf.mxu1 }
 0x1a8   : > { %v1248_v25 = vadd.f32 %v3057_v18, %v1209_v20  ;;  %v1207_v26 = vmul.f32 %v3050_v14, %v1075_v21  ;;  %v1309_v33 = vmul.f32 0.01, %v1245_v23  ;;  %vm1277_vm6 = vcmp.ge.f32.partialorder %v1245_v23, 0.0 }
 0x1a9   : > { %v2680_v27 = vpop.f32.mrf.mxu1  ;;  %v1343_v45 = vsel %vm1279_vm8, %v1247_v22, %v1311_v32 }
 0x1aa   : > { %v1312_v28 = vmul.f32 0.01, %v1248_v25  ;;  %v1246_v30 = vadd.f32 %v3057_v18, %v1207_v26  ;;  %vm1280_vm1 = vcmp.ge.f32.partialorder %v1248_v25, 0.0  ;;  %v1212_v36 = vmul.f32 %v2680_v27, %v3050_v14 }
 0x1ab   : > { %v1088_v31 = vpop.f32.mrf.mxu1  ;;  %v1341_v42 = vsel %vm1277_vm6, %v1245_v23, %v1309_v33 }
 0x1ac   : > { %v1210_v34 = vmul.f32 %v3050_v14, %v1088_v31  ;;  %vm1278_vm7 = vcmp.ge.f32.partialorder %v1246_v30, 0.0  ;;  %v1310_v35 = vmul.f32 0.01, %v1246_v30  ;;  %v1344_v39 = vsel %vm1280_vm1, %v1248_v25, %v1312_v28 }
 0x1ad   : > { %v2681_v37 = vpop.f32.mrf.mxu1  ;;  %v1251_v46 = vadd.f32 %v3057_v18, %v1212_v36  ;;  %v1374_v50 = vpack.c.bf16 %v1344_v39, %v1343_v45 }
 0x1ae   : > { %v1213_v38 = vmul.f32 %v2681_v37, %v3050_v14  ;;  %v1342_v40 = vsel %vm1278_vm7, %v1246_v30, %v1310_v35  ;;  %v1249_v43 = vadd.f32 %v3057_v18, %v1210_v34 }
 0x1af   : > { %v1091_v41 = vpop.f32.mrf.mxu1  ;;  %v1373_v49 = vpack.c.bf16 %v1342_v40, %v1341_v42  ;;  %v1315_v57 = vmul.f32 0.01, %v1251_v46  ;;  %vm1283_vm13 = vcmp.ge.f32.partialorder %v1251_v46, 0.0 }
 0x1b0   : > { %v1252_v44 = vadd.f32 %v3057_v18, %v1213_v38  ;;  %v1211_v47 = vmul.f32 %v3050_v14, %v1091_v41  ;;  %v1313_v54 = vmul.f32 0.01, %v1249_v43  ;;  %vm1281_vm11 = vcmp.ge.f32.partialorder %v1249_v43, 0.0 }
 0x1b1   : > { %v2684_v48 = vpop.f32.mrf.mxu1  ;;  %2708 = vmatprep.mubr.msk.bf16.mxu0 %vm1390_vm9, %v1373_v49  ;;  %v1347_v4 = vsel %vm1283_vm13, %v1251_v46, %v1315_v57 }
 0x1b2   : > { %v1316_v51 = vmul.f32 0.01, %v1252_v44  ;;  %v1250_v52 = vadd.f32 %v3057_v18, %v1211_v47  ;;  %vm1284_vm10 = vcmp.ge.f32.partialorder %v1252_v44, 0.0  ;;  %v1216_v55 = vmul.f32 %v2684_v48, %v3050_v14  ;;  %2709 = vmatmul.mubr.msk.bf16.vlgmr.msra.gmra.mxu0 %vm1390_vm9, %v1374_v50 }
 0x1b3   : > { %v1104_v53 = vpop.f32.mrf.mxu1  ;;  %v1345_v0 = vsel %vm1281_vm11, %v1249_v43, %v1313_v54 }
 0x1b4   : > { %v1214_v56 = vmul.f32 %v3050_v14, %v1104_v53  ;;  %vm1282_vm12 = vcmp.ge.f32.partialorder %v1250_v52, 0.0  ;;  %v1314_v58 = vmul.f32 0.01, %v1250_v52  ;;  %v1348_v61 = vsel %vm1284_vm10, %v1252_v44, %v1316_v51 }
 0x1b5   : > { %v2685_v59 = vpop.f32.mrf.mxu1  ;;  %v1255_v1 = vadd.f32 %v3057_v18, %v1216_v55  ;;  %v1376_v8 = vpack.c.bf16 %v1348_v61, %v1347_v4 }
 0x1b6   : > { %v1217_v60 = vmul.f32 %v2685_v59, %v3050_v14  ;;  %v1346_v62 = vsel %vm1282_vm12, %v1250_v52, %v1314_v58  ;;  %v1253_v2 = vadd.f32 %v3057_v18, %v1214_v56 }
 0x1b7   : > { %v1107_v63 = vpop.f32.mrf.mxu1  ;;  %v1375_v7 = vpack.c.bf16 %v1346_v62, %v1345_v0  ;;  %v1319_v11 = vmul.f32 0.01, %v1255_v1  ;;  %vm1287_vm2 = vcmp.ge.f32.partialorder %v1255_v1, 0.0 }
 0x1b8   : > { %v1256_v3 = vadd.f32 %v3057_v18, %v1217_v60  ;;  %v1215_v5 = vmul.f32 %v3050_v14, %v1107_v63  ;;  %v1317_v29 = vmul.f32 0.01, %v1253_v2  ;;  %vm1285_vm15 = vcmp.ge.f32.partialorder %v1253_v2, 0.0 }
 0x1b9   : > { %v2688_v6 = vpop.f32.mrf.mxu1  ;;  %2712 = vmatprep.mubr.msk.bf16.mxu0 %vm1390_vm9, %v1375_v7  ;;  %v1351_v26 = vsel %vm1287_vm2, %v1255_v1, %v1319_v11 }
 0x1ba   : > { %v1320_v9 = vmul.f32 0.01, %v1256_v3  ;;  %v1254_v24 = vadd.f32 %v3057_v18, %v1215_v5  ;;  %vm1288_vm14 = vcmp.ge.f32.partialorder %v1256_v3, 0.0  ;;  %2713 = vmatmul.mubr.msk.bf16.gmra.mxu0 %vm1390_vm9, %v1376_v8  ;;  %v1220_v15 = vmul.f32 %v2688_v6, %v3050_v14 }
 0x1bb   : > { %v1120_v10 = vpop.f32.mrf.mxu1  ;;  %v1349_v22 = vsel %vm1285_vm15, %v1253_v2, %v1317_v29 }
 0x1bc   : > { %v1218_v12 = vmul.f32 %v3050_v14, %v1120_v10  ;;  %vm1286_vm0 = vcmp.ge.f32.partialorder %v1254_v24, 0.0  ;;  %v1318_v13 = vmul.f32 0.01, %v1254_v24  ;;  %v1352_v19 = vsel %vm1288_vm14, %v1256_v3, %v1320_v9 }
 0x1bd   : > { %v2689_v16 = vpop.f32.mrf.mxu1  ;;  %v1259_v27 = vadd.f32 %v3057_v18, %v1220_v15  ;;  %v1378_v32 = vpack.c.bf16 %v1352_v19, %v1351_v26 }
 0x1be   : > { %v1221_v17 = vmul.f32 %v2689_v16, %v3050_v14  ;;  %v1350_v20 = vsel %vm1286_vm0, %v1254_v24, %v1318_v13  ;;  %v1257_v23 = vadd.f32 %v3057_v18, %v1218_v12 }
 0x1bf   : > { %v1123_v21 = vpop.f32.mrf.mxu1  ;;  %v1377_v31 = vpack.c.bf16 %v1350_v20, %v1349_v22  ;;  %v1323_v39 = vmul.f32 0.01, %v1259_v27  ;;  %vm1291_vm1 = vcmp.ge.f32.partialorder %v1259_v27, 0.0 }
 0x1c0   : > { %v1260_v25 = vadd.f32 %v3057_v18, %v1221_v17  ;;  %v1219_v28 = vmul.f32 %v3050_v14, %v1123_v21  ;;  %v1321_v36 = vmul.f32 0.01, %v1257_v23  ;;  %vm1289_vm4 = vcmp.ge.f32.partialorder %v1257_v23, 0.0 }
 0x1c1   : > { %v2692_v30 = vpop.f32.mrf.mxu1  ;;  %2716 = vmatprep.mubr.msk.bf16.mxu0 %vm1390_vm9, %v1377_v31  ;;  %v1355_v50 = vsel %vm1291_vm1, %v1259_v27, %v1323_v39 }
 0x1c2   : > { %v1324_v33 = vmul.f32 0.01, %v1260_v25  ;;  %v1258_v34 = vadd.f32 %v3057_v18, %v1219_v28  ;;  %vm1292_vm3 = vcmp.ge.f32.partialorder %v1260_v25, 0.0  ;;  %v1224_v37 = vmul.f32 %v2692_v30, %v3050_v14  ;;  %2717 = vmatmul.mubr.msk.bf16.gmra.mxu0 %vm1390_vm9, %v1378_v32 }
 0x1c3   : > { %v1136_v35 = vpop.f32.mrf.mxu1  ;;  %v1353_v46 = vsel %vm1289_vm4, %v1257_v23, %v1321_v36 }
 0x1c4   : > { %v1222_v38 = vmul.f32 %v3050_v14, %v1136_v35  ;;  %vm1290_vm5 = vcmp.ge.f32.partialorder %v1258_v34, 0.0  ;;  %v1322_v40 = vmul.f32 0.01, %v1258_v34  ;;  %v1356_v43 = vsel %vm1292_vm3, %v1260_v25, %v1324_v33 }
 0x1c5   : > { %v2693_v41 = vpop.f32.mrf.mxu1  ;;  %v1263_v47 = vadd.f32 %v3057_v18, %v1224_v37  ;;  %v1380_v54 = vpack.c.bf16 %v1356_v43, %v1355_v50 }
 0x1c6   : > { %v1225_v42 = vmul.f32 %v2693_v41, %v3050_v14  ;;  %v1354_v44 = vsel %vm1290_vm5, %v1258_v34, %v1322_v40  ;;  %v1261_v48 = vadd.f32 %v3057_v18, %v1222_v38 }
 0x1c7   : > { %v1139_v45 = vpop.f32.mrf.mxu1  ;;  %v1379_v53 = vpack.c.bf16 %v1354_v44, %v1353_v46  ;;  %v1327_v58 = vmul.f32 0.01, %v1263_v47  ;;  %vm1295_vm10 = vcmp.ge.f32.partialorder %v1263_v47, 0.0 }
 0x1c8   : > { %v1264_v49 = vadd.f32 %v3057_v18, %v1225_v42  ;;  %v1223_v51 = vmul.f32 %v3050_v14, %v1139_v45  ;;  %v1325_v59 = vmul.f32 0.01, %v1261_v48  ;;  %vm1293_vm7 = vcmp.ge.f32.partialorder %v1261_v48, 0.0 }
 0x1c9   : > { %v2696_v52 = vpop.f32.mrf.mxu1  ;;  %2720 = vmatprep.mubr.msk.bf16.mxu0 %vm1390_vm9, %v1379_v53  ;;  %v1359_v7 = vsel %vm1295_vm10, %v1263_v47, %v1327_v58 }
 0x1ca   : > { %v1328_v55 = vmul.f32 0.01, %v1264_v49  ;;  %v1262_v56 = vadd.f32 %v3057_v18, %v1223_v51  ;;  %vm1296_vm6 = vcmp.ge.f32.partialorder %v1264_v49, 0.0  ;;  %2721 = vmatmul.mubr.msk.bf16.gmra.mxu0 %vm1390_vm9, %v1380_v54  ;;  %v1228_v62 = vmul.f32 %v2696_v52, %v3050_v14 }
 0x1cb   : > { %v1152_v57 = vpop.f32.mrf.mxu1  ;;  %v1357_v4 = vsel %vm1293_vm7, %v1261_v48, %v1325_v59 }
 0x1cc   : > { %v1226_v60 = vmul.f32 %v3050_v14, %v1152_v57  ;;  %vm1294_vm8 = vcmp.ge.f32.partialorder %v1262_v56, 0.0  ;;  %v1326_v61 = vmul.f32 0.01, %v1262_v56  ;;  %v1360_v1 = vsel %vm1296_vm6, %v1264_v49, %v1328_v55 }
 0x1cd   : > { %v2697_v63 = vpop.f32.mrf.mxu1  ;;  %v1267_v8 = vadd.f32 %v3057_v18, %v1228_v62  ;;  %v1382_v11 = vpack.c.bf16 %v1360_v1, %v1359_v7 }
 0x1ce   : > { %v1229_v0 = vmul.f32 %v2697_v63, %v3050_v14  ;;  %v1358_v2 = vsel %vm1294_vm8, %v1262_v56, %v1326_v61  ;;  %v1265_v5 = vadd.f32 %v3057_v18, %v1226_v60 }
 0x1cf   : > { %v1155_v3 = vpop.f32.mrf.mxu1  ;;  %v1381_v10 = vpack.c.bf16 %v1358_v2, %v1357_v4  ;;  %v1331_v19 = vmul.f32 0.01, %v1267_v8  ;;  %vm1299_vm14 = vcmp.ge.f32.partialorder %v1267_v8, 0.0  ;;  %v3140_v4 = vld [vmem:[%s3383_s8] ss:$0 sm:$0xff] }
 0x1d0   : > { %v1268_v6 = vadd.f32 %v3057_v18, %v1229_v0  ;;  %v1227_v9 = vmul.f32 %v3050_v14, %v1155_v3  ;;  %v1329_v15 = vmul.f32 0.01, %v1265_v5  ;;  %vm1297_vm12 = vcmp.ge.f32.partialorder %v1265_v5, 0.0 }
 0x1d1   : > { %v2700_v24 = vpop.f32.mrf.mxu1  ;;  %2724 = vmatprep.mubr.msk.bf16.mxu0 %vm1390_vm9, %v1381_v10  ;;  %v1363_v32 = vsel %vm1299_vm14, %v1267_v8, %v1331_v19  ;;  %v3147_v8 = vld [vmem:[%s3384_s9] ss:$0 sm:$0xff] }
 0x1d2   : > { %v1332_v29 = vmul.f32 0.01, %v1268_v6  ;;  %v1266_v12 = vadd.f32 %v3057_v18, %v1227_v9  ;;  %vm1300_vm11 = vcmp.ge.f32.partialorder %v1268_v6, 0.0  ;;  %v1232_v16 = vmul.f32 %v2700_v24, %v3050_v14  ;;  %2725 = vmatmul.mubr.msk.bf16.gmra.mxu0 %vm1390_vm9, %v1382_v11 }
 0x1d3   : > { %v1168_v13 = vpop.f32.mrf.mxu1  ;;  %v1361_v27 = vsel %vm1297_vm12, %v1265_v5, %v1329_v15 }
 0x1d4   : > { %v1230_v17 = vmul.f32 %v3050_v14, %v1168_v13  ;;  %vm1298_vm13 = vcmp.ge.f32.partialorder %v1266_v12, 0.0  ;;  %v1330_v20 = vmul.f32 0.01, %v1266_v12  ;;  %v1364_v23 = vsel %vm1300_vm11, %v1268_v6, %v1332_v29 }
 0x1d5   : > { %v2701_v21 = vpop.f32.mrf.mxu1  ;;  %v1271_v28 = vadd.f32 %v3057_v18, %v1232_v16  ;;  %v1384_v36 = vpack.c.bf16 %v1364_v23, %v1363_v32 }
 0x1d6   : > { %v1233_v22 = vmul.f32 %v2701_v21, %v3050_v14  ;;  %v1362_v25 = vsel %vm1298_vm13, %v1266_v12, %v1330_v20  ;;  %v1269_v30 = vadd.f32 %v3057_v18, %v1230_v17 }
 0x1d7   : > { %v1171_v26 = vpop.f32.mrf.mxu1  ;;  %v1383_v35 = vpack.c.bf16 %v1362_v25, %v1361_v27  ;;  %v1335_v40 = vmul.f32 0.01, %v1271_v28  ;;  %vm1303_vm3 = vcmp.ge.f32.partialorder %v1271_v28, 0.0 }
 0x1d8   : > { %v1272_v31 = vadd.f32 %v3057_v18, %v1233_v22  ;;  %v1231_v33 = vmul.f32 %v3050_v14, %v1171_v26  ;;  %v1333_v41 = vmul.f32 0.01, %v1269_v30  ;;  %vm1301_vm0 = vcmp.ge.f32.partialorder %v1269_v30, 0.0 }
 0x1d9   : > { %v2704_v34 = vpop.f32.mrf.mxu1  ;;  %2728 = vmatprep.mubr.msk.bf16.mxu0 %vm1390_vm9, %v1383_v35  ;;  %v1367_v53 = vsel %vm1303_vm3, %v1271_v28, %v1335_v40 }
 0x1da   : > { %v1336_v37 = vmul.f32 0.01, %v1272_v31  ;;  %v1270_v38 = vadd.f32 %v3057_v18, %v1231_v33  ;;  %vm1304_vm15 = vcmp.ge.f32.partialorder %v1272_v31, 0.0  ;;  %2729 = vmatmul.mubr.msk.bf16.gmra.mxu0 %vm1390_vm9, %v1384_v36  ;;  %v1236_v44 = vmul.f32 %v2704_v34, %v3050_v14 }
 0x1db   : > { %v1184_v39 = vpop.f32.mrf.mxu1  ;;  %v1365_v51 = vsel %vm1301_vm0, %v1269_v30, %v1333_v41 }
 0x1dc   : > { %v1234_v42 = vmul.f32 %v3050_v14, %v1184_v39  ;;  %vm1302_vm2 = vcmp.ge.f32.partialorder %v1270_v38, 0.0  ;;  %v1334_v43 = vmul.f32 0.01, %v1270_v38  ;;  %v1368_v47 = vsel %vm1304_vm15, %v1272_v31, %v1336_v37 }
 0x1dd   : > { %v2705_v45 = vpop.f32.mrf.mxu1  ;;  %v1275_v54 = vadd.f32 %v3057_v18, %v1236_v44  ;;  %v1386_v57 = vpack.c.bf16 %v1368_v47, %v1367_v53 }
 0x1de   : > { %v1237_v46 = vmul.f32 %v2705_v45, %v3050_v14  ;;  %v1366_v48 = vsel %vm1302_vm2, %v1270_v38, %v1334_v43  ;;  %v1273_v49 = vadd.f32 %v3057_v18, %v1234_v42 }
 0x1df   : > { %v1187_v50 = vpop.f32.mrf.mxu1  ;;  %v1385_v56 = vpack.c.bf16 %v1366_v48, %v1365_v51  ;;  %v1339_v61 = vmul.f32 0.01, %v1275_v54  ;;  %vm1307_vm6 = vcmp.ge.f32.partialorder %v1275_v54, 0.0 }
 0x1e0   : > { %v1276_v52 = vadd.f32 %v3057_v18, %v1237_v46  ;;  %v1235_v55 = vmul.f32 %v3050_v14, %v1187_v50  ;;  %v1337_v58 = vmul.f32 0.01, %v1273_v49  ;;  %vm1305_vm4 = vcmp.ge.f32.partialorder %v1273_v49, 0.0 }
 0x1e1   : > { %2732 = vmatprep.mubr.msk.bf16.mxu0 %vm1390_vm9, %v1385_v56  ;;  %v1371_v2 = vsel %vm1307_vm6, %v1275_v54, %v1339_v61 }
 0x1e2   : > { %v1340_v59 = vmul.f32 0.01, %v1276_v52  ;;  %v1274_v60 = vadd.f32 %v3057_v18, %v1235_v55  ;;  %vm1308_vm5 = vcmp.ge.f32.partialorder %v1276_v52, 0.0  ;;  %2733 = vmatmul.mubr.msk.bf16.gmra.mxu0 %vm1390_vm9, %v1386_v57  ;;  %v1369_v63 = vsel %vm1305_vm4, %v1273_v49, %v1337_v58 }
 0x1e4   : > { %vm1306_vm1 = vcmp.ge.f32.partialorder %v1274_v60, 0.0  ;;  %v1338_v62 = vmul.f32 0.01, %v1274_v60  ;;  %v1372_v0 = vsel %vm1308_vm5, %v1276_v52, %v1340_v59 }
 0x1e5   : > { %v1388_v3 = vpack.c.bf16 %v1372_v0, %v1371_v2 }
 0x1e6   : > { %v1370_v1 = vsel %vm1306_vm1, %v1274_v60, %v1338_v62 }
 0x1e7   : > { %v1387_v14 = vpack.c.bf16 %v1370_v1, %v1369_v63 }
 0x1e9   : > { %2736 = vmatprep.mubr.msk.bf16.mxu0 %vm1390_vm9, %v1387_v14 }
 0x1ea   : > { %2737 = vmatmul.mubr.msk.bf16.gmra.mxu0 %vm1390_vm9, %v1388_v3 }
 0x272   : > { %v2710_v18 = vpop.f32.mrf.mxu0 }
 0x273   : > { %v1612_v6 = vmul.f32 %v2710_v18, %v3140_v4 }
 0x274   : > { %v1476_v5 = vpop.f32.mrf.mxu0 }
 0x275   : > { %v1610_v7 = vmul.f32 %v3140_v4, %v1476_v5  ;;  %v1651_v11 = vadd.f32 %v3147_v8, %v1612_v6 }
 0x276   : > { %v2711_v9 = vpop.f32.mrf.mxu0 }
 0x277   : > { %v1613_v24 = vmul.f32 %v2711_v9, %v3140_v4  ;;  %v1649_v29 = vadd.f32 %v3147_v8, %v1610_v7  ;;  %v1715_v20 = vmul.f32 0.01, %v1651_v11  ;;  %vm1683_vm11 = vcmp.ge.f32.partialorder %v1651_v11, 0.0 }
 0x278   : > { %v1479_v10 = vpop.f32.mrf.mxu0 }
 0x279   : > { %v1652_v12 = vadd.f32 %v3147_v8, %v1613_v24  ;;  %v1611_v13 = vmul.f32 %v3140_v4, %v1479_v10  ;;  %v1713_v21 = vmul.f32 0.01, %v1649_v29  ;;  %vm1681_vm8 = vcmp.ge.f32.partialorder %v1649_v29, 0.0 }
 0x27a   : > { %v2714_v15 = vpop.f32.mrf.mxu0  ;;  %v1747_v35 = vsel %vm1683_vm11, %v1651_v11, %v1715_v20 }
 0x27b   : > { %v1716_v16 = vmul.f32 0.01, %v1652_v12  ;;  %v1650_v17 = vadd.f32 %v3147_v8, %v1611_v13  ;;  %vm1684_vm7 = vcmp.ge.f32.partialorder %v1652_v12, 0.0  ;;  %v1616_v25 = vmul.f32 %v2714_v15, %v3140_v4 }
 0x27c   : > { %v1492_v19 = vpop.f32.mrf.mxu0  ;;  %v1745_v32 = vsel %vm1681_vm8, %v1649_v29, %v1713_v21 }
 0x27d   : > { %v1614_v22 = vmul.f32 %v3140_v4, %v1492_v19  ;;  %vm1682_vm10 = vcmp.ge.f32.partialorder %v1650_v17, 0.0  ;;  %v1714_v23 = vmul.f32 0.01, %v1650_v17  ;;  %v1748_v28 = vsel %vm1684_vm7, %v1652_v12, %v1716_v16 }
 0x27e   : > { %v2715_v26 = vpop.f32.mrf.mxu0  ;;  %v1655_v36 = vadd.f32 %v3147_v8, %v1616_v25  ;;  %v1778_v40 = vpack.c.bf16 %v1748_v28, %v1747_v35 }
 0x27f   : > { %v1617_v27 = vmul.f32 %v2715_v26, %v3140_v4  ;;  %v1746_v30 = vsel %vm1682_vm10, %v1650_v17, %v1714_v23  ;;  %v1653_v33 = vadd.f32 %v3147_v8, %v1614_v22 }
 0x280   : > { %v1495_v31 = vpop.f32.mrf.mxu0  ;;  %v1777_v39 = vpack.c.bf16 %v1746_v30, %v1745_v32  ;;  %v1719_v47 = vmul.f32 0.01, %v1655_v36  ;;  %vm1687_vm15 = vcmp.ge.f32.partialorder %v1655_v36, 0.0 }
 0x281   : > { %v1656_v34 = vadd.f32 %v3147_v8, %v1617_v27  ;;  %v1615_v37 = vmul.f32 %v3140_v4, %v1495_v31  ;;  %v1717_v44 = vmul.f32 0.01, %v1653_v33  ;;  %vm1685_vm13 = vcmp.ge.f32.partialorder %v1653_v33, 0.0 }
 0x282   : > { %v2718_v38 = vpop.f32.mrf.mxu0  ;;  %2742 = vmatprep.mubr.msk.bf16.mxu1 %vm1390_vm9, %v1777_v39  ;;  %v1751_v58 = vsel %vm1687_vm15, %v1655_v36, %v1719_v47 }
 0x283   : > { %v1720_v41 = vmul.f32 0.01, %v1656_v34  ;;  %v1654_v42 = vadd.f32 %v3147_v8, %v1615_v37  ;;  %vm1688_vm12 = vcmp.ge.f32.partialorder %v1656_v34, 0.0  ;;  %v1620_v45 = vmul.f32 %v2718_v38, %v3140_v4  ;;  %2743 = vmatmul.mubr.msk.bf16.vlgmr.msra.gmra.mxu1 %vm1390_vm9, %v1778_v40 }
 0x284   : > { %v1508_v43 = vpop.f32.mrf.mxu0  ;;  %v1749_v54 = vsel %vm1685_vm13, %v1653_v33, %v1717_v44 }
 0x285   : > { %v1618_v46 = vmul.f32 %v3140_v4, %v1508_v43  ;;  %vm1686_vm14 = vcmp.ge.f32.partialorder %v1654_v42, 0.0  ;;  %v1718_v48 = vmul.f32 0.01, %v1654_v42  ;;  %v1752_v51 = vsel %vm1688_vm12, %v1656_v34, %v1720_v41 }
 0x286   : > { %v2719_v49 = vpop.f32.mrf.mxu0  ;;  %v1659_v55 = vadd.f32 %v3147_v8, %v1620_v45  ;;  %v1780_v62 = vpack.c.bf16 %v1752_v51, %v1751_v58 }
 0x287   : > { %v1621_v50 = vmul.f32 %v2719_v49, %v3140_v4  ;;  %v1750_v52 = vsel %vm1686_vm14, %v1654_v42, %v1718_v48  ;;  %v1657_v56 = vadd.f32 %v3147_v8, %v1618_v46 }
 0x288   : > { %v1511_v53 = vpop.f32.mrf.mxu0  ;;  %v1779_v61 = vpack.c.bf16 %v1750_v52, %v1749_v54  ;;  %v1723_v14 = vmul.f32 0.01, %v1659_v55  ;;  %vm1691_vm4 = vcmp.ge.f32.partialorder %v1659_v55, 0.0 }
 0x289   : > { %v1660_v57 = vadd.f32 %v3147_v8, %v1621_v50  ;;  %v1619_v59 = vmul.f32 %v3140_v4, %v1511_v53  ;;  %v1721_v2 = vmul.f32 0.01, %v1657_v56  ;;  %vm1689_vm2 = vcmp.ge.f32.partialorder %v1657_v56, 0.0 }
 0x28a   : > { %v2722_v60 = vpop.f32.mrf.mxu0  ;;  %2746 = vmatprep.mubr.msk.bf16.mxu1 %vm1390_vm9, %v1779_v61  ;;  %v1755_v13 = vsel %vm1691_vm4, %v1659_v55, %v1723_v14 }
 0x28b   : > { %v1724_v63 = vmul.f32 0.01, %v1660_v57  ;;  %v1658_v0 = vadd.f32 %v3147_v8, %v1619_v59  ;;  %vm1692_vm0 = vcmp.ge.f32.partialorder %v1660_v57, 0.0  ;;  %2747 = vmatmul.mubr.msk.bf16.gmra.mxu1 %vm1390_vm9, %v1780_v62  ;;  %v1624_v5 = vmul.f32 %v2722_v60, %v3140_v4 }
 0x28c   : > { %v1524_v1 = vpop.f32.mrf.mxu0  ;;  %v1753_v11 = vsel %vm1689_vm2, %v1657_v56, %v1721_v2 }
 0x28d   : > { %v1622_v3 = vmul.f32 %v3140_v4, %v1524_v1  ;;  %vm1690_vm3 = vcmp.ge.f32.partialorder %v1658_v0, 0.0  ;;  %v1722_v18 = vmul.f32 0.01, %v1658_v0  ;;  %v1756_v9 = vsel %vm1692_vm0, %v1660_v57, %v1724_v63 }
 0x28e   : > { %v2723_v6 = vpop.f32.mrf.mxu0  ;;  %v1663_v15 = vadd.f32 %v3147_v8, %v1624_v5  ;;  %v1782_v20 = vpack.c.bf16 %v1756_v9, %v1755_v13 }
 0x28f   : > { %v1625_v7 = vmul.f32 %v2723_v6, %v3140_v4  ;;  %v1754_v24 = vsel %vm1690_vm3, %v1658_v0, %v1722_v18  ;;  %v1661_v29 = vadd.f32 %v3147_v8, %v1622_v3 }
 0x290   : > { %v1527_v10 = vpop.f32.mrf.mxu0  ;;  %v1781_v19 = vpack.c.bf16 %v1754_v24, %v1753_v11  ;;  %v1727_v28 = vmul.f32 0.01, %v1663_v15  ;;  %vm1695_vm7 = vcmp.ge.f32.partialorder %v1663_v15, 0.0 }
 0x291   : > { %v1664_v12 = vadd.f32 %v3147_v8, %v1625_v7  ;;  %v1623_v16 = vmul.f32 %v3140_v4, %v1527_v10  ;;  %v1725_v25 = vmul.f32 0.01, %v1661_v29  ;;  %vm1693_vm1 = vcmp.ge.f32.partialorder %v1661_v29, 0.0 }
 0x292   : > { %v2726_v17 = vpop.f32.mrf.mxu0  ;;  %2750 = vmatprep.mubr.msk.bf16.mxu1 %vm1390_vm9, %v1781_v19  ;;  %v1759_v40 = vsel %vm1695_vm7, %v1663_v15, %v1727_v28 }
 0x293   : > { %v1728_v21 = vmul.f32 0.01, %v1664_v12  ;;  %v1662_v22 = vadd.f32 %v3147_v8, %v1623_v16  ;;  %vm1696_vm5 = vcmp.ge.f32.partialorder %v1664_v12, 0.0  ;;  %v1628_v26 = vmul.f32 %v2726_v17, %v3140_v4  ;;  %2751 = vmatmul.mubr.msk.bf16.gmra.mxu1 %vm1390_vm9, %v1782_v20 }
 0x294   : > { %v1540_v23 = vpop.f32.mrf.mxu0  ;;  %v1757_v36 = vsel %vm1693_vm1, %v1661_v29, %v1725_v25 }
 0x295   : > { %v1626_v27 = vmul.f32 %v3140_v4, %v1540_v23  ;;  %vm1694_vm6 = vcmp.ge.f32.partialorder %v1662_v22, 0.0  ;;  %v1726_v30 = vmul.f32 0.01, %v1662_v22  ;;  %v1760_v33 = vsel %vm1696_vm5, %v1664_v12, %v1728_v21 }
 0x296   : > { %v2727_v31 = vpop.f32.mrf.mxu0  ;;  %v1667_v37 = vadd.f32 %v3147_v8, %v1628_v26  ;;  %v1784_v44 = vpack.c.bf16 %v1760_v33, %v1759_v40 }
 0x297   : > { %v1629_v32 = vmul.f32 %v2727_v31, %v3140_v4  ;;  %v1758_v34 = vsel %vm1694_vm6, %v1662_v22, %v1726_v30  ;;  %v1665_v38 = vadd.f32 %v3147_v8, %v1626_v27 }
 0x298   : > { %v1543_v35 = vpop.f32.mrf.mxu0  ;;  %v1783_v43 = vpack.c.bf16 %v1758_v34, %v1757_v36  ;;  %v1731_v48 = vmul.f32 0.01, %v1667_v37  ;;  %vm1699_vm12 = vcmp.ge.f32.partialorder %v1667_v37, 0.0 }
 0x299   : > { %v1668_v39 = vadd.f32 %v3147_v8, %v1629_v32  ;;  %v1627_v41 = vmul.f32 %v3140_v4, %v1543_v35  ;;  %v1729_v49 = vmul.f32 0.01, %v1665_v38  ;;  %vm1697_vm10 = vcmp.ge.f32.partialorder %v1665_v38, 0.0 }
 0x29a   : > { %v2730_v42 = vpop.f32.mrf.mxu0  ;;  %2754 = vmatprep.mubr.msk.bf16.mxu1 %vm1390_vm9, %v1783_v43  ;;  %v1763_v61 = vsel %vm1699_vm12, %v1667_v37, %v1731_v48 }
 0x29b   : > { %v1732_v45 = vmul.f32 0.01, %v1668_v39  ;;  %v1666_v46 = vadd.f32 %v3147_v8, %v1627_v41  ;;  %vm1700_vm8 = vcmp.ge.f32.partialorder %v1668_v39, 0.0  ;;  %2755 = vmatmul.mubr.msk.bf16.gmra.mxu1 %vm1390_vm9, %v1784_v44  ;;  %v1632_v52 = vmul.f32 %v2730_v42, %v3140_v4 }
 0x29c   : > { %v1556_v47 = vpop.f32.mrf.mxu0  ;;  %v1761_v58 = vsel %vm1697_vm10, %v1665_v38, %v1729_v49  ;;  %vm2308_vm10 = vcmask 125952  }
 0x29d   : > { %v1630_v50 = vmul.f32 %v3140_v4, %v1556_v47  ;;  %vm1698_vm11 = vcmp.ge.f32.partialorder %v1666_v46, 0.0  ;;  %v1730_v51 = vmul.f32 0.01, %v1666_v46  ;;  %v1764_v55 = vsel %vm1700_vm8, %v1668_v39, %v1732_v45 }
 0x29e   : > { %v2731_v53 = vpop.f32.mrf.mxu0  ;;  %v1671_v62 = vadd.f32 %v3147_v8, %v1632_v52  ;;  %v1786_v14 = vpack.c.bf16 %v1764_v55, %v1763_v61 }
 0x29f   : > { %v1633_v54 = vmul.f32 %v2731_v53, %v3140_v4  ;;  %v1762_v56 = vsel %vm1698_vm11, %v1666_v46, %v1730_v51  ;;  %v1669_v59 = vadd.f32 %v3147_v8, %v1630_v50 }
 0x2a0   : > { %v1559_v57 = vpop.f32.mrf.mxu0  ;;  %v1785_v1 = vpack.c.bf16 %v1762_v56, %v1761_v58  ;;  %v1735_v9 = vmul.f32 0.01, %v1671_v62  ;;  %vm1703_vm0 = vcmp.ge.f32.partialorder %v1671_v62, 0.0 }
 0x2a1   : > { %v1672_v60 = vadd.f32 %v3147_v8, %v1633_v54  ;;  %v1631_v63 = vmul.f32 %v3140_v4, %v1559_v57  ;;  %v1733_v5 = vmul.f32 0.01, %v1669_v59  ;;  %vm1701_vm14 = vcmp.ge.f32.partialorder %v1669_v59, 0.0 }
 0x2a2   : > { %v2734_v0 = vpop.f32.mrf.mxu0  ;;  %2758 = vmatprep.mubr.msk.bf16.mxu1 %vm1390_vm9, %v1785_v1  ;;  %v1767_v20 = vsel %vm1703_vm0, %v1671_v62, %v1735_v9 }
 0x2a3   : > { %v1736_v2 = vmul.f32 0.01, %v1672_v60  ;;  %v1670_v3 = vadd.f32 %v3147_v8, %v1631_v63  ;;  %vm1704_vm13 = vcmp.ge.f32.partialorder %v1672_v60, 0.0  ;;  %v1636_v6 = vmul.f32 %v2734_v0, %v3140_v4  ;;  %2759 = vmatmul.mubr.msk.bf16.gmra.mxu1 %vm1390_vm9, %v1786_v14 }
 0x2a4   : > { %v1572_v18 = vpop.f32.mrf.mxu0  ;;  %v1765_v15 = vsel %vm1701_vm14, %v1669_v59, %v1733_v5  ;;  %v3235_v59 = vld [vmem:[%s3387_s12] ss:$0 sm:$0xff] }
 0x2a5   : > { %v1634_v7 = vmul.f32 %v3140_v4, %v1572_v18  ;;  %vm1702_vm15 = vcmp.ge.f32.partialorder %v1670_v3, 0.0  ;;  %v1734_v24 = vmul.f32 0.01, %v1670_v3  ;;  %v1768_v29 = vsel %vm1704_vm13, %v1672_v60, %v1736_v2 }
 0x2a6   : > { %v2735_v10 = vpop.f32.mrf.mxu0  ;;  %v1675_v16 = vadd.f32 %v3147_v8, %v1636_v6  ;;  %v1788_v25 = vpack.c.bf16 %v1768_v29, %v1767_v20 }
 0x2a7   : > { %v1637_v11 = vmul.f32 %v2735_v10, %v3140_v4  ;;  %v1766_v12 = vsel %vm1702_vm15, %v1670_v3, %v1734_v24  ;;  %v1673_v17 = vadd.f32 %v3147_v8, %v1634_v7 }
 0x2a8   : > { %v1575_v13 = vpop.f32.mrf.mxu0  ;;  %v1787_v23 = vpack.c.bf16 %v1766_v12, %v1765_v15  ;;  %v1739_v30 = vmul.f32 0.01, %v1675_v16  ;;  %vm1707_vm5 = vcmp.ge.f32.partialorder %v1675_v16, 0.0 }
 0x2a9   : > { %v1676_v19 = vadd.f32 %v3147_v8, %v1637_v11  ;;  %v1635_v21 = vmul.f32 %v3140_v4, %v1575_v13  ;;  %v1737_v31 = vmul.f32 0.01, %v1673_v17  ;;  %vm1705_vm3 = vcmp.ge.f32.partialorder %v1673_v17, 0.0 }
 0x2aa   : > { %v2738_v22 = vpop.f32.mrf.mxu0  ;;  %2762 = vmatprep.mubr.msk.bf16.mxu1 %vm1390_vm9, %v1787_v23  ;;  %v1771_v43 = vsel %vm1707_vm5, %v1675_v16, %v1739_v30 }
 0x2ab   : > { %v1740_v26 = vmul.f32 0.01, %v1676_v19  ;;  %v1674_v27 = vadd.f32 %v3147_v8, %v1635_v21  ;;  %vm1708_vm2 = vcmp.ge.f32.partialorder %v1676_v19, 0.0  ;;  %2763 = vmatmul.mubr.msk.bf16.gmra.mxu1 %vm1390_vm9, %v1788_v25  ;;  %v1640_v34 = vmul.f32 %v2738_v22, %v3140_v4 }
 0x2ac   : > { %v1588_v28 = vpop.f32.mrf.mxu0  ;;  %v1769_v41 = vsel %vm1705_vm3, %v1673_v17, %v1737_v31 }
 0x2ad   : > { %v1638_v32 = vmul.f32 %v3140_v4, %v1588_v28  ;;  %vm1706_vm4 = vcmp.ge.f32.partialorder %v1674_v27, 0.0  ;;  %v1738_v33 = vmul.f32 0.01, %v1674_v27  ;;  %v1772_v37 = vsel %vm1708_vm2, %v1676_v19, %v1740_v26 }
 0x2ae   : > { %v2739_v35 = vpop.f32.mrf.mxu0  ;;  %v1679_v44 = vadd.f32 %v3147_v8, %v1640_v34  ;;  %v1790_v47 = vpack.c.bf16 %v1772_v37, %v1771_v43 }
 0x2af   : > { %v1641_v36 = vmul.f32 %v2739_v35, %v3140_v4  ;;  %v1770_v38 = vsel %vm1706_vm4, %v1674_v27, %v1738_v33  ;;  %v1677_v39 = vadd.f32 %v3147_v8, %v1638_v32 }
 0x2b0   : > { %v1591_v40 = vpop.f32.mrf.mxu0  ;;  %v1789_v46 = vpack.c.bf16 %v1770_v38, %v1769_v41  ;;  %v1743_v51 = vmul.f32 0.01, %v1679_v44  ;;  %vm1711_vm8 = vcmp.ge.f32.partialorder %v1679_v44, 0.0 }
 0x2b1   : > { %v1680_v42 = vadd.f32 %v3147_v8, %v1641_v36  ;;  %v1639_v45 = vmul.f32 %v3140_v4, %v1591_v40  ;;  %v1741_v48 = vmul.f32 0.01, %v1677_v39  ;;  %vm1709_vm1 = vcmp.ge.f32.partialorder %v1677_v39, 0.0 }
 0x2b2   : > { %2766 = vmatprep.mubr.msk.bf16.mxu1 %vm1390_vm9, %v1789_v46  ;;  %v1775_v56 = vsel %vm1711_vm8, %v1679_v44, %v1743_v51 }
 0x2b3   : > { %v1744_v49 = vmul.f32 0.01, %v1680_v42  ;;  %v1678_v50 = vadd.f32 %v3147_v8, %v1639_v45  ;;  %vm1712_vm6 = vcmp.ge.f32.partialorder %v1680_v42, 0.0  ;;  %2767 = vmatmul.mubr.msk.bf16.gmra.mxu1 %vm1390_vm9, %v1790_v47  ;;  %v1773_v53 = vsel %vm1709_vm1, %v1677_v39, %v1741_v48  ;;  %v3230_v8 = vld [vmem:[%s3386_s11] ss:$0 sm:$0xff] }
 0x2b5   : > { %vm1710_vm7 = vcmp.ge.f32.partialorder %v1678_v50, 0.0  ;;  %v1742_v52 = vmul.f32 0.01, %v1678_v50  ;;  %v1776_v54 = vsel %vm1712_vm6, %v1680_v42, %v1744_v49 }
 0x2b6   : > { %v1792_v57 = vpack.c.bf16 %v1776_v54, %v1775_v56 }
 0x2b7   : > { %v1774_v55 = vsel %vm1710_vm7, %v1678_v50, %v1742_v52 }
 0x2b8   : > { %v1791_v4 = vpack.c.bf16 %v1774_v55, %v1773_v53 }
 0x2ba   : > { %2770 = vmatprep.mubr.msk.bf16.mxu1 %vm1390_vm9, %v1791_v4 }
 0x2bb   : > { %2771 = vmatmul.mubr.msk.bf16.gmra.mxu1 %vm1390_vm9, %v1792_v57 }
 0x343   : > { %v2744_v58 = vpop.f32.mrf.mxu1 }
 0x344   : > { %v2015_v60 = vmul.f32 %v2744_v58, %v3230_v8 }
 0x345   : > { %v1879_v61 = vpop.f32.mrf.mxu1 }
 0x346   : > { %v2054_v62 = vadd.f32 %v3235_v59, %v2015_v60  ;;  %v2013_v63 = vmul.f32 %v3230_v8, %v1879_v61 }
 0x347   : > { %v2745_v0 = vpop.f32.mrf.mxu1 }
 0x348   : > { %vm2086_vm9 = vcmp.ge.f32.partialorder %v2054_v62, 0.0  ;;  %v2118_v1 = vmul.f32 0.01, %v2054_v62  ;;  %v2052_v14 = vadd.f32 %v3235_v59, %v2013_v63  ;;  %v2016_v2 = vmul.f32 %v2745_v0, %v3230_v8 }
 0x349   : > { %v1882_v3 = vpop.f32.mrf.mxu1 }
 0x34a   : > { %v2150_v18 = vsel %vm2086_vm9, %v2054_v62, %v2118_v1  ;;  %vm2084_vm11 = vcmp.ge.f32.partialorder %v2052_v14, 0.0  ;;  %v2116_v5 = vmul.f32 0.01, %v2052_v14  ;;  %v2055_v6 = vadd.f32 %v3235_v59, %v2016_v2 }
 0x34b   : > { %v2534_v7 = vpack.c.bf16 %v2150_v18, %v2150_v18  ;;  %v2014_v9 = vmul.f32 %v3230_v8, %v1882_v3  ;;  %v2748_v24 = vpop.f32.mrf.mxu1 }
 0x34c   : > { %v2148_v10 = vsel %vm2084_vm11, %v2052_v14, %v2116_v5  ;;  %vm2087_vm12 = vcmp.ge.f32.partialorder %v2055_v6, 0.0  ;;  %v2119_v11 = vmul.f32 0.01, %v2055_v6  ;;  %v2019_v29 = vmul.f32 %v2748_v24, %v3230_v8 }
 0x34d   : > { %2311 = vst.msk [vmem:[%s3247_s17 + $0x8] sm:$0xf] %vm2308_vm10, %v2534_v7  ;;  %v2532_v12 = vpack.c.bf16 %v2148_v10, %v2148_v10  ;;  %v2053_v13 = vadd.f32 %v3235_v59, %v2014_v9  ;;  %v1895_v15 = vpop.f32.mrf.mxu1 }
 0x34e   : > { %v2151_v16 = vsel %vm2087_vm12, %v2055_v6, %v2119_v11  ;;  %v2058_v17 = vadd.f32 %v3235_v59, %v2019_v29  ;;  %v2017_v19 = vmul.f32 %v3230_v8, %v1895_v15 }
 0x34f   : > { %2309 = vst.msk [vmem:[%s3247_s17] sm:$0xf] %vm2308_vm10, %v2532_v12  ;;  %v2535_v20 = vpack.c.bf16 %v2151_v16, %v2151_v16  ;;  %vm2085_vm13 = vcmp.ge.f32.partialorder %v2053_v13, 0.0  ;;  %v2117_v21 = vmul.f32 0.01, %v2053_v13  ;;  %v2749_v22 = vpop.f32.mrf.mxu1 }
 0x350   : > { %vm2090_vm14 = vcmp.ge.f32.partialorder %v2058_v17, 0.0  ;;  %v2122_v23 = vmul.f32 0.01, %v2058_v17  ;;  %v2056_v25 = vadd.f32 %v3235_v59, %v2017_v19  ;;  %v2020_v26 = vmul.f32 %v2749_v22, %v3230_v8 }
 0x351   : > { %2312 = vst.msk [vmem:[%s3247_s17 + $0xc] sm:$0xf] %vm2308_vm10, %v2535_v20  ;;  %v2149_v27 = vsel %vm2085_vm13, %v2053_v13, %v2117_v21  ;;  %v1898_v28 = vpop.f32.mrf.mxu1 }
 0x352   : > { %v2533_v30 = vpack.c.bf16 %v2149_v27, %v2149_v27  ;;  %v2154_v31 = vsel %vm2090_vm14, %v2058_v17, %v2122_v23  ;;  %vm2088_vm15 = vcmp.ge.f32.partialorder %v2056_v25, 0.0  ;;  %v2120_v32 = vmul.f32 0.01, %v2056_v25 }
 0x353   : > { %v2538_v33 = vpack.c.bf16 %v2154_v31, %v2154_v31  ;;  %v2059_v34 = vadd.f32 %v3235_v59, %v2020_v26  ;;  %v2018_v35 = vmul.f32 %v3230_v8, %v1898_v28  ;;  %v2752_v36 = vpop.f32.mrf.mxu1 }
 0x354   : > { %2310 = vst.msk [vmem:[%s3247_s17 + $0x4] sm:$0xf] %vm2308_vm10, %v2533_v30  ;;  %v2152_v37 = vsel %vm2088_vm15, %v2056_v25, %v2120_v32  ;;  %v2023_v38 = vmul.f32 %v2752_v36, %v3230_v8 }
 0x355   : > { %2315 = vst.msk [vmem:[%s3247_s17 + $0x18] sm:$0xf] %vm2308_vm10, %v2538_v33  ;;  %v2536_v39 = vpack.c.bf16 %v2152_v37, %v2152_v37  ;;  %vm2091_vm0 = vcmp.ge.f32.partialorder %v2059_v34, 0.0  ;;  %v2123_v40 = vmul.f32 0.01, %v2059_v34  ;;  %v2057_v41 = vadd.f32 %v3235_v59, %v2018_v35  ;;  %v1911_v42 = vpop.f32.mrf.mxu1 }
 0x356   : > { %v2062_v43 = vadd.f32 %v3235_v59, %v2023_v38  ;;  %v2021_v44 = vmul.f32 %v3230_v8, %v1911_v42 }
 0x357   : > { %2313 = vst.msk [vmem:[%s3247_s17 + $0x10] sm:$0xf] %vm2308_vm10, %v2536_v39  ;;  %v2155_v45 = vsel %vm2091_vm0, %v2059_v34, %v2123_v40  ;;  %vm2089_vm2 = vcmp.ge.f32.partialorder %v2057_v41, 0.0  ;;  %v2121_v46 = vmul.f32 0.01, %v2057_v41  ;;  %v2753_v47 = vpop.f32.mrf.mxu1 }
 0x358   : > { %v2539_v48 = vpack.c.bf16 %v2155_v45, %v2155_v45  ;;  %vm2094_vm3 = vcmp.ge.f32.partialorder %v2062_v43, 0.0  ;;  %v2126_v49 = vmul.f32 0.01, %v2062_v43  ;;  %v2060_v50 = vadd.f32 %v3235_v59, %v2021_v44 }
 0x359   : > { %v2153_v51 = vsel %vm2089_vm2, %v2057_v41, %v2121_v46  ;;  %v2024_v52 = vmul.f32 %v2753_v47, %v3230_v8  ;;  %v1914_v53 = vpop.f32.mrf.mxu1 }
 0x35a   : > { %2316 = vst.msk [vmem:[%s3247_s17 + $0x1c] sm:$0xf] %vm2308_vm10, %v2539_v48  ;;  %v2537_v54 = vpack.c.bf16 %v2153_v51, %v2153_v51  ;;  %v2158_v55 = vsel %vm2094_vm3, %v2062_v43, %v2126_v49  ;;  %vm2092_vm4 = vcmp.ge.f32.partialorder %v2060_v50, 0.0  ;;  %v2124_v4 = vmul.f32 0.01, %v2060_v50 }
 0x35b   : > { %v2542_v56 = vpack.c.bf16 %v2158_v55, %v2158_v55  ;;  %v2063_v57 = vadd.f32 %v3235_v59, %v2024_v52  ;;  %v2022_v58 = vmul.f32 %v3230_v8, %v1914_v53  ;;  %v2756_v60 = vpop.f32.mrf.mxu1 }
 0x35c   : > { %2314 = vst.msk [vmem:[%s3247_s17 + $0x14] sm:$0xf] %vm2308_vm10, %v2537_v54  ;;  %v2156_v61 = vsel %vm2092_vm4, %v2060_v50, %v2124_v4  ;;  %v2027_v62 = vmul.f32 %v2756_v60, %v3230_v8 }
 0x35d   : > { %2319 = vst.msk [vmem:[%s3247_s17 + $0x28] sm:$0xf] %vm2308_vm10, %v2542_v56  ;;  %v2540_v63 = vpack.c.bf16 %v2156_v61, %v2156_v61  ;;  %vm2095_vm5 = vcmp.ge.f32.partialorder %v2063_v57, 0.0  ;;  %v2127_v0 = vmul.f32 0.01, %v2063_v57  ;;  %v2061_v1 = vadd.f32 %v3235_v59, %v2022_v58  ;;  %v1927_v14 = vpop.f32.mrf.mxu1 }
 0x35e   : > { %v2066_v2 = vadd.f32 %v3235_v59, %v2027_v62  ;;  %v2025_v3 = vmul.f32 %v3230_v8, %v1927_v14 }
 0x35f   : > { %2317 = vst.msk [vmem:[%s3247_s17 + $0x20] sm:$0xf] %vm2308_vm10, %v2540_v63  ;;  %v2159_v18 = vsel %vm2095_vm5, %v2063_v57, %v2127_v0  ;;  %vm2093_vm1 = vcmp.ge.f32.partialorder %v2061_v1, 0.0  ;;  %v2125_v5 = vmul.f32 0.01, %v2061_v1  ;;  %v2757_v6 = vpop.f32.mrf.mxu1 }
 0x360   : > { %v2543_v7 = vpack.c.bf16 %v2159_v18, %v2159_v18  ;;  %vm2098_vm6 = vcmp.ge.f32.partialorder %v2066_v2, 0.0  ;;  %v2130_v9 = vmul.f32 0.01, %v2066_v2  ;;  %v2064_v24 = vadd.f32 %v3235_v59, %v2025_v3 }
 0x361   : > { %v2157_v10 = vsel %vm2093_vm1, %v2061_v1, %v2125_v5  ;;  %v2028_v11 = vmul.f32 %v2757_v6, %v3230_v8  ;;  %v1930_v29 = vpop.f32.mrf.mxu1 }
 0x362   : > { %2320 = vst.msk [vmem:[%s3247_s17 + $0x2c] sm:$0xf] %vm2308_vm10, %v2543_v7  ;;  %v2541_v12 = vpack.c.bf16 %v2157_v10, %v2157_v10  ;;  %v2162_v13 = vsel %vm2098_vm6, %v2066_v2, %v2130_v9  ;;  %vm2096_vm7 = vcmp.ge.f32.partialorder %v2064_v24, 0.0  ;;  %v2128_v15 = vmul.f32 0.01, %v2064_v24 }
 0x363   : > { %v2546_v16 = vpack.c.bf16 %v2162_v13, %v2162_v13  ;;  %v2067_v17 = vadd.f32 %v3235_v59, %v2028_v11  ;;  %v2026_v19 = vmul.f32 %v3230_v8, %v1930_v29  ;;  %v2760_v20 = vpop.f32.mrf.mxu1 }
 0x364   : > { %2318 = vst.msk [vmem:[%s3247_s17 + $0x24] sm:$0xf] %vm2308_vm10, %v2541_v12  ;;  %v2160_v21 = vsel %vm2096_vm7, %v2064_v24, %v2128_v15  ;;  %v2031_v22 = vmul.f32 %v2760_v20, %v3230_v8 }
 0x365   : > { %2323 = vst.msk [vmem:[%s3247_s17 + $0x38] sm:$0xf] %vm2308_vm10, %v2546_v16  ;;  %v2544_v23 = vpack.c.bf16 %v2160_v21, %v2160_v21  ;;  %vm2099_vm8 = vcmp.ge.f32.partialorder %v2067_v17, 0.0  ;;  %v2131_v25 = vmul.f32 0.01, %v2067_v17  ;;  %v2065_v26 = vadd.f32 %v3235_v59, %v2026_v19  ;;  %v1943_v27 = vpop.f32.mrf.mxu1 }
 0x366   : > { %v2070_v28 = vadd.f32 %v3235_v59, %v2031_v22  ;;  %v2029_v30 = vmul.f32 %v3230_v8, %v1943_v27 }
 0x367   : > { %2321 = vst.msk [vmem:[%s3247_s17 + $0x30] sm:$0xf] %vm2308_vm10, %v2544_v23  ;;  %v2163_v31 = vsel %vm2099_vm8, %v2067_v17, %v2131_v25  ;;  %vm2097_vm9 = vcmp.ge.f32.partialorder %v2065_v26, 0.0  ;;  %v2129_v32 = vmul.f32 0.01, %v2065_v26  ;;  %v2761_v33 = vpop.f32.mrf.mxu1 }
 0x368   : > { %v2547_v34 = vpack.c.bf16 %v2163_v31, %v2163_v31  ;;  %vm2102_vm11 = vcmp.ge.f32.partialorder %v2070_v28, 0.0  ;;  %v2134_v35 = vmul.f32 0.01, %v2070_v28  ;;  %v2068_v36 = vadd.f32 %v3235_v59, %v2029_v30 }
 0x369   : > { %v2161_v37 = vsel %vm2097_vm9, %v2065_v26, %v2129_v32  ;;  %v2032_v38 = vmul.f32 %v2761_v33, %v3230_v8  ;;  %v1946_v39 = vpop.f32.mrf.mxu1 }
 0x36a   : > { %2324 = vst.msk [vmem:[%s3247_s17 + $0x3c] sm:$0xf] %vm2308_vm10, %v2547_v34  ;;  %v2545_v40 = vpack.c.bf16 %v2161_v37, %v2161_v37  ;;  %v2166_v41 = vsel %vm2102_vm11, %v2070_v28, %v2134_v35  ;;  %vm2100_vm12 = vcmp.ge.f32.partialorder %v2068_v36, 0.0  ;;  %v2132_v42 = vmul.f32 0.01, %v2068_v36 }
 0x36b   : > { %v2550_v43 = vpack.c.bf16 %v2166_v41, %v2166_v41  ;;  %v2071_v44 = vadd.f32 %v3235_v59, %v2032_v38  ;;  %v2030_v45 = vmul.f32 %v3230_v8, %v1946_v39  ;;  %v2764_v46 = vpop.f32.mrf.mxu1 }
 0x36c   : > { %2322 = vst.msk [vmem:[%s3247_s17 + $0x34] sm:$0xf] %vm2308_vm10, %v2545_v40  ;;  %v2164_v47 = vsel %vm2100_vm12, %v2068_v36, %v2132_v42  ;;  %v2035_v48 = vmul.f32 %v2764_v46, %v3230_v8 }
 0x36d   : > { %2327 = vst.msk [vmem:[%s3247_s17 + $0x48] sm:$0xf] %vm2308_vm10, %v2550_v43  ;;  %v2548_v49 = vpack.c.bf16 %v2164_v47, %v2164_v47  ;;  %vm2103_vm13 = vcmp.ge.f32.partialorder %v2071_v44, 0.0  ;;  %v2135_v50 = vmul.f32 0.01, %v2071_v44  ;;  %v2069_v51 = vadd.f32 %v3235_v59, %v2030_v45  ;;  %v1959_v52 = vpop.f32.mrf.mxu1 }
 0x36e   : > { %v2074_v53 = vadd.f32 %v3235_v59, %v2035_v48  ;;  %v2033_v54 = vmul.f32 %v3230_v8, %v1959_v52 }
 0x36f   : > { %2325 = vst.msk [vmem:[%s3247_s17 + $0x40] sm:$0xf] %vm2308_vm10, %v2548_v49  ;;  %v2167_v55 = vsel %vm2103_vm13, %v2071_v44, %v2135_v50  ;;  %vm2101_vm14 = vcmp.ge.f32.partialorder %v2069_v51, 0.0  ;;  %v2133_v4 = vmul.f32 0.01, %v2069_v51  ;;  %v2765_v56 = vpop.f32.mrf.mxu1 }
 0x370   : > { %v2551_v57 = vpack.c.bf16 %v2167_v55, %v2167_v55  ;;  %vm2106_vm15 = vcmp.ge.f32.partialorder %v2074_v53, 0.0  ;;  %v2138_v58 = vmul.f32 0.01, %v2074_v53  ;;  %v2072_v60 = vadd.f32 %v3235_v59, %v2033_v54 }
 0x371   : > { %v2165_v61 = vsel %vm2101_vm14, %v2069_v51, %v2133_v4  ;;  %v2036_v62 = vmul.f32 %v2765_v56, %v3230_v8  ;;  %v1962_v63 = vpop.f32.mrf.mxu1 }
 0x372   : > { %2328 = vst.msk [vmem:[%s3247_s17 + $0x4c] sm:$0xf] %vm2308_vm10, %v2551_v57  ;;  %v2549_v0 = vpack.c.bf16 %v2165_v61, %v2165_v61  ;;  %v2170_v1 = vsel %vm2106_vm15, %v2074_v53, %v2138_v58  ;;  %vm2104_vm0 = vcmp.ge.f32.partialorder %v2072_v60, 0.0  ;;  %v2136_v14 = vmul.f32 0.01, %v2072_v60 }
 0x373   : > { %v2554_v2 = vpack.c.bf16 %v2170_v1, %v2170_v1  ;;  %v2075_v3 = vadd.f32 %v3235_v59, %v2036_v62  ;;  %v2034_v18 = vmul.f32 %v3230_v8, %v1962_v63  ;;  %v2768_v5 = vpop.f32.mrf.mxu1 }
 0x374   : > { %2326 = vst.msk [vmem:[%s3247_s17 + $0x44] sm:$0xf] %vm2308_vm10, %v2549_v0  ;;  %v2168_v6 = vsel %vm2104_vm0, %v2072_v60, %v2136_v14  ;;  %v2039_v7 = vmul.f32 %v2768_v5, %v3230_v8 }
 0x375   : > { %2331 = vst.msk [vmem:[%s3247_s17 + $0x58] sm:$0xf] %vm2308_vm10, %v2554_v2  ;;  %v2552_v9 = vpack.c.bf16 %v2168_v6, %v2168_v6  ;;  %vm2107_vm2 = vcmp.ge.f32.partialorder %v2075_v3, 0.0  ;;  %v2139_v24 = vmul.f32 0.01, %v2075_v3  ;;  %v2073_v10 = vadd.f32 %v3235_v59, %v2034_v18  ;;  %v1975_v11 = vpop.f32.mrf.mxu1 }
 0x376   : > { %v2078_v29 = vadd.f32 %v3235_v59, %v2039_v7  ;;  %v2037_v12 = vmul.f32 %v3230_v8, %v1975_v11 }
 0x377   : > { %2329 = vst.msk [vmem:[%s3247_s17 + $0x50] sm:$0xf] %vm2308_vm10, %v2552_v9  ;;  %v2171_v13 = vsel %vm2107_vm2, %v2075_v3, %v2139_v24  ;;  %vm2105_vm3 = vcmp.ge.f32.partialorder %v2073_v10, 0.0  ;;  %v2137_v15 = vmul.f32 0.01, %v2073_v10  ;;  %v2769_v16 = vpop.f32.mrf.mxu1 }
 0x378   : > { %v2555_v17 = vpack.c.bf16 %v2171_v13, %v2171_v13  ;;  %vm2110_vm4 = vcmp.ge.f32.partialorder %v2078_v29, 0.0  ;;  %v2142_v19 = vmul.f32 0.01, %v2078_v29  ;;  %v2076_v20 = vadd.f32 %v3235_v59, %v2037_v12 }
 0x379   : > { %v2169_v21 = vsel %vm2105_vm3, %v2073_v10, %v2137_v15  ;;  %v2040_v22 = vmul.f32 %v2769_v16, %v3230_v8  ;;  %v1978_v23 = vpop.f32.mrf.mxu1 }
 0x37a   : > { %2332 = vst.msk [vmem:[%s3247_s17 + $0x5c] sm:$0xf] %vm2308_vm10, %v2555_v17  ;;  %v2553_v25 = vpack.c.bf16 %v2169_v21, %v2169_v21  ;;  %v2174_v26 = vsel %vm2110_vm4, %v2078_v29, %v2142_v19  ;;  %vm2108_vm5 = vcmp.ge.f32.partialorder %v2076_v20, 0.0  ;;  %v2140_v27 = vmul.f32 0.01, %v2076_v20 }
 0x37b   : > { %v2558_v28 = vpack.c.bf16 %v2174_v26, %v2174_v26  ;;  %v2079_v30 = vadd.f32 %v3235_v59, %v2040_v22  ;;  %v2038_v31 = vmul.f32 %v3230_v8, %v1978_v23  ;;  %v2772_v32 = vpop.f32.mrf.mxu1 }
 0x37c   : > { %2330 = vst.msk [vmem:[%s3247_s17 + $0x54] sm:$0xf] %vm2308_vm10, %v2553_v25  ;;  %v2172_v33 = vsel %vm2108_vm5, %v2076_v20, %v2140_v27  ;;  %v2043_v34 = vmul.f32 %v2772_v32, %v3230_v8 }
 0x37d   : > { %2335 = vst.msk [vmem:[%s3247_s17 + $0x68] sm:$0xf] %vm2308_vm10, %v2558_v28  ;;  %v2556_v35 = vpack.c.bf16 %v2172_v33, %v2172_v33  ;;  %vm2111_vm1 = vcmp.ge.f32.partialorder %v2079_v30, 0.0  ;;  %v2143_v36 = vmul.f32 0.01, %v2079_v30  ;;  %v2077_v37 = vadd.f32 %v3235_v59, %v2038_v31  ;;  %v1991_v38 = vpop.f32.mrf.mxu1 }
 0x37e   : > { %v2082_v39 = vadd.f32 %v3235_v59, %v2043_v34  ;;  %v2041_v40 = vmul.f32 %v3230_v8, %v1991_v38 }
 0x37f   : > { %2333 = vst.msk [vmem:[%s3247_s17 + $0x60] sm:$0xf] %vm2308_vm10, %v2556_v35  ;;  %v2175_v41 = vsel %vm2111_vm1, %v2079_v30, %v2143_v36  ;;  %vm2109_vm6 = vcmp.ge.f32.partialorder %v2077_v37, 0.0  ;;  %v2141_v42 = vmul.f32 0.01, %v2077_v37  ;;  %v2773_v43 = vpop.f32.mrf.mxu1 }
 0x380   : > { %v2559_v44 = vpack.c.bf16 %v2175_v41, %v2175_v41  ;;  %vm2114_vm7 = vcmp.ge.f32.partialorder %v2082_v39, 0.0  ;;  %v2146_v45 = vmul.f32 0.01, %v2082_v39  ;;  %v2080_v46 = vadd.f32 %v3235_v59, %v2041_v40 }
 0x381   : > { %v2173_v47 = vsel %vm2109_vm6, %v2077_v37, %v2141_v42  ;;  %v2044_v48 = vmul.f32 %v2773_v43, %v3230_v8  ;;  %v1994_v49 = vpop.f32.mrf.mxu1 }
 0x382   : > { %2336 = vst.msk [vmem:[%s3247_s17 + $0x6c] sm:$0xf] %vm2308_vm10, %v2559_v44  ;;  %v2557_v50 = vpack.c.bf16 %v2173_v47, %v2173_v47  ;;  %v2178_v51 = vsel %vm2114_vm7, %v2082_v39, %v2146_v45  ;;  %vm2112_vm8 = vcmp.ge.f32.partialorder %v2080_v46, 0.0  ;;  %v2144_v52 = vmul.f32 0.01, %v2080_v46 }
 0x383   : > { %v2562_v53 = vpack.c.bf16 %v2178_v51, %v2178_v51  ;;  %v2083_v54 = vadd.f32 %v3235_v59, %v2044_v48  ;;  %v2042_v55 = vmul.f32 %v3230_v8, %v1994_v49 }
 0x384   : > { %2334 = vst.msk [vmem:[%s3247_s17 + $0x64] sm:$0xf] %vm2308_vm10, %v2557_v50  ;;  %v2176_v4 = vsel %vm2112_vm8, %v2080_v46, %v2144_v52 }
 0x385   : > { %2339 = vst.msk [vmem:[%s3247_s17 + $0x78] sm:$0xf] %vm2308_vm10, %v2562_v53  ;;  %v2560_v56 = vpack.c.bf16 %v2176_v4, %v2176_v4  ;;  %vm2115_vm9 = vcmp.ge.f32.partialorder %v2083_v54, 0.0  ;;  %v2147_v57 = vmul.f32 0.01, %v2083_v54  ;;  %v2081_v58 = vadd.f32 %v3235_v59, %v2042_v55 }
 0x387   : > { %2337 = vst.msk [vmem:[%s3247_s17 + $0x70] sm:$0xf] %vm2308_vm10, %v2560_v56  ;;  %v2179_v60 = vsel %vm2115_vm9, %v2083_v54, %v2147_v57  ;;  %vm2113_vm11 = vcmp.ge.f32.partialorder %v2081_v58, 0.0  ;;  %v2145_v61 = vmul.f32 0.01, %v2081_v58 }
 0x388   : > { %v2563_v62 = vpack.c.bf16 %v2179_v60, %v2179_v60 }
 0x389   : > { %v2177_v63 = vsel %vm2113_vm11, %v2081_v58, %v2145_v61 }
 0x38a   : > { %2340 = vst.msk [vmem:[%s3247_s17 + $0x7c] sm:$0xf] %vm2308_vm10, %v2563_v62  ;;  %v2561_v8 = vpack.c.bf16 %v2177_v63, %v2177_v63 }
 0x38c   : > { %2338 = vst.msk [vmem:[%s3247_s17 + $0x74] sm:$0xf] %vm2308_vm10, %v2561_v8 }
 0x38d PF: > { %s23_s25 = sadd.s32 1, %s2811_s25  }
 0x38e   : > { %p20_p4 = scmp.ge.s32.totalorder %s23_s25, 4  }
 0x390   :  { %22 = sbr.rel (!%p20_p4) target bundleno = 1 (0x1), region = 102 }

// kernel: patch_embed_forward.6
= control target key start
LH: loop header
LB: loop body
LE: loop exit
PB: predicated region body
PF: predicated region fallthrough
CT: control target
= control target key end

     0   :  { %s1872_s15 = smov 0   ;;  %s1874_s16 = smov 0   ;;  %s2336_s0 = inlined_call_operand.vmem [shape: bf16[2,13,13,32], index: 0, kind: input, shape index: {}]   ;;  %s2337_s1 = inlined_call_operand.vmem [shape: bf16[800,64], index: 1, kind: input, shape index: {}]   ;;  %s2338_s2 = inlined_call_operand.vmem [shape: f32[1,64], index: 2, kind: input, shape index: {}]   ;;  %s2339_s3 = inlined_call_operand.vmem [shape: f32[1,64], index: 3, kind: input, shape index: {}]   ;;  %s2340_s4 = inlined_call_operand.vmem [shape: bf16[2,5,5,64], index: 4, kind: output, shape index: {}]  }
   0x1   :  { %s1876_s17 = smov 0   ;;  %s1878_s18 = smov 0  }
   0x2   :  { %s1880_s19 = smov 0  }
   0x3 LB: > { %s23_s20 = sadd.s32 1, %s1834_s17  ;;  %s26_s21 = sadd.s32 1, %s1838_s18  ;;  %s1842_s19 = sphi %s1880_s19, %s14_s19   ;;  %s1838_s18 = sphi %s1878_s18, %s2346_s18   ;;  %s1834_s17 = sphi %s1876_s17, %s2345_s17   ;;  %s1830_s16 = sphi %s1874_s16, %s2344_s16   ;;  %s1826_s15 = sphi %s1872_s15, %s2343_s15  }
   0x4   : > { %p24_p0 = scmp.ge.s32.totalorder %s23_s20, 5  ;;  %p1502_p1 = scmp.ge.s32.totalorder %s1842_s19, 1 }
   0x5   : > { %p176_p2 = scmp.lt.s32.totalorder %s1842_s19, 11 }
   0x6   : > { %s2348_s20 = smov (%p24_p0, %s23_s20), 0  ;;  %s2350_s21 = smov (!%p24_p0, %s26_s21), %s1838_s18 }
   0x7   : > { %p177_p3 = pnand %p1502_p1, %p176_p2  ;;  %p28_p4 = scmp.ge.s32.totalorder %s2350_s21, 2 }
   0x8   : > { %p205_p5 = scmp.lt.s32.totalorder (!%p177_p3), %s1830_s16, 1  ;;  %s1505_s22 = sshll.u32 (!%p177_p3), %s1826_s15, 1 }
   0x9   : > { %s2352_s21 = smov (%p28_p4, %s2350_s21), 0  ;;  %180 = sbr.rel (%p177_p3) target bundleno = 448 (0x1c0), region = 36 }
   0xa   : > { %p223_p6 = scmp.lt.s32.totalorder (!%p177_p3), %s1505_s22, 8  ;;  %s1506_s10 = sadd.s32 (!%p177_p3), 4294967295, %s1505_s22 }
   0xb   : > { %p221_p7 = scmp.gt.s32.totalorder (!%p177_p3), %s1506_s10, 0  ;;  %s1845_s28 = smov (!%p177_p3), 64  }
   0xc   : > { %s1846_s6 = smov (!%p177_p3), 96   ;;  %p212_p8 = scmp.lt.s32.totalorder (!%p177_p3), %s1826_s15, 4 }
   0xe   : > { %v1754_v0 = vld [vmem:[%s2337_s1 + $0x78] sm:$0xff]   ;;  %s2354_s16 = smov (!%p205_p5, %s1830_s16), 1  ;;  %v1756_v2 = vld [vmem:[%s2337_s1 + $0x70] sm:$0xff]   ;;  %v1758_v4 = vld [vmem:[%s2337_s1 + $0x68] sm:$0xff]   ;;  %s2356_s10 = smov (!%p221_p7, %s1506_s10), 0  ;;  %vm712_vm0 = vcmask 1044480  }
   0xf   : > { %v1755_v1 = vld [vmem:[%s2337_s1 + $0x38] sm:$0xff]   ;;  %s224_s29 = scalar_select %p223_p6, %s1505_s22, 8  ;;  %1603 = vmatprep.subr.bf16.mxu0 %v1754_v0  ;;  %v1757_v3 = vld [vmem:[%s2337_s1 + $0x30] sm:$0xff]   ;;  %v1759_v5 = vld [vmem:[%s2337_s1 + $0x28] sm:$0xff]   ;;  %vm713_vm1 = vsmask.f32 4352 }
  0x10   : > { %s1699_s30 = smul.u32 104, %s2354_s16  ;;  %1604 = vmatpush3.bf16.msra.mxu0 %v1755_v1  ;;  %v1760_v6 = vld [vmem:[%s2337_s1 + $0x60] sm:$0xff]   ;;  %s1844_s22 = smov 32   ;;  %v1762_v31 = vld [vmem:[%s2337_s1 + $0x58] sm:$0xff]   ;;  %v1764_v35 = vld [vmem:[%s2337_s1 + $0x50] sm:$0xff]   ;;  %vm334_vm3 = vcmask 261120  }
  0x11   : > { %s1602_s9 = sshll.u32 %s224_s29, 3  ;;  %1605 = vmatprep.subr.bf16.mxu0 %v1756_v2  ;;  %s1601_s27 = sshll.u32 %s2356_s10, 3  ;;  %v1761_v15 = vld [vmem:[%s2337_s1 + $0x20] sm:$0xff]   ;;  %v1763_v32 = vld [vmem:[%s2337_s1 + $0x18] sm:$0xff]   ;;  %v1765_v44 = vld [vmem:[%s2337_s1 + $0x10] sm:$0xff]   ;;  %vm337_vm4 = vcmask 523264  }
  0x12   : > { %s209_s13 = scalar_lea.vmem %s2336_s0, %s1699_s30  ;;  %v1766_v45 = vld [vmem:[%s2337_s1 + $0x48] sm:$0xff]   ;;  %v1768_v59 = vld [vmem:[%s2337_s1 + $0x40] sm:$0xff]   ;;  %v1770_v0 = vld [vmem:[%s2337_s1 + $0xf8] sm:$0xff]   ;;  %vm340_vm5 = vcmask 785408   ;;  %s1700_s11 = smul.u32 5, %s2354_s16  ;;  %vm1351_vm9 = vcmask 1046528  }
  0x13   : > { %s1929_s24 = scalar_lea.vmem %s209_s13, %s1602_s9  ;;  %s1946_s29 = scalar_lea.vmem %s209_s13, %s1601_s27  ;;  %v1767_v55 = vld [vmem:[%s2337_s1 + $0x8] sm:$0xff]   ;;  %v1769_v61 = vld [vmem:[%s2337_s1] sm:$0xff]   ;;  %1631 = vmatprep.subr.bf16.mxu1 %v1770_v0  ;;  %vm2179_vm2 = vmand %vm712_vm0, %vm713_vm1  ;;  %vm1375_vm10 = vcmask 1040384   ;;  %vm1377_vm11 = vcmask 1041408   ;;  %vm1379_vm12 = vcmask 1042432   ;;  %vm1381_vm13 = vcmask 1043456  }
  0x14   : > { %v1935_v7 = vld [vmem:[%s1929_s24 + $0x8] sm:$0x7f]   ;;  %1606 = vmatpush3.bf16.msra.mxu0 %v1757_v3  ;;  %v1938_v8 = vld [vmem:[%s1929_s24] sm:$0x7f]   ;;  %v1967_v22 = vld [vmem:[%s1929_s24 + $0x10] sm:$0x7f]  }
  0x15   : > { %1607 = vmatprep.subr.bf16.mxu0 %v1758_v4  ;;  %501 = vrot.lane.b32.xlu0 %v1935_v7, %s1844_s22  ;;  %v506_v9 = vshll.u32 %v1935_v7, 16  ;;  %v487_v10 = vrot.slane %v1938_v8, 1  ;;  %v481_v11 = vshll.u32 %v1938_v8, 16  ;;  %v504_v12 = vshrl.u32 %v1935_v7, 16  ;;  %v1956_v16 = vld [vmem:[%s1946_s29 + $0x8] sm:$0x7f]  }
  0x16   : > { %v479_v14 = vshrl.u32 %v1938_v8, 16  ;;  %v1959_v17 = vld [vmem:[%s1946_s29] sm:$0x7f]   ;;  %v512_v18 = vrot.slane %v1935_v7, 1  ;;  %v287_v20 = vshll.u32 %v1956_v16, 16  ;;  %v285_v28 = vshrl.u32 %v1956_v16, 16 }
  0x17   : > { %488 = vrot.lane.b32.xlu1 %v487_v10, %s1845_s28  ;;  %v508_v13 = vrot.slane %v506_v9, 1  ;;  %v483_v19 = vrot.slane %v481_v11, 1  ;;  %v268_v21 = vrot.slane %v1959_v17, 1  ;;  %v491_v25 = vrot.slane %v481_v11, 2  ;;  %v1978_v30 = vld [vmem:[%s1929_s24 + $0x20] sm:$0x7f]  }
  0x18   : > { %1608 = vmatpush3.bf16.msra.mxu0 %v1759_v5  ;;  %v490_v24 = vrot.slane %v479_v14, 1  ;;  %v262_v26 = vshll.u32 %v1959_v17, 16  ;;  %v289_v29 = vrot.slane %v287_v20, 1  ;;  %v1987_v33 = vshrl.u32 %v1978_v30, 16  ;;  %v2022_v57 = vld [vmem:[%s1929_s24 + $0x18] sm:$0x7f]  }
  0x19   : > { %1609 = vmatprep.subr.bf16.mxu0 %v1760_v6  ;;  %282 = vrot.lane.b32.xlu0 %v1956_v16, %s1844_s22  ;;  %v509_v23 = vor.u32 %v508_v13, %v504_v12  ;;  %v484_v27 = vor.u32 %v483_v19, %v479_v14  ;;  %v1990_v34 = vshll.u32 %v1978_v30, 16  ;;  %v260_v37 = vshrl.u32 %v1959_v17, 16  ;;  %v2048_v2 = vld [vmem:[%s1946_s29 + $0x10] sm:$0x7f]   ;;  %v1771_v4 = vld [vmem:[%s2337_s1 + $0xb8] sm:$0xff]   ;;  %v1774_v11 = vld [vmem:[%s2337_s1 + $0xe8] sm:$0xff]  }
  0x1a   : > { %v492_v36 = vor.u32 %v491_v25, %v490_v24  ;;  %v264_v38 = vrot.slane %v262_v26, 1  ;;  %v529_v39 = vshrl.u32 %v1967_v22, 16  ;;  %v290_v40 = vor.u32 %v289_v29, %v285_v28  ;;  %1632 = vmatpush3.bf16.msra.mxu1 %v1771_v4  ;;  %v2099_v29 = vld [vmem:[%s1946_s29 + $0x20] sm:$0x7f]   ;;  %v2161_v0 = vld [vmem:[%s2337_s1 + $0x188] sm:$0xff]   ;;  %s2358_s15 = smov (!%p212_p8, %s1826_s15), 4 }
  0x1b   : > { %269 = vrot.lane.b32.xlu1 %v268_v21, %s1845_s28  ;;  %v531_v41 = vshll.u32 %v1967_v22, 16  ;;  %v618_v42 = vrot.slane %v1987_v33, 1  ;;  %v619_v43 = vrot.slane %v1990_v34, 2  ;;  %v271_v48 = vrot.slane %v260_v37, 1  ;;  %v1775_v21 = vld [vmem:[%s2337_s1 + $0xa8] sm:$0xff]   ;;  %s215_s12 = sadd.s32 %s1700_s11, %s2358_s15 }
  0x1c   : > { %1610 = vmatpush3.bf16.msra.mxu0 %v1761_v15  ;;  %v265_v47 = vor.u32 %v264_v38, %v260_v37  ;;  %v272_v49 = vrot.slane %v262_v26, 2  ;;  %v293_v50 = vrot.slane %v1956_v16, 1  ;;  %v538_v51 = vrot.slane %v529_v39, 1 }
  0x1d   : > { %513 = vrot.lane.b32.xlu0 %v512_v18, %s1846_s6  ;;  %1611 = vmatprep.subr.bf16.mxu0 %v1762_v31  ;;  %v2010_v46 = vor.u32 %v619_v43, %v618_v42  ;;  %v539_v52 = vrot.slane %v531_v41, 2  ;;  %v518_v54 = vrot.slane %v1935_v7, 2  ;;  %v2026_v58 = vrot.slane %v504_v12, 1  ;;  %v1772_v7 = vld [vmem:[%s2337_s1 + $0xf0] sm:$0xff]  }
  0x1e   : > { %v273_v53 = vor.u32 %v272_v49, %v271_v48  ;;  %v543_v60 = vrot.slane %v1967_v22, 2  ;;  %v2039_v62 = vrot.slane %v506_v9, 2  ;;  %v605_v63 = vrot.slane %v1987_v33, 7  ;;  %v1773_v9 = vld [vmem:[%s2337_s1 + $0xb0] sm:$0xff]   ;;  %1633 = vmatprep.subr.bf16.mxu1 %v1772_v7  ;;  %v1786_v48 = vld [vmem:[%s2337_s1 + $0xc8] sm:$0xff]  }
  0x1f   : > { %510 = vrot.lane.b32.xlu1 %v509_v23, %s1845_s28  ;;  %v540_v56 = vor.u32 %v539_v52, %v538_v51  ;;  %v583_v1 = vshll.u32 %v2022_v57, 16  ;;  %v533_v6 = vrot.slane %v531_v41, 1  ;;  %v2067_v10 = vrot.slane %v285_v28, 1  ;;  %1634 = vmatpush3.bf16.msra.mxu1 %v1773_v9  ;;  %v1776_v23 = vld [vmem:[%s2337_s1 + $0xe0] sm:$0xff]   ;;  %v1788_v52 = vld [vmem:[%s2337_s1 + $0x88] sm:$0xff]  }
  0x20   : > { %1612 = vmatpush3.bf16.msra.mxu0 %v1763_v32  ;;  %v517_v3 = vor.u32 %v2039_v62, %v2026_v58  ;;  %v2056_v5 = vor.u32 %v1990_v34, %v605_v63  ;;  %v581_v12 = vshrl.u32 %v2022_v57, 16  ;;  %v611_v15 = vrot.slane %v1990_v34, 1  ;;  %1635 = vmatprep.subr.bf16.mxu1 %v1774_v11  ;;  %v1777_v32 = vld [vmem:[%s2337_s1 + $0xa0] sm:$0xff]  }
  0x21   : > { %485 = vrot.lane.b32.xlu0 %v484_v27, %s1844_s22  ;;  %1613 = vmatprep.subr.bf16.mxu0 %v1764_v35  ;;  %v585_v13 = vrot.slane %v583_v1, 1  ;;  %v534_v14 = vor.u32 %v533_v6, %v529_v39  ;;  %v589_v18 = vrot.slane %v2022_v57, 1  ;;  %v310_v19 = vshrl.u32 %v2048_v2, 16  ;;  %v1779_v27 = vld [vmem:[%s2337_s1 + $0x178] sm:$0xff]  }
  0x22   : > { %v2088_v24 = vrot.slane %v287_v20, 2  ;;  %v312_v26 = vshll.u32 %v2048_v2, 16  ;;  %v612_v28 = vor.u32 %v611_v15, %v1987_v33  ;;  %v615_v31 = vrot.slane %v1978_v30, 1  ;;  %v1778_v35 = vld [vmem:[%s2337_s1 + $0xd8] sm:$0xff]  }
  0x23   : > { %493 = vrot.lane.b32.xlu1 %v492_v36, %s1846_s6  ;;  %v586_v25 = vor.u32 %v585_v13, %v581_v12  ;;  %1636 = vmatpush3.bf16.msra.mxu1 %v1775_v21  ;;  %v592_v34 = vrot.slane %v581_v12, 1  ;;  %v593_v33 = vrot.slane %v583_v1, 2  ;;  %v319_v36 = vrot.slane %v310_v19, 1  ;;  %v1780_v39 = vld [vmem:[%s2337_s1 + $0x98] sm:$0xff]  }
  0x24   : > { %1614 = vmatpush3.bf16.msra.mxu0 %v1765_v44  ;;  %v298_v20 = vor.u32 %v2088_v24, %v2067_v10  ;;  %1637 = vmatprep.subr.bf16.mxu1 %v1776_v23  ;;  %v391_v37 = vshrl.u32 %v2099_v29, 16  ;;  %v394_v38 = vshll.u32 %v2099_v29, 16  ;;  %v2125_v44 = vld [vmem:[%s1946_s29 + $0x18] sm:$0x7f]   ;;  %v299_v49 = vrot.slane %v1956_v16, 2 }
  0x25   : > { %291 = vrot.lane.b32.xlu0 %v290_v40, %s1845_s28  ;;  %1615 = vmatprep.subr.bf16.mxu0 %v1766_v45  ;;  %v1782_v40 = vld [vmem:[%s2337_s1 + $0xd0] sm:$0xff]   ;;  %v594_v42 = vor.u32 %v593_v33, %v592_v34  ;;  %v371_v51 = vshll.u32 %v2125_v44, 16  ;;  %v369_v16 = vshrl.u32 %v2125_v44, 16  ;;  %v647_v4 = vshrl.u32 %v2010_v46, 16 }
  0x26   : > { %v393_v41 = vrot.slane %v391_v37, 7  ;;  %v407_v63 = vrot.slane %v394_v38, 2  ;;  %v649_v6 = vshll.u32 %v2010_v46, 16  ;;  %v403_v21 = vrot.slane %v2099_v29, 1 }
  0x27   : > { %266 = vrot.lane.b32.xlu1 %v265_v47, %s1844_s22  ;;  %1638 = vmatpush3.bf16.msra.mxu1 %v1777_v32  ;;  %v1784_v47 = vld [vmem:[%s2337_s1 + $0x90] sm:$0xff]   ;;  %v381_v46 = vrot.slane %v371_v51, 2  ;;  %vm1384_vm14 = vcmask 518144   ;;  %vm1385_vm15 = vsmask.f32 2304 }
  0x28   : > { %1616 = vmatpush3.bf16.msra.mxu0 %v1767_v55  ;;  %1639 = vmatprep.subr.bf16.mxu1 %v1778_v35  ;;  %v2127_v45 = vor.u32 %v394_v38, %v393_v41  ;;  %v373_v55 = vrot.slane %v371_v51, 1  ;;  %v651_v12 = vrot.slane %v649_v6, 1  ;;  %v276_v51 = vrot.slane %v1959_v17, 2  ;;  %vm1386_vm0 = vmand %vm1384_vm14, %vm1385_vm15 }
  0x29   : > { %294 = vrot.lane.b32.xlu0 %v293_v50, %s1846_s6  ;;  %1617 = vmatprep.subr.bf16.mxu0 %v1768_v59  ;;  %v324_v50 = vrot.slane %v2048_v2, 2  ;;  %v1792_v59 = vld [vmem:[%s2337_s1 + $0x80] sm:$0xff]  }
  0x2a   : > { %v374_v7 = vor.u32 %v373_v55, %v369_v16  ;;  %v652_v15 = vor.u32 %v651_v12, %v647_v4 }
  0x2b   : > { %274 = vrot.lane.b32.xlu1 %v273_v53, %s1846_s6  ;;  %1640 = vmatpush3.bf16.msra.mxu1 %v1780_v39  ;;  %v1790_v53 = vld [vmem:[%s2337_s1 + $0xc0] sm:$0xff]  }
  0x2c   : > { %1618 = vmatpush3.bf16.msra.mxu0 %v1769_v61  ;;  %1641 = vmatprep.subr.bf16.mxu1 %v1782_v40  ;;  %v399_v61 = vrot.slane %v394_v38, 1  ;;  %v698_v23 = vshrl.u32 %v652_v15, 16 }
  0x2d   : > { %541 = vrot.lane.b32.xlu0 %v540_v56, %s1844_s22  ;;  %1659 = vmatprep.subr.bf16.mxu0 %v1779_v27  ;;  %v406_v56 = vrot.slane %v391_v37, 1 }
  0x2e   : > { %v400_v9 = vor.u32 %v399_v61, %v391_v37  ;;  %v700_v27 = vrot.slane %v698_v23, 3  ;;  %v1785_v23 = vld [vmem:[%s2337_s1 + $0x130] sm:$0xff]  }
  0x2f   : > { %519 = vrot.lane.b32.xlu1 %v518_v54, %s1844_s22  ;;  %1642 = vmatpush3.bf16.msra.mxu1 %v1784_v47  ;;  %v314_v54 = vrot.slane %v312_v26, 1  ;;  %v408_v1 = vor.u32 %v407_v63, %v406_v56 }
  0x30   : > { %1643 = vmatprep.subr.bf16.mxu1 %v1786_v48 }
  0x31   : > { %544 = vrot.lane.b32.xlu0 %v543_v60, %s1845_s28  ;;  %v315_v60 = vor.u32 %v314_v54, %v310_v19  ;;  %v437_v11 = vshll.u32 %v408_v1, 16  ;;  %v435_v13 = vshrl.u32 %v408_v1, 16  ;;  %v380_v19 = vrot.slane %v369_v16, 1 }
  0x33   : > { %526 = vrot.lane.b32.xlu1 %v1967_v22, %s1845_s28  ;;  %1644 = vmatpush3.bf16.msra.mxu1 %v1788_v52 }
  0x34   : > { %1645 = vmatprep.subr.bf16.mxu1 %v1790_v53 }
  0x35   : > { %551 = vrot.lane.b32.xlu0 %v2022_v57, %s1846_s6 }
  0x37   : > { %609 = vrot.lane.b32.xlu1 %v1978_v30, %s1844_s22  ;;  %v320_v30 = vrot.slane %v312_v26, 2  ;;  %1646 = vmatpush3.bf16.msra.mxu1 %v1792_v59 }
  0x38   : > { %1691 = vmatprep.subr.bf16.mxu1 %v2161_v0 }
  0x39   : > { %535 = vrot.lane.b32.xlu0 %v534_v14, %s1846_s6  ;;  %v321_v43 = vor.u32 %v320_v30, %v319_v36  ;;  %v439_v14 = vrot.slane %v437_v11, 1  ;;  %v495_v30 = vrot.slane %v1938_v8, 2 }
  0x3b   : > { %587 = vrot.lane.b32.xlu1 %v586_v25, %s1844_s22  ;;  %v701_v25 = vshll.u32 %v652_v15, 16  ;;  %v2173_v26 = vor.u32 %v439_v14, %v435_v13  ;;  %v1781_v15 = vld [vmem:[%s2337_s1 + $0x138] sm:$0xff]  }
  0x3d   : > { %613 = vrot.lane.b32.xlu0 %v612_v28, %s1845_s28  ;;  %v703_v28 = vrot.slane %v701_v25, 4 }
  0x3f   : > { %590 = vrot.lane.b32.xlu1 %v589_v18, %s1845_s28  ;;  %v377_v18 = vrot.slane %v2125_v44, 1  ;;  %v2177_v32 = vor.u32 %v703_v28, %v700_v27  ;;  %v1787_v27 = vld [vmem:[%s2337_s1 + $0x168] sm:$0xff]  }
  0x41   : > { %616 = vrot.lane.b32.xlu0 %v615_v31, %s1846_s6  ;;  %v382_v31 = vor.u32 %v381_v46, %v380_v19 }
  0x43   : > { %595 = vrot.lane.b32.xlu1 %v594_v42, %s1846_s6 }
  0x45   : > { %322 = vrot.lane.b32.xlu0 %v321_v43, %s1844_s22 }
  0x47   : > { %300 = vrot.lane.b32.xlu1 %v299_v49, %s1844_s22 }
  0x49   : > { %325 = vrot.lane.b32.xlu0 %v324_v50, %s1845_s28 }
  0x4b   : > { %307 = vrot.lane.b32.xlu1 %v2048_v2, %s1845_s28 }
  0x4d   : > { %332 = vrot.lane.b32.xlu0 %v2125_v44, %s1846_s6 }
  0x4f   : > { %397 = vrot.lane.b32.xlu1 %v2099_v29, %s1844_s22  ;;  %v721_v29 = vsel %vm2179_vm2, %v2173_v26, %v2177_v32 }
  0x51   : > { %316 = vrot.lane.b32.xlu0 %v315_v60, %s1846_s6 }
  0x53   : > { %375 = vrot.lane.b32.xlu1 %v374_v7, %s1844_s22  ;;  %s1504_s22 = sshll.u32 %s215_s12, 2 }
  0x55   : > { %401 = vrot.lane.b32.xlu0 %v400_v9, %s1845_s28 }
  0x57   : > { %378 = vrot.lane.b32.xlu1 %v377_v18, %s1845_s28 }
  0x59   : > { %404 = vrot.lane.b32.xlu0 %v403_v21, %s1846_s6 }
  0x5b   : > { %383 = vrot.lane.b32.xlu1 %v382_v31, %s1846_s6  ;;  %v1789_v31 = vld [vmem:[%s2337_s1 + $0x128] sm:$0xff]   ;;  %s217_s6 = scalar_lea.vmem %s2340_s4, %s1504_s22 }
  0x87   : > { %v502_v35 = vpop.permute.xlu0 %501 }
  0x88   : > { %v561_v39 = vsel %vm334_vm3, %v495_v30, %v502_v35  ;;  %v1793_v30 = vld [vmem:[%s2337_s1 + $0x120] sm:$0xff]  }
  0x89   : > { %v489_v33 = vpop.permute.xlu1 %488 }
  0x8b   : > { %v283_v36 = vpop.permute.xlu0 %282 }
  0x8c   : > { %v346_v60 = vsel %vm334_vm3, %v276_v51, %v283_v36 }
  0x8d   : > { %v270_v37 = vpop.permute.xlu1 %269 }
  0x8f   : > { %v514_v38 = vpop.permute.xlu0 %513 }
  0x91   : > { %v511_v40 = vpop.permute.xlu1 %510 }
  0x92   : > { %v563_v41 = vsel %vm337_vm4, %v561_v39, %v511_v40  ;;  %v537_v39 = vrot.slane %v1967_v22, 1  ;;  %v1797_v22 = vld [vmem:[%s2337_s1 + $0x110] sm:$0xff]  }
  0x93   : > { %v486_v42 = vpop.permute.xlu0 %485  ;;  %v565_v43 = vsel %vm340_vm5, %v563_v41, %v514_v38  ;;  %v1794_v38 = vld [vmem:[%s2337_s1 + $0x158] sm:$0xff]  }
  0x94   : > { %v554_v47 = vsel %vm334_vm3, %v1938_v8, %v486_v42  ;;  %v660_v48 = vshrl.u32 %v565_v43, 16  ;;  %v663_v49 = vshll.u32 %v565_v43, 16  ;;  %v1795_v41 = vld [vmem:[%s2337_s1 + $0x118] sm:$0xff]   ;;  %v1796_v43 = vld [vmem:[%s2337_s1 + $0x150] sm:$0xff]  }
  0x95   : > { %v556_v50 = vsel %vm337_vm4, %v554_v47, %v489_v33  ;;  %v494_v52 = vpop.permute.xlu1 %493  ;;  %v1791_v33 = vld [vmem:[%s2337_s1 + $0x160] sm:$0xff]  }
  0x96   : > { %v662_v53 = vrot.slane %v660_v48, 3  ;;  %v665_v54 = vrot.slane %v663_v49, 4  ;;  %v558_v16 = vsel %vm340_vm5, %v556_v50, %v494_v52  ;;  %v1799_v52 = vld [vmem:[%s2337_s1 + $0x148] sm:$0xff]  }
  0x97   : > { %v292_v55 = vpop.permute.xlu0 %291  ;;  %v653_v56 = vshrl.u32 %v558_v16, 16  ;;  %v656_v59 = vshll.u32 %v558_v16, 16 }
  0x98   : > { %v348_v8 = vsel %vm337_vm4, %v346_v60, %v292_v55  ;;  %v666_v7 = vor.u32 %v665_v54, %v662_v53  ;;  %v1800_v55 = vld [vmem:[%s2337_s1 + $0x108] sm:$0xff]  }
  0x99   : > { %v655_v61 = vrot.slane %v653_v56, 3  ;;  %v658_v63 = vrot.slane %v656_v59, 4  ;;  %v267_v1 = vpop.permute.xlu1 %266 }
  0x9a   : > { %v336_v4 = vsel %vm334_vm3, %v1959_v17, %v267_v1  ;;  %v1783_v17 = vld [vmem:[%s2337_s1 + $0x170] sm:$0xff]  }
  0x9b   : > { %v295_v6 = vpop.permute.xlu0 %294  ;;  %v659_v12 = vor.u32 %v658_v63, %v655_v61  ;;  %v339_v13 = vsel %vm337_vm4, %v336_v4, %v270_v37  ;;  %v1801_v61 = vld [vmem:[%s2337_s1 + $0x140] sm:$0xff]  }
  0x9c   : > { %v350_v9 = vsel %vm340_vm5, %v348_v8, %v295_v6  ;;  %v318_v8 = vrot.slane %v2048_v2, 1  ;;  %v1802_v6 = vld [vmem:[%s2337_s1 + $0x100] sm:$0xff]  }
  0x9d   : > { %v716_v11 = vsel %vm2179_vm2, %v350_v9, %v666_v7  ;;  %v275_v14 = vpop.permute.xlu1 %274 }
  0x9e   : > { %1160 = vmatprep.mubr.bf16.mxu0 %v716_v11  ;;  %v342_v18 = vsel %vm340_vm5, %v339_v13, %v275_v14 }
  0x9f   : > { %v542_v19 = vpop.permute.xlu0 %541  ;;  %v715_v46 = vsel %vm2179_vm2, %v342_v18, %v659_v12 }
  0xa0   : > { %1161 = vmatmul.mubr.bf16.vlgmr.msra.gmra.mxu0 %v715_v46  ;;  %v575_v47 = vsel %vm334_vm3, %v537_v39, %v542_v19 }
  0xa1   : > { %1168 = vmatprep.mubr.bf16.mxu0 %v666_v7  ;;  %v520_v21 = vpop.permute.xlu1 %519  ;;  %1660 = vmatpush3.bf16.msra.mxu0 %v1781_v15 }
  0xa2   : > { %1661 = vmatprep.subr.bf16.mxu0 %v1783_v17  ;;  %v568_v53 = vsel %vm334_vm3, %v517_v3, %v520_v21 }
  0xa3   : > { %v545_v25 = vpop.permute.xlu0 %544 }
  0xa4   : > { %v577_v48 = vsel %vm337_vm4, %v575_v47, %v545_v25 }
  0xa5   : > { %v527_v28 = vpop.permute.xlu1 %526  ;;  %1662 = vmatpush3.bf16.msra.mxu0 %v1785_v23 }
  0xa6   : > { %1663 = vmatprep.subr.bf16.mxu0 %v1787_v27  ;;  %v570_v56 = vsel %vm337_vm4, %v568_v53, %v527_v28 }
  0xa7   : > { %v552_v35 = vpop.permute.xlu0 %551 }
  0xa8   : > { %1169 = vmatmul.mubr.bf16.gmra.mxu0 %v659_v12  ;;  %v579_v50 = vsel %vm340_vm5, %v577_v48, %v552_v35 }
  0xa9   : > { %v610_v36 = vpop.permute.xlu1 %609  ;;  %1664 = vmatpush3.bf16.msra.mxu0 %v1789_v31  ;;  %v674_v54 = vshrl.u32 %v579_v50, 16  ;;  %v677_v59 = vshll.u32 %v579_v50, 16 }
  0xaa   : > { %1665 = vmatprep.subr.bf16.mxu0 %v1791_v33  ;;  %v629_v58 = vsel %vm334_vm3, %v2056_v5, %v610_v36 }
  0xab   : > { %v536_v37 = vpop.permute.xlu0 %535  ;;  %v676_v63 = vrot.slane %v674_v54, 3  ;;  %v679_v7 = vrot.slane %v677_v59, 4 }
  0xac   : > { %v572_v62 = vsel %vm340_vm5, %v570_v56, %v536_v37 }
  0xad   : > { %v588_v40 = vpop.permute.xlu1 %587  ;;  %1666 = vmatpush3.bf16.msra.mxu0 %v1793_v30  ;;  %v667_v9 = vshrl.u32 %v572_v62, 16  ;;  %v670_v11 = vshll.u32 %v572_v62, 16  ;;  %v680_v23 = vor.u32 %v679_v7, %v676_v63 }
  0xae   : > { %1667 = vmatprep.subr.bf16.mxu0 %v1794_v38  ;;  %v622_v5 = vsel %vm334_vm3, %v2022_v57, %v588_v40  ;;  %v1803_v40 = vld [vmem:[%s2337_s1 + $0x180] sm:$0xff]  }
  0xaf   : > { %v614_v42 = vpop.permute.xlu0 %613  ;;  %v669_v19 = vrot.slane %v667_v9, 3  ;;  %v672_v17 = vrot.slane %v670_v11, 4 }
  0xb0   : > { %v631_v3 = vsel %vm337_vm4, %v629_v58, %v614_v42 }
  0xb1   : > { %v591_v49 = vpop.permute.xlu1 %590  ;;  %1668 = vmatpush3.bf16.msra.mxu0 %v1795_v41  ;;  %v673_v33 = vor.u32 %v672_v17, %v669_v19 }
  0xb2   : > { %1669 = vmatprep.subr.bf16.mxu0 %v1796_v43  ;;  %v624_v13 = vsel %vm337_vm4, %v622_v5, %v591_v49 }
  0xb3   : > { %v617_v51 = vpop.permute.xlu0 %616 }
  0xb4   : > { %v633_v1 = vsel %vm340_vm5, %v631_v3, %v617_v51 }
  0xb5   : > { %v596_v16 = vpop.permute.xlu1 %595  ;;  %1670 = vmatpush3.bf16.msra.mxu0 %v1797_v22  ;;  %v642_v14 = vshll.u32 %v633_v1, 16  ;;  %v640_v36 = vshrl.u32 %v633_v1, 16 }
  0xb6   : > { %1671 = vmatprep.subr.bf16.mxu0 %v1799_v52  ;;  %v626_v15 = vsel %vm340_vm5, %v624_v13, %v596_v16 }
  0xb7   : > { %v323_v60 = vpop.permute.xlu0 %322  ;;  %v636_v25 = vshll.u32 %v626_v15, 16  ;;  %v644_v27 = vrot.slane %v642_v14, 1  ;;  %v634_v24 = vshrl.u32 %v626_v15, 16 }
  0xb8   : > { %v362_v2 = vsel %vm334_vm3, %v318_v8, %v323_v60 }
  0xb9   : > { %v301_v4 = vpop.permute.xlu1 %300  ;;  %1672 = vmatpush3.bf16.msra.mxu0 %v1800_v55  ;;  %v638_v38 = vrot.slane %v636_v25, 1  ;;  %v645_v41 = vor.u32 %v644_v27, %v640_v36 }
  0xba   : > { %1673 = vmatprep.subr.bf16.mxu0 %v1801_v61  ;;  %v354_v31 = vsel %vm334_vm3, %v298_v20, %v301_v4 }
  0xbb   : > { %v326_v12 = vpop.permute.xlu0 %325  ;;  %v639_v43 = vor.u32 %v638_v38, %v634_v24  ;;  %v690_v47 = vshrl.u32 %v645_v41, 16  ;;  %v693_v48 = vshll.u32 %v645_v41, 16 }
  0xbc   : > { %v364_v46 = vsel %vm337_vm4, %v362_v2, %v326_v12 }
  0xbd   : > { %v308_v18 = vpop.permute.xlu1 %307  ;;  %1674 = vmatpush3.bf16.msra.mxu0 %v1802_v6  ;;  %v682_v52 = vshrl.u32 %v639_v43, 16  ;;  %v685_v53 = vshll.u32 %v639_v43, 16  ;;  %v692_v16 = vrot.slane %v690_v47, 3  ;;  %v695_v55 = vrot.slane %v693_v48, 4 }
  0xbe   : > { %v356_v30 = vsel %vm337_vm4, %v354_v31, %v308_v18 }
  0xbf   : > { %v333_v21 = vpop.permute.xlu0 %332  ;;  %v684_v62 = vrot.slane %v682_v52, 3  ;;  %v687_v3 = vrot.slane %v685_v53, 4  ;;  %v696_v1 = vor.u32 %v695_v55, %v692_v16 }
  0xc0   : > { %v366_v57 = vsel %vm340_vm5, %v364_v46, %v333_v21 }
  0xc1   : > { %v718_v28 = vsel %vm2179_vm2, %v366_v57, %v680_v23  ;;  %v398_v35 = vpop.permute.xlu1 %397  ;;  %v688_v7 = vor.u32 %v687_v3, %v684_v62 }
  0xc2   : > { %1208 = vmatprep.mubr.bf16.mxu1 %v718_v28  ;;  %v417_v49 = vsel %vm334_vm3, %v2127_v45, %v398_v35 }
  0xc3   : > { %v317_v37 = vpop.permute.xlu0 %316 }
  0xc4   : > { %v358_v39 = vsel %vm340_vm5, %v356_v30, %v317_v37 }
  0xc5   : > { %v717_v10 = vsel %vm2179_vm2, %v358_v39, %v673_v33  ;;  %v376_v20 = vpop.permute.xlu1 %375 }
  0xc6   : > { %1209 = vmatmul.mubr.bf16.vlgmr.msra.gmra.mxu1 %v717_v10 }
  0xc7   : > { %v402_v42 = vpop.permute.xlu0 %401  ;;  %1216 = vmatprep.mubr.bf16.mxu1 %v680_v23  ;;  %1692 = vmatpush3.bf16.msra.mxu1 %v2161_v0  ;;  %v410_v0 = vsel %vm334_vm3, %v2125_v44, %v376_v20 }
  0xc8   : > { %1693 = vmatprep.subr.bf16.mxu1 %v1803_v40  ;;  %v419_v50 = vsel %vm337_vm4, %v417_v49, %v402_v42 }
  0xc9   : > { %v379_v22 = vpop.permute.xlu1 %378 }
  0xca   : > { %v412_v59 = vsel %vm337_vm4, %v410_v0, %v379_v22 }
  0xcb   : > { %v405_v51 = vpop.permute.xlu0 %404  ;;  %1694 = vmatpush3.bf16.msra.mxu1 %v1803_v40 }
  0xcc   : > { %v421_v54 = vsel %vm340_vm5, %v419_v50, %v405_v51  ;;  %v1597_v51 = vld [vmem:[%s2338_s2] ss:$0 sm:$0xff] }
  0xcd   : > { %v430_v56 = vshll.u32 %v421_v54, 16  ;;  %v384_v60 = vpop.permute.xlu1 %383  ;;  %v428_v45 = vshrl.u32 %v421_v54, 16 }
  0xce   : > { %1217 = vmatmul.mubr.bf16.gmra.mxu1 %v673_v33  ;;  %v414_v58 = vsel %vm340_vm5, %v412_v59, %v384_v60 }
  0xcf   : > { %v432_v61 = vrot.slane %v430_v56, 1  ;;  %1695 = vmatprep.mubr.msk.bf16.mxu1 %vm334_vm3, %v721_v29  ;;  %v424_v63 = vshll.u32 %v414_v58, 16  ;;  %v422_v8 = vshrl.u32 %v414_v58, 16  ;;  %v1598_v56 = vld [vmem:[%s2339_s3] ss:$0 sm:$0xff] }
  0xd1   : > { %v433_v44 = vor.u32 %v432_v61, %v428_v45  ;;  %v426_v4 = vrot.slane %v424_v63, 1 }
  0xd3   : > { %v720_v6 = vsel %vm2179_vm2, %v433_v44, %v696_v1  ;;  %v427_v9 = vor.u32 %v426_v4, %v422_v8 }
  0xd4   : > { %1256 = vmatprep.mubr.bf16.mxu0 %v720_v6 }
  0xd5   : > { %v719_v11 = vsel %vm2179_vm2, %v427_v9, %v688_v7 }
  0xd6   : > { %1696 = vmatmul.mubr.msk.bf16.vlgmr.msra.gmra.mxu1 %vm334_vm3, %v2177_v32  ;;  %1257 = vmatmul.mubr.bf16.vlgmr.msra.gmra.mxu0 %v719_v11 }
  0xd7   : > { %1264 = vmatprep.mubr.bf16.mxu0 %v696_v1 }
  0xde   : > { %1265 = vmatmul.mubr.bf16.gmra.mxu0 %v688_v7 }
 0x160   : > { %v1619_v26 = vpop.f32.mrf.mxu0 }
 0x162   : > { %v1620_v29 = vpop.f32.mrf.mxu0 }
 0x163   : > { %v1621_v31 = vadd.f32 %v1620_v29, %v1619_v26 }
 0x164   : > { %v1622_v5 = vpop.f32.mrf.mxu0 }
 0x166   : > { %v1623_v12 = vpop.f32.mrf.mxu0 }
 0x167   : > { %v1624_v39 = vadd.f32 %v1623_v12, %v1622_v5 }
 0x168   : > { %v1625_v13 = vpop.f32.mrf.mxu0 }
 0x16a   : > { %v1626_v14 = vpop.f32.mrf.mxu0 }
 0x16b   : > { %v1627_v43 = vadd.f32 %v1626_v14, %v1625_v13 }
 0x16c   : > { %v1628_v15 = vpop.f32.mrf.mxu0 }
 0x16e   : > { %v1629_v2 = vpop.f32.mrf.mxu0 }
 0x186   : > { %v1647_v18 = vpop.f32.mrf.mxu1 }
 0x188   : > { %v1648_v19 = vpop.f32.mrf.mxu1 }
 0x189   : > { %v1649_v57 = vadd.f32 %v1648_v19, %v1647_v18 }
 0x18a   : > { %v1650_v17 = vpop.f32.mrf.mxu1 }
 0x18b   : > { %v1211_v37 = vadd.f32 %v1649_v57, %v1621_v31 }
 0x18c   : > { %v1651_v46 = vpop.f32.mrf.mxu1 }
 0x18d   : > { %v1652_v33 = vadd.f32 %v1651_v46, %v1650_v17 }
 0x18e   : > { %v1653_v34 = vpop.f32.mrf.mxu1 }
 0x18f   : > { %v1214_v10 = vadd.f32 %v1652_v33, %v1624_v39 }
 0x190   : > { %v1654_v21 = vpop.f32.mrf.mxu1 }
 0x191   : > { %v1655_v24 = vadd.f32 %v1654_v21, %v1653_v34  ;;  %v1387_v34 = vld [vmem:[%s217_s6] sm:$0x7] }
 0x192   : > { %v1656_v23 = vpop.f32.mrf.mxu1 }
 0x193   : > { %v1219_v50 = vadd.f32 %v1655_v24, %v1627_v43 }
 0x194   : > { %v1657_v25 = vpop.f32.mrf.mxu1 }
 0x196   : > { %v1697_v32 = vpop.f32.mrf.mxu1  ;;  %v1675_v27 = vpop.f32.mrf.mxu0 }
 0x198   : > { %v1306_v28 = vpop.f32.mrf.mxu1  ;;  %v1676_v35 = vpop.f32.mrf.mxu0 }
 0x199   : > { %v1677_v36 = vadd.f32 %v1676_v35, %v1675_v27 }
 0x19a   : > { %v1698_v30 = vpop.f32.mrf.mxu1  ;;  %v1678_v38 = vpop.f32.mrf.mxu0 }
 0x19b   : > { %v1259_v40 = vadd.f32 %v1677_v36, %v1211_v37 }
 0x19c   : > { %v1679_v41 = vpop.f32.mrf.mxu0  ;;  %v1309_v49 = vpop.f32.mrf.mxu1 }
 0x19d   : > { %v1680_v20 = vadd.f32 %v1679_v41, %v1678_v38  ;;  %v1307_v48 = vadd.f32 %v1306_v28, %v1259_v40 }
 0x19e   : > { %v1681_v42 = vpop.f32.mrf.mxu0 }
 0x19f   : > { %v1262_v47 = vadd.f32 %v1680_v20, %v1214_v10  ;;  %v1327_v0 = vmul.f32 %v1597_v51, %v1307_v48 }
 0x1a0   : > { %v1682_v22 = vpop.f32.mrf.mxu0 }
 0x1a1   : > { %v1310_v52 = vadd.f32 %v1309_v49, %v1262_v47  ;;  %v1683_v53 = vadd.f32 %v1682_v22, %v1681_v42  ;;  %v1337_v62 = vadd.f32 %v1598_v56, %v1327_v0 }
 0x1a2   : > { %v1684_v54 = vpop.f32.mrf.mxu0 }
 0x1a3   : > { %v1328_v16 = vmul.f32 %v1597_v51, %v1310_v52  ;;  %v1267_v55 = vadd.f32 %v1683_v53, %v1219_v50  ;;  %v1343_v1 = vmul.f32 0.01, %v1337_v62  ;;  %vm1340_vm8 = vcmp.ge.f32.partialorder %v1337_v62, 0.0 }
 0x1a4   : > { %v1685_v59 = vpop.f32.mrf.mxu0 }
 0x1a5   : > { %v1338_v60 = vadd.f32 %v1598_v56, %v1328_v16  ;;  %v1315_v45 = vadd.f32 %v1697_v32, %v1267_v55  ;;  %v1346_v7 = vsel %vm1340_vm8, %v1337_v62, %v1343_v1 }
 0x1a7   : > { %v1344_v61 = vmul.f32 0.01, %v1338_v60  ;;  %v1329_v58 = vmul.f32 %v1597_v51, %v1315_v45  ;;  %vm1341_vm6 = vcmp.ge.f32.partialorder %v1338_v60, 0.0 }
 0x1a9   : > { %v1339_v3 = vadd.f32 %v1598_v56, %v1329_v58  ;;  %v1347_v63 = vsel %vm1341_vm6, %v1338_v60, %v1344_v61 }
 0x1aa   : > { %v1352_v4 = vrot.slane %v1347_v63, 1 }
 0x1ab   : > { %vm1342_vm7 = vcmp.ge.f32.partialorder %v1339_v3, 0.0  ;;  %v1345_v44 = vmul.f32 0.01, %v1339_v3 }
 0x1ad   : > { %v1348_v8 = vsel %vm1342_vm7, %v1339_v3, %v1345_v44 }
 0x1ae   : > { %v1353_v6 = vrot.slane %v1348_v8, 1 }
 0x1b0   : > { %v1354_v9 = vsel %vm1351_vm9, %v1352_v4, %v1353_v6  ;;  %v1358_v11 = vmax.f32 %v1347_v63, %v1353_v6 }
 0x1b1   : > { %v1357_v26 = vmax.f32 %v1346_v7, %v1354_v9 }
 0x1b2   : > { %v1364_v29 = vrot.slane %v1358_v11, 1 }
 0x1b3   : > { %v1360_v5 = vrot.slane %v1357_v26, 1 }
 0x1b4   : > { %v1366_v13 = vmax.f32 %v1357_v26, %v1364_v29 }
 0x1b5   : > { %v1362_v12 = vmax.f32 %v1357_v26, %v1360_v5 }
 0x1b6   : > { %v1373_v18 = vrot.slane %v1366_v13, 3 }
 0x1b7   : > { %v1368_v14 = vrot.slane %v1362_v12, 1  ;;  %v1370_v15 = vrot.slane %v1362_v12, 2  ;;  %v1376_v2 = vsel %vm1375_vm10, %v1357_v26, %v1362_v12 }
 0x1b9   : > { %v1378_v19 = vsel %vm1377_vm11, %v1376_v2, %v1368_v14 }
 0x1ba   : > { %v1380_v17 = vsel %vm1379_vm12, %v1378_v19, %v1370_v15 }
 0x1bb   : > { %v1382_v46 = vsel %vm1381_vm13, %v1380_v17, %v1373_v18 }
 0x1bc   : > { %v1383_v21 = vpack.c.bf16 %v1382_v46, %v1382_v46 }
 0x1be   : > { %v1388_v23 = vsel %vm1386_vm0, %v1383_v21, %v1387_v34 }
 0x1bf   : > { %1389 = vst [vmem:[%s217_s6] sm:$0x7] %v1388_v23 }
 0x1c0 PF: > { %s14_s19 = sadd.s32 1, %s1842_s19   ;;  %s2343_s15 = smov %s1834_s17 }
 0x1c1   : > { %p11_p9 = scmp.ge.s32.totalorder %s14_s19, 12   ;;  %s2344_s16 = smov %s1838_s18 }
 0x1c2   : > { %s2345_s17 = smov %s2348_s20  ;;  %s2346_s18 = smov %s2352_s21 }
 0x1c3   :  { %13 = sbr.rel (!%p11_p9) target bundleno = 3 (0x3), region = 76 }

// kernel: patch_embed_forward.5
= control target key start
LH: loop header
LB: loop body
LE: loop exit
PB: predicated region body
PF: predicated region fallthrough
CT: control target
= control target key end

     0   :  { %s1723_s15 = smov 0   ;;  %s1725_s16 = smov 0   ;;  %s2306_s0 = inlined_call_operand.vmem [shape: bf16[2,20,20,16], index: 0, kind: input, shape index: {}]   ;;  %s2307_s1 = inlined_call_operand.vmem [shape: bf16[400,32], index: 1, kind: input, shape index: {}]   ;;  %s2308_s2 = inlined_call_operand.vmem [shape: f32[1,32], index: 2, kind: input, shape index: {}]   ;;  %s2309_s3 = inlined_call_operand.vmem [shape: f32[1,32], index: 3, kind: input, shape index: {}]   ;;  %s2310_s4 = inlined_call_operand.vmem [shape: bf16[2,9,9,32], index: 4, kind: output, shape index: {}]  }
   0x1   :  { %s1727_s17 = smov 0   ;;  %s1729_s18 = smov 0  }
   0x2   :  { %s1731_s19 = smov 0  }
   0x3 LB: > { %s23_s20 = sadd.s32 1, %s1680_s17  ;;  %s26_s21 = sadd.s32 1, %s1684_s18  ;;  %s1688_s19 = sphi %s1731_s19, %s14_s19   ;;  %s1684_s18 = sphi %s1729_s18, %s2314_s18   ;;  %s1680_s17 = sphi %s1727_s17, %s2313_s17   ;;  %s1676_s16 = sphi %s1725_s16, %s2312_s16   ;;  %s1672_s15 = sphi %s1723_s15, %s2311_s15  }
   0x4   : > { %p24_p0 = scmp.ge.s32.totalorder %s23_s20, 9  ;;  %p1438_p1 = scmp.ge.s32.totalorder %s1688_s19, 1 }
   0x5   : > { %p176_p2 = scmp.lt.s32.totalorder %s1688_s19, 19 }
   0x6   : > { %s2316_s20 = smov (%p24_p0, %s23_s20), 0  ;;  %s2318_s21 = smov (!%p24_p0, %s26_s21), %s1684_s18 }
   0x7   : > { %p177_p3 = pnand %p1438_p1, %p176_p2  ;;  %p28_p4 = scmp.ge.s32.totalorder %s2318_s21, 2 }
   0x8   : > { %p206_p5 = scmp.lt.s32.totalorder (!%p177_p3), %s1676_s16, 1  ;;  %s1442_s22 = sshll.u32 (!%p177_p3), %s1672_s15, 1 }
   0x9   : > { %s2320_s21 = smov (%p28_p4, %s2318_s21), 0  ;;  %180 = sbr.rel (%p177_p3) target bundleno = 471 (0x1d7), region = 36 }
   0xa   : > { %s1443_s23 = sadd.s32 (!%p177_p3), 4294967295, %s1442_s22  ;;  %p225_p7 = scmp.lt.s32.totalorder (!%p177_p3), %s1442_s22, 15 }
   0xb   : > { %p223_p6 = scmp.gt.s32.totalorder (!%p177_p3), %s1443_s23, 0  ;;  %s1690_s30 = smov (!%p177_p3), 32  }
   0xc   : > { %s1691_s6 = smov (!%p177_p3), 16   ;;  %s1692_s8 = smov (!%p177_p3), 64  }
   0xd   : > { %s1693_s9 = smov (!%p177_p3), 48   ;;  %s1694_s14 = smov (!%p177_p3), 80  }
   0xe   : > { %s2322_s16 = smov (!%p206_p5, %s1676_s16), 1  ;;  %s2324_s23 = smov (!%p223_p6, %s1443_s23), 0  ;;  %vm284_vm0 = vcmask 1046528   ;;  %vm302_vm1 = vcmask 1045504   ;;  %vm269_vm2 = vsmask.f32 7424 }
   0xf   : > { %s1555_s24 = smul.u32 240, %s2322_s16  ;;  %s2326_s22 = smov (!%p225_p7, %s1442_s22), 15  ;;  %vm290_vm3 = vsmask.f32 6400  ;;  %vm403_vm4 = vcmask 130048   ;;  %vm409_vm5 = vcmask 392192  }
  0x10   : > { %s1523_s28 = smul.u32 12, %s2324_s23  ;;  %s1695_s11 = smov 96   ;;  %vm406_vm6 = vcmask 261120   ;;  %vm412_vm7 = vcmask 523264   ;;  %vm415_vm8 = vcmask 654336   ;;  %vm418_vm9 = vcmask 785408  }
  0x11   : > { %s1762_s27 = scalar_lea.vmem %s2306_s0, %s1555_s24  ;;  %s1524_s5 = smul.u32 12, %s2326_s22  ;;  %vm421_vm10 = vcmask 916480   ;;  %vm1290_vm15 = vcmask 1040384  }
  0x12   : > { %s1765_s29 = scalar_lea.vmem %s1762_s27, %s1523_s28  ;;  %s1696_s28 = smov 112  }
  0x13   : > { %v1770_v0 = vld [vmem:[%s1765_s29 + $0x18] sm:$0xff]   ;;  %v1773_v1 = vld [vmem:[%s1765_s29 + $0x2c] ss:$0 sps:$4 sm:$0x33]   ;;  %v1776_v2 = vld [vmem:[%s1765_s29 + $0x24] sm:$0xff]   ;;  %s1825_s7 = scalar_lea.vmem %s1762_s27, %s1524_s5  ;;  %p213_p8 = scmp.lt.s32.totalorder %s1672_s15, 8 }
  0x14   : > { %356 = vrot.lane.b32.xlu0 %v1770_v0, %s1690_s30  ;;  %v456_v3 = vshrl.u32 %v1773_v1, 16  ;;  %v462_v4 = vrot.slane %v1776_v2, 1  ;;  %v463_v5 = vrot.slane %v1773_v1, 1  ;;  %v1785_v6 = vld [vmem:[%s1765_s29 + $0x30] sm:$0xff]   ;;  %v452_v7 = vshll.u32 %v1773_v1, 16  ;;  %v1811_v21 = vld [vmem:[%s1765_s29] sm:$0xff]  }
  0x15   : > { %v1791_v9 = vld [vmem:[%s1765_s29 + $0xc] sm:$0xff]   ;;  %v445_v10 = vshrl.u32 %v1776_v2, 16  ;;  %v447_v11 = vshll.u32 %v1776_v2, 16  ;;  %v1799_v13 = vshrl.u32 %v1785_v6, 16  ;;  %v1802_v14 = vshll.u32 %v1785_v6, 16  ;;  %s2328_s15 = smov (!%p213_p8, %s1672_s15), 8 }
  0x16   : > { %460 = vrot.lane.b32.xlu1 %v456_v3, %s1691_s6  ;;  %v464_v8 = vsel %vm284_vm0, %v462_v4, %v463_v5  ;;  %v1795_v12 = vrot.slane %v456_v3, 1  ;;  %v1805_v15 = vld [vmem:[%s1765_s29 + $0x14] ss:$0 sps:$4 sm:$0x33]   ;;  %v346_v16 = vrot.slane %v1791_v9, 2  ;;  %v473_v18 = vrot.slane %v452_v7, 2 }
  0x17   : > { %v449_v17 = vrot.slane %v447_v11, 1  ;;  %v488_v19 = vrot.slane %v1799_v13, 7  ;;  %v347_v20 = vrot.slane %v1805_v15, 2  ;;  %v454_v23 = vrot.slane %v452_v7, 1  ;;  %v1626_v4 = vld [vmem:[%s2307_s1 + $0x78] sm:$0xff]   ;;  %s1440_s12 = sshll.u32 %s2328_s15, 1 }
  0x18   : > { %465 = vrot.lane.b32.xlu0 %v464_v8, %s1690_s30  ;;  %v1815_v24 = vld [vmem:[%s1765_s29 + $0x8] ss:$0 sps:$4 sm:$0x33]   ;;  %v469_v25 = vrot.slane %v445_v10, 1  ;;  %v470_v26 = vrot.slane %v447_v11, 2  ;;  %v285_v29 = vrot.slane %v1811_v21, 1  ;;  %v474_v34 = vor.u32 %v473_v18, %v1795_v12  ;;  %1527 = vmatprep.subr.bf16.mxu0 %v1626_v4 }
  0x19   : > { %v450_v22 = vor.u32 %v449_v17, %v445_v10  ;;  %v491_v27 = vor.u32 %v1802_v14, %v488_v19  ;;  %v348_v28 = vsel %vm302_vm1, %v346_v16, %v347_v20  ;;  %v286_v30 = vrot.slane %v1815_v24, 1  ;;  %v1831_v33 = vld [vmem:[%s1765_s29 + $0x20] ss:$0 sps:$4 sm:$0x33]   ;;  %v1629_v11 = vld [vmem:[%s2307_s1 + $0x70] sm:$0xff]  }
  0x1a   : > { %467 = vrot.lane.b32.xlu1 %v463_v5, %s1690_s30  ;;  %v271_v31 = vshrl.u32 %v1811_v21, 16  ;;  %v273_v32 = vshll.u32 %v1811_v21, 16  ;;  %v278_v35 = vshll.u32 %v1815_v24, 16  ;;  %v362_v36 = vshrl.u32 %v1770_v0, 16  ;;  %v1627_v5 = vld [vmem:[%s2307_s1 + $0x38] sm:$0xff]   ;;  %v1879_v20 = vld [vmem:[%s1825_s7 + $0x30] sm:$0xff]  }
  0x1b   : > { %v364_v37 = vshll.u32 %v1770_v0, 16  ;;  %v455_v38 = vsel %vm269_vm2, %v450_v22, %v454_v23  ;;  %v471_v39 = vor.u32 %v470_v26, %v469_v25  ;;  %v369_v41 = vshll.u32 %v1831_v33, 16  ;;  %v1849_v55 = vld [vmem:[%s1765_s29 + $0x38] ss:$0 sps:$4 sm:$0x33]   ;;  %1528 = vmatpush3.bf16.msra.mxu0 %v1627_v5  ;;  %v1630_v22 = vld [vmem:[%s2307_s1 + $0x30] sm:$0xff]  }
  0x1c   : > { %492 = vrot.lane.b32.xlu0 %v491_v27, %s1692_s8  ;;  %v275_v40 = vrot.slane %v273_v32, 1  ;;  %v287_v42 = vsel %vm284_vm0, %v285_v29, %v286_v30  ;;  %v280_v43 = vrot.slane %v278_v35, 1  ;;  %v294_v45 = vshrl.u32 %v1815_v24, 16  ;;  %1529 = vmatprep.subr.bf16.mxu0 %v1629_v11  ;;  %v1632_v26 = vld [vmem:[%s2307_s1 + $0x68] sm:$0xff]   ;;  %v1642_v5 = vld [vmem:[%s2307_s1 + $0x10] sm:$0xff]  }
  0x1d   : > { %v366_v44 = vrot.slane %v364_v37, 1  ;;  %v475_v47 = vsel %vm290_vm3, %v471_v39, %v474_v34  ;;  %v371_v49 = vrot.slane %v369_v41, 1  ;;  %v291_v50 = vrot.slane %v271_v31, 1 }
  0x1e   : > { %349 = vrot.lane.b32.xlu1 %v348_v28, %s1691_s6  ;;  %v276_v46 = vor.u32 %v275_v40, %v271_v31  ;;  %v292_v52 = vrot.slane %v273_v32, 2  ;;  %v296_v53 = vrot.slane %v294_v45, 1  ;;  %v297_v54 = vrot.slane %v278_v35, 2  ;;  %v1633_v31 = vld [vmem:[%s2307_s1 + $0x28] sm:$0xff]  }
  0x1f   : > { %v367_v48 = vor.u32 %v366_v44, %v362_v36  ;;  %v375_v59 = vrot.slane %v1770_v0, 1  ;;  %v376_v60 = vrot.slane %v1831_v33, 1  ;;  %v503_v61 = vrot.slane %v1802_v14, 1  ;;  %1530 = vmatpush3.bf16.msra.mxu0 %v1630_v22 }
  0x20   : > { %458 = vrot.lane.b32.xlu0 %v455_v38, %s1691_s6  ;;  %v281_v51 = vsel %vm269_vm2, %v276_v46, %v280_v43  ;;  %v293_v57 = vor.u32 %v292_v52, %v291_v50  ;;  %v298_v58 = vor.u32 %v297_v54, %v296_v53  ;;  %v506_v62 = vshll.u32 %v1849_v55, 16  ;;  %1531 = vmatprep.subr.bf16.mxu0 %v1632_v26  ;;  %v1913_v38 = vld [vmem:[%s1825_s7 + $0x24] sm:$0xff]   ;;  %v1924_v43 = vld [vmem:[%s1825_s7 + $0x2c] ss:$0 sps:$4 sm:$0x33]   ;;  %v1639_v50 = vld [vmem:[%s2307_s1 + $0x18] sm:$0xff]  }
  0x21   : > { %v372_v56 = vsel %vm269_vm2, %v367_v48, %v371_v49  ;;  %v383_v63 = vshrl.u32 %v1831_v33, 16  ;;  %v377_v7 = vsel %vm284_vm0, %v375_v59, %v376_v60  ;;  %v504_v8 = vor.u32 %v503_v61, %v1799_v13  ;;  %v1641_v52 = vld [vmem:[%s2307_s1 + $0x50] sm:$0xff]  }
  0x22   : > { %288 = vrot.lane.b32.xlu1 %v287_v42, %s1690_s30  ;;  %v299_v3 = vsel %vm290_vm3, %v293_v57, %v298_v58  ;;  %v508_v10 = vrot.slane %v506_v62, 1  ;;  %v381_v16 = vrot.slane %v364_v37, 2  ;;  %v386_v18 = vrot.slane %v369_v41, 2  ;;  %v1636_v42 = vld [vmem:[%s2307_s1 + $0x20] sm:$0xff]   ;;  %v1960_v57 = vld [vmem:[%s1825_s7 + $0xc] sm:$0xff]  }
  0x23   : > { %v385_v17 = vrot.slane %v383_v63, 1  ;;  %v303_v23 = vrot.slane %v1811_v21, 2  ;;  %v304_v25 = vrot.slane %v1815_v24, 2  ;;  %v1895_v30 = vshrl.u32 %v1879_v20, 16  ;;  %1532 = vmatpush3.bf16.msra.mxu0 %v1633_v31  ;;  %v1625_v31 = vld [vmem:[%s2307_s1 + $0xb8] sm:$0xff]  }
  0x24   : > { %476 = vrot.lane.b32.xlu0 %v475_v47, %s1693_s9  ;;  %v509_v27 = vsel %vm269_vm2, %v504_v8, %v508_v10  ;;  %v1898_v24 = vshll.u32 %v1879_v20, 16  ;;  %v517_v37 = vrot.slane %v1849_v55, 1  ;;  %v321_v40 = vshll.u32 %v1791_v9, 16  ;;  %v1934_v47 = vld [vmem:[%s1825_s7 + $0x38] ss:$0 sps:$4 sm:$0x33]  }
  0x25   : > { %v387_v29 = vor.u32 %v386_v18, %v385_v17  ;;  %v305_v32 = vsel %vm302_vm1, %v303_v23, %v304_v25  ;;  %v866_v34 = vrot.slane %v1895_v30, 1  ;;  %v391_v44 = vrot.slane %v1770_v0, 2  ;;  %v1963_v58 = vld [vmem:[%s1825_s7 + $0x14] ss:$0 sps:$4 sm:$0x33]   ;;  %v1980_v8 = vld [vmem:[%s1825_s7] sm:$0xff]  }
  0x26   : > { %282 = vrot.lane.b32.xlu1 %v281_v51, %s1691_s6  ;;  %v867_v35 = vrot.slane %v1898_v24, 2  ;;  %v392_v45 = vrot.slane %v1831_v33, 2  ;;  %v510_v46 = vshrl.u32 %v1849_v55, 16  ;;  %v319_v49 = vshrl.u32 %v1791_v9, 16 }
  0x27   : > { %v323_v0 = vrot.slane %v321_v40, 1  ;;  %v326_v33 = vshll.u32 %v1805_v15, 16  ;;  %v790_v51 = vshll.u32 %v1913_v38, 16  ;;  %v524_v53 = vrot.slane %v1802_v14, 2 }
  0x28   : > { %373 = vrot.lane.b32.xlu0 %v372_v56, %s1693_s9  ;;  %v1918_v41 = vor.u32 %v867_v35, %v866_v34  ;;  %v1953_v54 = vrot.slane %v510_v46, 1  ;;  %v1957_v56 = vrot.slane %v506_v62, 2  ;;  %v393_v59 = vsel %vm302_vm1, %v391_v44, %v392_v45  ;;  %v1645_v35 = vld [vmem:[%s2307_s1 + $0x8] sm:$0xff]  }
  0x29   : > { %v795_v60 = vshll.u32 %v1924_v43, 16  ;;  %v849_v61 = vshll.u32 %v1934_v47, 16  ;;  %v324_v63 = vor.u32 %v323_v0, %v319_v49  ;;  %v328_v62 = vrot.slane %v326_v33, 1  ;;  %v2028_v45 = vld [vmem:[%s1825_s7 + $0x8] ss:$0 sps:$4 sm:$0x33]  }
  0x2a   : > { %478 = vrot.lane.b32.xlu1 %v1795_v12, %s1693_s9  ;;  %v380_v12 = vrot.slane %v362_v36, 1  ;;  %v516_v36 = vrot.slane %v1785_v6, 1  ;;  %v788_v4 = vshrl.u32 %v1913_v38, 16  ;;  %v853_v10 = vshrl.u32 %v1934_v47, 16 }
  0x2b   : > { %v1985_v11 = vrot.slane %v849_v61, 2  ;;  %v332_v17 = vrot.slane %v1791_v9, 1  ;;  %v797_v18 = vrot.slane %v795_v60, 1  ;;  %v333_v22 = vrot.slane %v1805_v15, 1 }
  0x2c   : > { %499 = vrot.lane.b32.xlu0 %v1785_v6, %s1694_s14  ;;  %v382_v28 = vor.u32 %v381_v16, %v380_v12  ;;  %v1638_v6 = vld [vmem:[%s2307_s1 + $0x58] sm:$0xff]   ;;  %v518_v48 = vsel %vm284_vm0, %v516_v36, %v517_v37  ;;  %v1644_v12 = vld [vmem:[%s2307_s1 + $0x48] sm:$0xff]   ;;  %v343_v16 = vrot.slane %v326_v33, 2  ;;  %v805_v23 = vrot.slane %v1913_v38, 1 }
  0x2d   : > { %v1998_v25 = vrot.slane %v853_v10, 1  ;;  %v329_v26 = vsel %vm269_vm2, %v324_v63, %v328_v62  ;;  %v340_v34 = vshrl.u32 %v1805_v15, 16  ;;  %v528_v36 = vor.u32 %v1957_v56, %v1953_v54  ;;  %v1647_v15 = vld [vmem:[%s2307_s1 + $0x40] sm:$0xff]  }
  0x2e   : > { %300 = vrot.lane.b32.xlu1 %v299_v3, %s1693_s9  ;;  %v388_v39 = vsel %vm290_vm3, %v382_v28, %v387_v29  ;;  %v1971_v3 = vrot.slane %v319_v49, 1  ;;  %v696_v28 = vrot.slane %v1960_v57, 2  ;;  %v697_v29 = vrot.slane %v1963_v58, 2  ;;  %v1648_v63 = vld [vmem:[%s2307_s1] sm:$0xff]  }
  0x2f   : > { %v799_v44 = vshrl.u32 %v1924_v43, 16  ;;  %v334_v49 = vsel %vm284_vm0, %v332_v17, %v333_v22  ;;  %v676_v0 = vshll.u32 %v1963_v58, 16  ;;  %v523_v62 = vrot.slane %v1799_v13, 1 }
  0x30   : > { %378 = vrot.lane.b32.xlu0 %v377_v7, %s1692_s8  ;;  %v792_v7 = vrot.slane %v790_v51, 1  ;;  %v813_v17 = vrot.slane %v790_v51, 2 }
  0x32   : > { %494 = vrot.lane.b32.xlu1 %v488_v19, %s1692_s8  ;;  %v1635_v19 = vld [vmem:[%s2307_s1 + $0x60] sm:$0xff]  }
  0x33   : > { %1533 = vmatprep.subr.bf16.mxu0 %v1635_v19  ;;  %v871_v19 = vor.u32 %v1985_v11, %v1998_v25 }
  0x34   : > { %512 = vrot.lane.b32.xlu0 %v509_v27, %s1695_s11  ;;  %1534 = vmatpush3.bf16.msra.mxu0 %v1636_v42  ;;  %v806_v27 = vrot.slane %v1924_v43, 1  ;;  %v338_v42 = vrot.slane %v321_v40, 2  ;;  %v1697_v40 = vmov 0  }
  0x35   : > { %1535 = vmatprep.subr.bf16.mxu0 %v1638_v6  ;;  %v1628_v6 = vld [vmem:[%s2307_s1 + $0xb0] sm:$0xff]   ;;  %1179 = vmatprep.subr.bf16.mxu1 %v1697_v40 }
  0x36   : > { %306 = vrot.lane.b32.xlu1 %v305_v32, %s1692_s8  ;;  %v793_v32 = vor.u32 %v792_v7, %v788_v4  ;;  %1180 = vmatpush1.bf16.msra.mxu1 %v1625_v31  ;;  %v807_v56 = vsel %vm284_vm0, %v805_v23, %v806_v27  ;;  %v624_v23 = vshrl.u32 %v1980_v8, 16 }
  0x37   : > { %1181 = vmatprep.subr.bf16.mxu1 %v1697_v40 }
  0x38   : > { %389 = vrot.lane.b32.xlu0 %v388_v39, %s1694_s14  ;;  %1536 = vmatpush3.bf16.msra.mxu0 %v1639_v50  ;;  %v669_v39 = vshrl.u32 %v1960_v57, 16  ;;  %v339_v50 = vor.u32 %v338_v42, %v1971_v3  ;;  %v693_v3 = vrot.slane %v676_v0, 2  ;;  %v2086_v42 = vld [vmem:[%s1825_s7 + $0x18] sm:$0xff]  }
  0x39   : > { %1537 = vmatprep.subr.bf16.mxu0 %v1641_v52  ;;  %v798_v52 = vsel %vm269_vm2, %v793_v32, %v797_v18  ;;  %v816_v18 = vrot.slane %v795_v60, 2 }
  0x3a   : > { %501 = vrot.lane.b32.xlu1 %v1849_v55, %s1694_s14  ;;  %v687_v33 = vrot.slane %v669_v39, 1  ;;  %1182 = vmatpush1.bf16.msra.mxu1 %v1628_v6  ;;  %v1631_v55 = vld [vmem:[%s2307_s1 + $0xa8] sm:$0xff]  }
  0x3b   : > { %1183 = vmatprep.subr.bf16.mxu1 %v1697_v40 }
  0x3c   : > { %519 = vrot.lane.b32.xlu0 %v518_v48, %s1696_s28  ;;  %1538 = vmatpush3.bf16.msra.mxu0 %v1642_v5  ;;  %v671_v48 = vshll.u32 %v1960_v57, 16  ;;  %v812_v5 = vrot.slane %v788_v4, 1  ;;  %v525_v4 = vor.u32 %v524_v53, %v523_v62  ;;  %v631_v53 = vshll.u32 %v2028_v45, 16 }
  0x3d   : > { %1539 = vmatprep.subr.bf16.mxu0 %v1644_v12  ;;  %v690_v12 = vshrl.u32 %v1963_v58, 16  ;;  %v637_v62 = vrot.slane %v1980_v8, 1 }
  0x3e   : > { %313 = vrot.lane.b32.xlu1 %v1791_v9, %s1694_s14  ;;  %v342_v9 = vrot.slane %v340_v34, 1  ;;  %v688_v7 = vrot.slane %v671_v48, 2  ;;  %v529_v60 = vsel %vm290_vm3, %v525_v4, %v528_v36  ;;  %v814_v34 = vor.u32 %v813_v17, %v812_v5  ;;  %1184 = vmatpush1.bf16.msra.mxu1 %v1631_v55  ;;  %v1634_v36 = vld [vmem:[%s2307_s1 + $0xa0] sm:$0xff]   ;;  %v1640_v17 = vld [vmem:[%s2307_s1 + $0x90] sm:$0xff]  }
  0x3f   : > { %v692_v51 = vrot.slane %v690_v12, 1  ;;  %v571_v31 = vshll.u32 %v529_v60, 16  ;;  %1185 = vmatprep.subr.bf16.mxu1 %v1697_v40  ;;  %v638_v5 = vrot.slane %v2028_v45, 1  ;;  %v645_v4 = vshrl.u32 %v2028_v45, 16 }
  0x40   : > { %394 = vrot.lane.b32.xlu0 %v393_v59, %s1695_s11  ;;  %v344_v59 = vor.u32 %v343_v16, %v342_v9  ;;  %1540 = vmatpush3.bf16.msra.mxu0 %v1645_v35  ;;  %v2057_v16 = vrot.slane %v799_v44, 1  ;;  %v689_v22 = vor.u32 %v688_v7, %v687_v33 }
  0x41   : > { %1541 = vmatprep.subr.bf16.mxu0 %v1647_v15  ;;  %v694_v32 = vor.u32 %v693_v3, %v692_v51  ;;  %v573_v6 = vrot.slane %v571_v31, 1  ;;  %v712_v3 = vshrl.u32 %v2086_v42, 16  ;;  %v639_v55 = vsel %vm284_vm0, %v637_v62, %v638_v5  ;;  %v1643_v51 = vld [vmem:[%s2307_s1 + $0x88] sm:$0xff]  }
  0x42   : > { %514 = vrot.lane.b32.xlu1 %v510_v46, %s1695_s11  ;;  %v626_v46 = vshll.u32 %v1980_v8, 16  ;;  %v2062_v13 = vsel %vm290_vm3, %v339_v50, %v344_v59  ;;  %v817_v35 = vor.u32 %v816_v18, %v2057_v16  ;;  %v2099_v50 = vld [vmem:[%s1825_s7 + $0x20] ss:$0 sps:$4 sm:$0x33]   ;;  %1186 = vmatpush1.bf16.msra.mxu1 %v1634_v36  ;;  %v648_v31 = vrot.slane %v631_v53, 2 }
  0x43   : > { %v2092_v9 = vsel %vm290_vm3, %v689_v22, %v694_v32  ;;  %1187 = vmatprep.subr.bf16.mxu1 %v1697_v40  ;;  %v719_v12 = vshll.u32 %v2099_v50, 16  ;;  %v1646_v32 = vld [vmem:[%s2307_s1 + $0x80] sm:$0xff]   ;;  %v742_v5 = vrot.slane %v2099_v50, 2 }
  0x44   : > { %330 = vrot.lane.b32.xlu0 %v329_v26, %s1695_s11  ;;  %v628_v14 = vrot.slane %v626_v46, 1  ;;  %1542 = vmatpush3.bf16.msra.mxu0 %v1648_v63  ;;  %v569_v26 = vshrl.u32 %v529_v60, 16  ;;  %v818_v33 = vsel %vm290_vm3, %v814_v34, %v817_v35  ;;  %v643_v60 = vrot.slane %v626_v46, 2  ;;  %v1649_v36 = vld [vmem:[%s2307_s1 + $0xc0] sm:$0xff]  }
  0x45   : > { %v721_v22 = vrot.slane %v719_v12, 1  ;;  %v725_v46 = vrot.slane %v2086_v42, 1  ;;  %v846_v34 = vrot.slane %v1898_v24, 1  ;;  %v733_v35 = vshrl.u32 %v2099_v50, 16 }
  0x46   : > { %401 = vrot.lane.b32.xlu1 %v1776_v2, %s1696_s28 }
  0x48   : > { %521 = vrot.lane.b32.xlu0 %v517_v37, %s1696_s28  ;;  %v576_v37 = vshll.u32 %v1953_v54, 16  ;;  %v698_v54 = vsel %vm302_vm1, %v696_v28, %v697_v29  ;;  %v633_v28 = vrot.slane %v631_v53, 1  ;;  %v574_v29 = vor.u32 %v573_v6, %v569_v26 }
  0x49   : > { %v647_v26 = vrot.slane %v645_v4, 1  ;;  %v726_v53 = vrot.slane %v2099_v50, 1 }
  0x4a   : > { %801 = vrot.lane.b32.xlu1 %v798_v52, %s1691_s6  ;;  %v578_v15 = vrot.slane %v576_v37, 1  ;;  %v714_v52 = vshll.u32 %v2086_v42, 16 }
  0x4c   : > { %335 = vrot.lane.b32.xlu0 %v334_v49, %s1696_s28  ;;  %v629_v49 = vor.u32 %v628_v14, %v624_v23  ;;  %v579_v59 = vsel %vm269_vm2, %v574_v29, %v578_v15  ;;  %v716_v7 = vrot.slane %v714_v52, 1  ;;  %v642_v14 = vrot.slane %v624_v23, 1 }
  0x4d   : > { %1515 = vmatprep.mubr.msk.bf16.mxu1 %vm403_vm4, %v579_v59  ;;  %v649_v23 = vor.u32 %v648_v31, %v647_v26  ;;  %v727_v15 = vsel %vm284_vm0, %v725_v46, %v726_v53  ;;  %v735_v29 = vrot.slane %v733_v35, 1 }
  0x4e   : > { %808 = vrot.lane.b32.xlu1 %v807_v56, %s1690_s30  ;;  %v1637_v56 = vld [vmem:[%s2307_s1 + $0x98] sm:$0xff]   ;;  %v634_v63 = vsel %vm269_vm2, %v629_v49, %v633_v28  ;;  %v717_v37 = vor.u32 %v716_v7, %v712_v3  ;;  %v730_v49 = vrot.slane %v712_v3, 1  ;;  %v731_v28 = vrot.slane %v714_v52, 2 }
  0x4f   : > { %1188 = vmatpush1.bf16.msra.mxu1 %v1637_v56  ;;  %v653_v56 = vrot.slane %v1980_v8, 2  ;;  %v859_v52 = vrot.slane %v1879_v20, 1  ;;  %v872_v3 = vsel %vm290_vm3, %v1918_v41, %v871_v19  ;;  %v678_v19 = vrot.slane %v676_v0, 1 }
  0x50   : > { %699 = vrot.lane.b32.xlu0 %v698_v54, %s1691_s6  ;;  %1189 = vmatprep.subr.bf16.mxu1 %v1697_v40  ;;  %v644_v54 = vor.u32 %v643_v60, %v642_v14  ;;  %v732_v59 = vor.u32 %v731_v28, %v730_v49 }
  0x52   : > { %803 = vrot.lane.b32.xlu1 %v799_v44, %s1691_s6  ;;  %v831_v44 = vrot.slane %v1895_v30, 7  ;;  %v650_v6 = vsel %vm290_vm3, %v644_v54, %v649_v23 }
  0x53   : > { %1190 = vmatpush1.bf16.msra.mxu1 %v1640_v17  ;;  %v914_v17 = vshll.u32 %v872_v3, 16 }
  0x54   : > { %819 = vrot.lane.b32.xlu0 %v818_v33, %s1693_s9  ;;  %v834_v18 = vor.u32 %v1898_v24, %v831_v44  ;;  %1191 = vmatprep.subr.bf16.mxu1 %v1697_v40  ;;  %v847_v24 = vor.u32 %v846_v34, %v1895_v30  ;;  %v736_v33 = vrot.slane %v719_v12, 2  ;;  %v673_v12 = vrot.slane %v671_v48, 1 }
  0x55   : > { %v916_v4 = vrot.slane %v914_v17, 1 }
  0x56   : > { %635 = vrot.lane.b32.xlu1 %v634_v63, %s1691_s6  ;;  %v737_v63 = vor.u32 %v736_v33, %v735_v29  ;;  %v674_v41 = vor.u32 %v673_v12, %v669_v39  ;;  %v683_v39 = vrot.slane %v1963_v58, 1 }
  0x57   : > { %1192 = vmatpush1.bf16.msra.mxu1 %v1643_v51 }
  0x58   : > { %706 = vrot.lane.b32.xlu0 %v2086_v42, %s1690_s30  ;;  %1193 = vmatprep.subr.bf16.mxu1 %v1697_v40 }
  0x5a   : > { %810 = vrot.lane.b32.xlu1 %v806_v27, %s1690_s30  ;;  %v722_v27 = vsel %vm269_vm2, %v717_v37, %v721_v22 }
  0x5b   : > { %1194 = vmatpush1.bf16.msra.mxu1 %v1646_v32 }
  0x5c   : > { %835 = vrot.lane.b32.xlu0 %v834_v18, %s1692_s8  ;;  %1209 = vmatprep.subr.bf16.mxu1 %v1697_v40  ;;  %v654_v40 = vrot.slane %v2028_v45, 2  ;;  %v860_v45 = vrot.slane %v1934_v47, 1  ;;  %v679_v18 = vsel %vm269_vm2, %v674_v41, %v678_v19 }
  0x5e   : > { %640 = vrot.lane.b32.xlu1 %v639_v55, %s1690_s30  ;;  %v655_v62 = vsel %vm302_vm1, %v653_v56, %v654_v40  ;;  %v861_v7 = vsel %vm284_vm0, %v859_v52, %v860_v45  ;;  %v682_v55 = vrot.slane %v1960_v57, 1 }
  0x5f   : > { %1210 = vmatpush2.bf16.msra.mxu1 %v1649_v36 }
  0x60   : > { %723 = vrot.lane.b32.xlu0 %v722_v27, %s1693_s9  ;;  %v684_v0 = vsel %vm284_vm0, %v682_v55, %v683_v39 }
  0x62   : > { %821 = vrot.lane.b32.xlu1 %v2057_v16, %s1693_s9  ;;  %v851_v16 = vrot.slane %v849_v61, 1  ;;  %v738_v61 = vsel %vm290_vm3, %v732_v59, %v737_v63  ;;  %vm1314_vm3 = vcmask 253952  }
  0x64   : > { %842 = vrot.lane.b32.xlu0 %v1879_v20, %s1694_s14  ;;  %v852_v30 = vsel %vm269_vm2, %v847_v24, %v851_v16  ;;  %v919_v20 = vshll.u32 %v1998_v25, 16 }
  0x66   : > { %651 = vrot.lane.b32.xlu1 %v650_v6, %s1693_s9  ;;  %v921_v50 = vrot.slane %v919_v20, 1 }
  0x68   : > { %728 = vrot.lane.b32.xlu0 %v727_v15, %s1692_s8 }
  0x6a   : > { %837 = vrot.lane.b32.xlu1 %v831_v44, %s1692_s8  ;;  %v741_v44 = vrot.slane %v2086_v42, 2  ;;  %v912_v42 = vshrl.u32 %v872_v3, 16 }
  0x6c   : > { %855 = vrot.lane.b32.xlu0 %v852_v30, %s1695_s11  ;;  %v743_v11 = vsel %vm302_vm1, %v741_v44, %v742_v5  ;;  %v917_v25 = vor.u32 %v916_v4, %v912_v42 }
  0x6e   : > { %656 = vrot.lane.b32.xlu1 %v655_v62, %s1692_s8  ;;  %v2194_v48 = vsel %vm269_vm2, %v917_v25, %v921_v50 }
  0x70   : > { %739 = vrot.lane.b32.xlu0 %v738_v61, %s1694_s14 }
  0x72   : > { %844 = vrot.lane.b32.xlu1 %v1934_v47, %s1694_s14 }
  0x74   : > { %862 = vrot.lane.b32.xlu0 %v861_v7, %s1696_s28 }
  0x76   : > { %663 = vrot.lane.b32.xlu1 %v1960_v57, %s1694_s14 }
  0x78   : > { %744 = vrot.lane.b32.xlu0 %v743_v11, %s1695_s11 }
  0x7a   : > { %857 = vrot.lane.b32.xlu1 %v853_v10, %s1695_s11 }
  0x7c   : > { %680 = vrot.lane.b32.xlu0 %v679_v18, %s1695_s11 }
  0x7e   : > { %751 = vrot.lane.b32.xlu1 %v1913_v38, %s1696_s28 }
  0x80   : > { %864 = vrot.lane.b32.xlu0 %v860_v45, %s1696_s28 }
  0x82   : > { %685 = vrot.lane.b32.xlu1 %v684_v0, %s1696_s28  ;;  %s1556_s28 = smul.u32 18, %s2322_s16 }
  0x84   : > { %s217_s13 = sadd.s32 %s1556_s28, %s1440_s12 }
  0x85   : > { %s1441_s22 = sshll.u32 %s217_s13, 2 }
  0x86   : > { %v357_v37 = vpop.permute.xlu0 %356  ;;  %s219_s23 = scalar_lea.vmem %s2310_s4, %s1441_s22 }
  0x88   : > { %v461_v47 = vpop.permute.xlu1 %460 }
  0x89   : > { %v533_v62 = vsel %vm403_vm4, %v1773_v1, %v461_v47 }
  0x8a   : > { %v466_v10 = vpop.permute.xlu0 %465 }
  0x8c   : > { %v468_v22 = vpop.permute.xlu1 %467 }
  0x8d   : > { %v537_v61 = vsel %vm406_vm6, %v533_v62, %v468_v22 }
  0x8e   : > { %v493_v51 = vpop.permute.xlu0 %492 }
  0x90   : > { %v350_v14 = vpop.permute.xlu1 %349 }
  0x91   : > { %v427_v28 = vsel %vm403_vm4, %v2062_v13, %v350_v14 }
  0x92   : > { %v459_v57 = vpop.permute.xlu0 %458  ;;  %v429_v40 = vsel %vm406_vm6, %v427_v28, %v357_v37 }
  0x93   : > { %v531_v35 = vsel %vm403_vm4, %v1776_v2, %v459_v57 }
  0x94   : > { %v289_v60 = vpop.permute.xlu1 %288  ;;  %v535_v15 = vsel %vm406_vm6, %v531_v35, %v466_v10 }
  0x96   : > { %v477_v58 = vpop.permute.xlu0 %476 }
  0x97   : > { %v539_v24 = vsel %vm409_vm5, %v535_v15, %v477_v58 }
  0x98   : > { %v283_v26 = vpop.permute.xlu1 %282  ;;  %v543_v29 = vsel %vm412_vm7, %v539_v24, %v493_v51 }
  0x99   : > { %v405_v5 = vsel %vm403_vm4, %v1811_v21, %v283_v26 }
  0x9a   : > { %v374_v31 = vpop.permute.xlu0 %373  ;;  %v408_v42 = vsel %vm406_vm6, %v405_v5, %v289_v60 }
  0x9b   : > { %v431_v63 = vsel %vm409_vm5, %v429_v40, %v374_v31 }
  0x9c   : > { %v479_v27 = vpop.permute.xlu1 %478 }
  0x9d   : > { %v541_v3 = vsel %vm409_vm5, %v537_v61, %v479_v27 }
  0x9e   : > { %v500_v32 = vpop.permute.xlu0 %499 }
  0x9f   : > { %v547_v2 = vsel %vm415_vm8, %v543_v29, %v500_v32 }
  0xa0   : > { %v301_v54 = vpop.permute.xlu1 %300 }
  0xa1   : > { %v411_v21 = vsel %vm409_vm5, %v408_v42, %v301_v54 }
  0xa2   : > { %v379_v23 = vpop.permute.xlu0 %378 }
  0xa3   : > { %v433_v13 = vsel %vm412_vm7, %v431_v63, %v379_v23 }
  0xa4   : > { %v495_v46 = vpop.permute.xlu1 %494 }
  0xa5   : > { %v545_v12 = vsel %vm412_vm7, %v541_v3, %v495_v46 }
  0xa6   : > { %v513_v53 = vpop.permute.xlu0 %512 }
  0xa7   : > { %v551_v33 = vsel %vm418_vm9, %v547_v2, %v513_v53 }
  0xa8   : > { %v307_v34 = vpop.permute.xlu1 %306 }
  0xa9   : > { %v414_v50 = vsel %vm412_vm7, %v411_v21, %v307_v34 }
  0xaa   : > { %v390_v36 = vpop.permute.xlu0 %389 }
  0xab   : > { %v435_v52 = vsel %vm415_vm8, %v433_v13, %v390_v36 }
  0xac   : > { %v502_v6 = vpop.permute.xlu1 %501 }
  0xad   : > { %v549_v17 = vsel %vm415_vm8, %v545_v12, %v502_v6 }
  0xae   : > { %v520_v49 = vpop.permute.xlu0 %519 }
  0xaf   : > { %v555_v30 = vsel %vm421_vm10, %v551_v33, %v520_v49 }
  0xb0   : > { %v314_v16 = vpop.permute.xlu1 %313  ;;  %v560_v45 = vshll.u32 %v555_v30, 16  ;;  %v558_v18 = vshrl.u32 %v555_v30, 16 }
  0xb1   : > { %v417_v39 = vsel %vm415_vm8, %v414_v50, %v314_v16 }
  0xb2   : > { %v395_v56 = vpop.permute.xlu0 %394  ;;  %v562_v4 = vrot.slane %v560_v45, 1 }
  0xb3   : > { %v437_v7 = vsel %vm418_vm9, %v435_v52, %v395_v56 }
  0xb4   : > { %v515_v59 = vpop.permute.xlu1 %514  ;;  %v563_v0 = vor.u32 %v562_v4, %v558_v18 }
  0xb5   : > { %v553_v11 = vsel %vm418_vm9, %v549_v17, %v515_v59 }
  0xb6   : > { %v331_v44 = vpop.permute.xlu0 %330 }
  0xb7   : > { %v420_v37 = vsel %vm418_vm9, %v417_v39, %v331_v44 }
  0xb8   : > { %v402_v20 = vpop.permute.xlu1 %401 }
  0xb9   : > { %v439_v1 = vsel %vm421_vm10, %v437_v7, %v402_v20 }
  0xba   : > { %1162 = vmatprep.mubr.bf16.mxu0 %v439_v1  ;;  %v522_v41 = vpop.permute.xlu0 %521 }
  0xbb   : > { %v557_v19 = vsel %vm421_vm10, %v553_v11, %v522_v41 }
  0xbc   : > { %v802_v25 = vpop.permute.xlu1 %801  ;;  %v564_v55 = vshll.u32 %v557_v19, 16 }
  0xbe   : > { %v566_v47 = vrot.slane %v564_v55, 1  ;;  %v336_v10 = vpop.permute.xlu0 %335 }
  0xbf   : > { %v423_v22 = vsel %vm421_vm10, %v420_v37, %v336_v10 }
  0xc0   : > { %v809_v51 = vpop.permute.xlu1 %808  ;;  %1163 = vmatmul.mubr.bf16.vlgmr.msra.gmra.mxu0 %v423_v22  ;;  %v567_v14 = vsel %vm269_vm2, %v563_v0, %v566_v47 }
  0xc1   : > { %1212 = vmatmul.mubr.bf16.vlgmr.msra.gmra.mxu1 %v567_v14 }
  0xc2   : > { %v700_v57 = vpop.permute.xlu0 %699  ;;  %1516 = vmatprep.mubr.msk.bf16.mxu1 %vm403_vm4, %v2194_v48  ;;  %v874_v48 = vsel %vm403_vm4, %v1913_v38, %v802_v25 }
  0xc3   : > { %v878_v16 = vsel %vm406_vm6, %v874_v48, %v809_v51  ;;  %v770_v40 = vsel %vm403_vm4, %v2092_v9, %v700_v57 }
  0xc4   : > { %v804_v60 = vpop.permute.xlu1 %803 }
  0xc5   : > { %v876_v61 = vsel %vm403_vm4, %v1924_v43, %v804_v60 }
  0xc6   : > { %v820_v58 = vpop.permute.xlu0 %819 }
  0xc7   : > { %v882_v29 = vsel %vm409_vm5, %v878_v16, %v820_v58 }
  0xc8   : > { %v636_v26 = vpop.permute.xlu1 %635 }
  0xc9   : > { %v754_v45 = vsel %vm403_vm4, %v1980_v8, %v636_v26  ;;  %vm1315_vm4 = vsmask.f32 256 }
  0xca   : > { %v707_v31 = vpop.permute.xlu0 %706 }
  0xcb   : > { %v772_v63 = vsel %vm406_vm6, %v770_v40, %v707_v31 }
  0xcc   : > { %v811_v27 = vpop.permute.xlu1 %810 }
  0xcd   : > { %v880_v9 = vsel %vm406_vm6, %v876_v61, %v811_v27 }
  0xce   : > { %v836_v32 = vpop.permute.xlu0 %835 }
  0xcf   : > { %v886_v33 = vsel %vm412_vm7, %v882_v29, %v836_v32 }
  0xd0   : > { %v641_v54 = vpop.permute.xlu1 %640 }
  0xd1   : > { %v756_v7 = vsel %vm406_vm6, %v754_v45, %v641_v54  ;;  %vm1316_vm6 = vmand %vm1314_vm3, %vm1315_vm4 }
  0xd2   : > { %v724_v23 = vpop.permute.xlu0 %723 }
  0xd3   : > { %v774_v13 = vsel %vm409_vm5, %v772_v63, %v724_v23  ;;  %v1517_v23 = vld [vmem:[%s2308_s2] ss:$0 sm:$0xff] }
  0xd4   : > { %v822_v46 = vpop.permute.xlu1 %821 }
  0xd5   : > { %v884_v20 = vsel %vm409_vm5, %v880_v9, %v822_v46 }
  0xd6   : > { %v843_v53 = vpop.permute.xlu0 %842 }
  0xd7   : > { %v890_v56 = vsel %vm415_vm8, %v886_v33, %v843_v53 }
  0xd8   : > { %v652_v34 = vpop.permute.xlu1 %651 }
  0xd9   : > { %v758_v43 = vsel %vm409_vm5, %v756_v7, %v652_v34  ;;  %vm1294_vm5 = vcmask 1042432  }
  0xda   : > { %v729_v35 = vpop.permute.xlu0 %728 }
  0xdb   : > { %v776_v52 = vsel %vm412_vm7, %v774_v13, %v729_v35  ;;  %v1518_v35 = vld [vmem:[%s2309_s3] ss:$0 sm:$0xff] }
  0xdc   : > { %v838_v36 = vpop.permute.xlu1 %837 }
  0xdd   : > { %v888_v17 = vsel %vm412_vm7, %v884_v20, %v838_v36 }
  0xde   : > { %v856_v6 = vpop.permute.xlu0 %855 }
  0xdf   : > { %v894_v30 = vsel %vm418_vm9, %v890_v56, %v856_v6 }
  0xe0   : > { %v657_v15 = vpop.permute.xlu1 %656 }
  0xe1   : > { %v760_v8 = vsel %vm412_vm7, %v758_v43, %v657_v15  ;;  %vm1296_vm7 = vcmask 1043456  }
  0xe2   : > { %v740_v24 = vpop.permute.xlu0 %739 }
  0xe3   : > { %v778_v44 = vsel %vm415_vm8, %v776_v52, %v740_v24 }
  0xe4   : > { %v845_v49 = vpop.permute.xlu1 %844 }
  0xe5   : > { %v892_v4 = vsel %vm415_vm8, %v888_v17, %v845_v49 }
  0xe6   : > { %v863_v28 = vpop.permute.xlu0 %862 }
  0xe7   : > { %v898_v38 = vsel %vm421_vm10, %v894_v30, %v863_v28 }
  0xe8   : > { %v664_v2 = vpop.permute.xlu1 %663  ;;  %v903_v5 = vshll.u32 %v898_v38, 16  ;;  %v901_v55 = vshrl.u32 %v898_v38, 16 }
  0xe9   : > { %v762_v41 = vsel %vm415_vm8, %v760_v8, %v664_v2  ;;  %vm1298_vm8 = vcmask 1044480  }
  0xea   : > { %v745_v59 = vpop.permute.xlu0 %744  ;;  %v905_v11 = vrot.slane %v903_v5, 1 }
  0xeb   : > { %v780_v12 = vsel %vm418_vm9, %v778_v44, %v745_v59 }
  0xec   : > { %v858_v62 = vpop.permute.xlu1 %857  ;;  %v906_v37 = vor.u32 %v905_v11, %v901_v55 }
  0xed   : > { %v896_v21 = vsel %vm418_vm9, %v892_v4, %v858_v62 }
  0xee   : > { %v681_v3 = vpop.permute.xlu0 %680 }
  0xef   : > { %v764_v25 = vsel %vm418_vm9, %v762_v41, %v681_v3  ;;  %vm1312_vm9 = vcmask 257024  }
  0xf0   : > { %v752_v1 = vpop.permute.xlu1 %751 }
  0xf1   : > { %v782_v42 = vsel %vm421_vm10, %v780_v12, %v752_v1 }
  0xf2   : > { %1170 = vmatprep.mubr.bf16.mxu0 %v782_v42  ;;  %v865_v19 = vpop.permute.xlu0 %864 }
  0xf3   : > { %v900_v50 = vsel %vm421_vm10, %v896_v21, %v865_v19  ;;  %v1317_v19 = vld [vmem:[%s219_s23 + $0x4] sm:$0x1] }
  0xf4   : > { %v686_v18 = vpop.permute.xlu1 %685  ;;  %v907_v39 = vshll.u32 %v900_v50, 16 }
  0xf5   : > { %v766_v0 = vsel %vm421_vm10, %v764_v25, %v686_v18 }
  0xf6   : > { %1171 = vmatmul.mubr.bf16.gmra.mxu0 %v766_v0  ;;  %v909_v47 = vrot.slane %v907_v39, 1 }
  0xf8   : > { %v910_v10 = vsel %vm269_vm2, %v906_v37, %v909_v47  ;;  %vm1292_vm2 = vcmask 1041408  }
  0xf9   : > { %1220 = vmatmul.mubr.bf16.gmra.mxu1 %v910_v10 }
 0x180   : > { %v1543_v60 = vpop.f32.mrf.mxu0 }
 0x181   : > { %v1213_v22 = vpop.f32.mrf.mxu1 }
 0x182   : > { %v1544_v58 = vpop.f32.mrf.mxu0 }
 0x183   : > { %v1215_v51 = vpop.f32.mrf.mxu1  ;;  %v1545_v31 = vadd.f32 %v1544_v58, %v1543_v60 }
 0x184   : > { %v1546_v26 = vpop.f32.mrf.mxu0 }
 0x185   : > { %v1216_v14 = vpop.f32.mrf.mxu1  ;;  %v1214_v32 = vadd.f32 %v1545_v31, %v1213_v22 }
 0x186   : > { %v1547_v27 = vpop.f32.mrf.mxu0 }
 0x187   : > { %v1218_v57 = vpop.f32.mrf.mxu1  ;;  %v1548_v54 = vadd.f32 %v1547_v27, %v1546_v26  ;;  %v1235_v53 = vmul.f32 %v1517_v23, %v1214_v32 }
 0x189   : > { %v1217_v34 = vadd.f32 %v1548_v54, %v1216_v14  ;;  %v1246_v49 = vadd.f32 %v1518_v35, %v1235_v53 }
 0x18b   : > { %v1236_v48 = vmul.f32 %v1517_v23, %v1217_v34  ;;  %v1254_v40 = vmul.f32 0.01, %v1246_v49  ;;  %vm1250_vm11 = vcmp.ge.f32.partialorder %v1246_v49, 0.0 }
 0x18d   : > { %v1247_v30 = vadd.f32 %v1518_v35, %v1236_v48  ;;  %v1258_v52 = vsel %vm1250_vm11, %v1246_v49, %v1254_v40 }
 0x18f   : > { %v1255_v61 = vmul.f32 0.01, %v1247_v30  ;;  %vm1251_vm13 = vcmp.ge.f32.partialorder %v1247_v30, 0.0 }
 0x191   : > { %v1259_v7 = vsel %vm1251_vm13, %v1247_v30, %v1255_v61 }
 0x1b6   : > { %v1549_v46 = vpop.f32.mrf.mxu0 }
 0x1b8   : > { %v1550_v36 = vpop.f32.mrf.mxu0 }
 0x1b9   : > { %v1551_v6 = vadd.f32 %v1550_v36, %v1549_v46  ;;  %v1221_v15 = vpop.f32.mrf.mxu1 }
 0x1ba   : > { %v1552_v24 = vpop.f32.mrf.mxu0 }
 0x1bb   : > { %v1222_v16 = vadd.f32 %v1551_v6, %v1221_v15  ;;  %v1223_v28 = vpop.f32.mrf.mxu1 }
 0x1bc   : > { %v1553_v29 = vpop.f32.mrf.mxu0 }
 0x1bd   : > { %v1237_v2 = vmul.f32 %v1517_v23, %v1222_v16  ;;  %v1554_v33 = vadd.f32 %v1553_v29, %v1552_v24  ;;  %v1224_v56 = vpop.f32.mrf.mxu1 }
 0x1bf   : > { %v1248_v59 = vadd.f32 %v1518_v35, %v1237_v2  ;;  %v1225_v63 = vadd.f32 %v1554_v33, %v1224_v56  ;;  %v1226_v38 = vpop.f32.mrf.mxu1 }
 0x1c1   : > { %vm1252_vm12 = vcmp.ge.f32.partialorder %v1248_v59, 0.0  ;;  %v1256_v62 = vmul.f32 0.01, %v1248_v59  ;;  %v1238_v13 = vmul.f32 %v1517_v23, %v1225_v63 }
 0x1c3   : > { %v1260_v45 = vsel %vm1252_vm12, %v1248_v59, %v1256_v62  ;;  %v1249_v9 = vadd.f32 %v1518_v35, %v1238_v13 }
 0x1c4   : > { %v1262_v44 = vmax.f32 %v1258_v52, %v1260_v45 }
 0x1c5   : > { %vm1253_vm14 = vcmp.ge.f32.partialorder %v1249_v9, 0.0  ;;  %v1257_v5 = vmul.f32 0.01, %v1249_v9 }
 0x1c6   : > { %v1265_v3 = vrot.slane %v1262_v44, 1 }
 0x1c7   : > { %v1261_v20 = vsel %vm1253_vm14, %v1249_v9, %v1257_v5 }
 0x1c8   : > { %v1267_v12 = vmax.f32 %v1262_v44, %v1265_v3  ;;  %v1263_v1 = vmax.f32 %v1259_v7, %v1261_v20 }
 0x1ca   : > { %v1274_v43 = vrot.slane %v1267_v12, 1  ;;  %v1291_v17 = vsel %vm1290_vm15, %v1262_v44, %v1267_v12  ;;  %v1269_v42 = vrot.slane %v1263_v1, 1  ;;  %v1276_v8 = vrot.slane %v1267_v12, 2 }
 0x1cb   : > { %v1288_v4 = vrot.slane %v1263_v1, 7 }
 0x1cc   : > { %v1293_v11 = vsel %vm1292_vm2, %v1291_v17, %v1274_v43  ;;  %v1271_v41 = vmax.f32 %v1262_v44, %v1269_v42  ;;  %v1272_v21 = vmax.f32 %v1263_v1, %v1269_v42 }
 0x1cd   : > { %v1526_v25 = vpack.c.bf16 %v1288_v4, %v1288_v4  ;;  %v1295_v55 = vsel %vm1294_vm5, %v1293_v11, %v1276_v8 }
 0x1ce   : > { %v1279_v50 = vrot.slane %v1271_v41, 3  ;;  %v1282_v18 = vrot.slane %v1272_v21, 4  ;;  %v1284_v0 = vrot.slane %v1272_v21, 5  ;;  %v1286_v47 = vrot.slane %v1272_v21, 6 }
 0x1cf   : > { %v1318_v39 = vsel %vm1316_vm6, %v1526_v25, %v1317_v19 }
 0x1d0   : > { %v1297_v37 = vsel %vm1296_vm7, %v1295_v55, %v1279_v50  ;;  %1319 = vst [vmem:[%s219_s23 + $0x4] sm:$0x1] %v1318_v39 }
 0x1d1   : > { %v1299_v10 = vsel %vm1298_vm8, %v1297_v37, %v1282_v18 }
 0x1d2   : > { %v1301_v22 = vsel %vm302_vm1, %v1299_v10, %v1284_v0 }
 0x1d3   : > { %v1303_v51 = vsel %vm284_vm0, %v1301_v22, %v1286_v47 }
 0x1d4   : > { %v1525_v14 = vpack.c.bf16 %v1303_v51, %v1303_v51 }
 0x1d6   : > { %1313 = vst.msk [vmem:[%s219_s23] sm:$0xf] %vm1312_vm9, %v1525_v14 }
 0x1d7 PF: > { %s14_s19 = sadd.s32 1, %s1688_s19   ;;  %s2311_s15 = smov %s1680_s17 }
 0x1d8   : > { %p11_p9 = scmp.ge.s32.totalorder %s14_s19, 20   ;;  %s2312_s16 = smov %s1684_s18 }
 0x1d9   : > { %s2313_s17 = smov %s2316_s20  ;;  %s2314_s18 = smov %s2320_s21 }
 0x1da   :  { %13 = sbr.rel (!%p11_p9) target bundleno = 3 (0x3), region = 76 }

// kernel: patch_embed_forward.7
= control target key start
LH: loop header
LB: loop body
LE: loop exit
PB: predicated region body
PF: predicated region fallthrough
CT: control target
= control target key end

     0   :  { %vm112_vm0 = vcmask 523264   ;;  %vm328_vm1 = vcmask 261120   ;;  %s1119_s1 = inlined_call_operand.vmem [shape: bf16[64,32], index: 1, kind: input, shape index: {}]   ;;  %s1120_s0 = inlined_call_operand.vmem [shape: bf16[128,64], index: 0, kind: input, shape index: {}]   ;;  %s1121_s2 = inlined_call_operand.vmem [shape: f32[1,32], index: 2, kind: input, shape index: {}]   ;;  %s1122_s3 = inlined_call_operand.vmem [shape: f32[1,32], index: 3, kind: input, shape index: {}]   ;;  %s1123_s4 = inlined_call_operand.vmem [shape: f32[1,32], index: 4, kind: input, shape index: {}]   ;;  %s1124_s5 = inlined_call_operand.vmem [shape: f32[1,32], index: 5, kind: input, shape index: {}]   ;;  %s1125_s6 = inlined_call_operand.vmem [shape: f32[128,32], index: 6, kind: output, shape index: {}]  }
   0x1   :  { %v672_v0 = vld [vmem:[%s1119_s1 + $0x18] sm:$0xff]   ;;  %v673_v1 = vld [vmem:[%s1119_s1 + $0x10] sm:$0xff]   ;;  %v674_v2 = vld [vmem:[%s1119_s1 + $0x8] sm:$0xff]  }
   0x2   :  { %640 = vmatprep.subr.bf16.mxu0 %v672_v0  ;;  %664 = vmatprep.subr.bf16.mxu1 %v672_v0  ;;  %v676_v3 = vld [vmem:[%s1120_s0] sm:$0xff]   ;;  %v678_v6 = vld [vmem:[%s1120_s0 + $0x8] sm:$0xff]   ;;  %v680_v8 = vld [vmem:[%s1120_s0 + $0x10] sm:$0xff]  }
   0x3   :  { %641 = vmatpush3.bf16.msra.mxu0 %v672_v0  ;;  %668 = vmatpush3.bf16.msra.mxu1 %v672_v0  ;;  %v677_v4 = vld [vmem:[%s1120_s0 + $0x20] sm:$0xff]   ;;  %v679_v7 = vld [vmem:[%s1120_s0 + $0x28] sm:$0xff]   ;;  %v682_v9 = vld [vmem:[%s1120_s0 + $0x30] sm:$0xff]  }
   0x4   :  { %642 = vmatprep.subr.bf16.mxu0 %v673_v1  ;;  %665 = vmatprep.subr.bf16.mxu1 %v673_v1  ;;  %v675_v5 = vld [vmem:[%s1119_s1] sm:$0xff]   ;;  %v681_v10 = vld [vmem:[%s1120_s0 + $0x18] sm:$0xff]  }
   0x5   :  { %648 = vmatprep.mubr.msk.bf16.mxu0 %vm112_vm0, %v676_v3  ;;  %656 = vmatprep.mubr.msk.bf16.mxu1 %vm112_vm0, %v677_v4  ;;  %v683_v11 = vld [vmem:[%s1120_s0 + $0x38] sm:$0xff]   ;;  %v798_v12 = vld [vmem:[%s1121_s2] ss:$0 sm:$0xff] }
   0x6   :  { %v803_v14 = vld [vmem:[%s1122_s3] ss:$0 sm:$0xff] }
   0x7   :  { %643 = vmatpush3.bf16.msra.mxu0 %v673_v1  ;;  %669 = vmatpush3.bf16.msra.mxu1 %v673_v1 }
   0x8   :  { %644 = vmatprep.subr.bf16.mxu0 %v674_v2  ;;  %666 = vmatprep.subr.bf16.mxu1 %v674_v2 }
   0xb   :  { %645 = vmatpush3.bf16.msra.mxu0 %v674_v2  ;;  %670 = vmatpush3.bf16.msra.mxu1 %v674_v2 }
   0xc   :  { %646 = vmatprep.subr.bf16.mxu0 %v675_v5  ;;  %667 = vmatprep.subr.bf16.mxu1 %v675_v5 }
   0xf   :  { %647 = vmatpush3.bf16.msra.mxu0 %v675_v5  ;;  %671 = vmatpush3.bf16.msra.mxu1 %v675_v5 }
  0x12   :  { %649 = vmatmul.mubr.msk.bf16.vlgmr.msra.gmra.mxu0 %vm112_vm0, %v678_v6  ;;  %657 = vmatmul.mubr.msk.bf16.vlgmr.msra.gmra.mxu1 %vm112_vm0, %v679_v7 }
  0x13   :  { %652 = vmatprep.mubr.msk.bf16.mxu0 %vm112_vm0, %v680_v8  ;;  %660 = vmatprep.mubr.msk.bf16.mxu1 %vm112_vm0, %v682_v9 }
  0x1a   :  { %653 = vmatmul.mubr.msk.bf16.gmra.mxu0 %vm112_vm0, %v681_v10  ;;  %661 = vmatmul.mubr.msk.bf16.gmra.mxu1 %vm112_vm0, %v683_v11 }
  0xd2   :  { %v650_v13 = vpop.f32.mrf.mxu0  ;;  %v658_v15 = vpop.f32.mrf.mxu1 }
  0xd3   :  { %v243_v16 = vmul.f32 %v650_v13, %v798_v12  ;;  %v251_v17 = vmul.f32 %v658_v15, %v798_v12 }
  0xd4   :  { %v171_v18 = vpop.f32.mrf.mxu0  ;;  %v203_v19 = vpop.f32.mrf.mxu1 }
  0xd5   :  { %v266_v20 = vadd.f32 %v803_v14, %v243_v16  ;;  %v274_v21 = vadd.f32 %v803_v14, %v251_v17  ;;  %v241_v22 = vmul.f32 %v798_v12, %v171_v18  ;;  %v249_v23 = vmul.f32 %v798_v12, %v203_v19 }
  0xd6   :  { %v651_v24 = vpop.f32.mrf.mxu0  ;;  %v659_v25 = vpop.f32.mrf.mxu1 }
  0xd7   :  { %v264_v26 = vadd.f32 %v803_v14, %v241_v22  ;;  %v244_v27 = vmul.f32 %v651_v24, %v798_v12  ;;  %v252_v28 = vmul.f32 %v659_v25, %v798_v12  ;;  %vm290_vm2 = vcmp.ge.f32.partialorder %v274_v21, 0.0 }
  0xd8   :  { %v174_v29 = vpop.f32.mrf.mxu0  ;;  %v206_v30 = vpop.f32.mrf.mxu1  ;;  %v306_v31 = vmul.f32 0.01, %v274_v21  ;;  %vm282_vm3 = vcmp.ge.f32.partialorder %v266_v20, 0.0  ;;  %v298_v32 = vmul.f32 0.01, %v266_v20  ;;  %v272_v33 = vadd.f32 %v803_v14, %v249_v23 }
  0xd9   :  { %v267_v34 = vadd.f32 %v803_v14, %v244_v27  ;;  %v242_v35 = vmul.f32 %v798_v12, %v174_v29  ;;  %v250_v36 = vmul.f32 %v798_v12, %v206_v30  ;;  %vm280_vm4 = vcmp.ge.f32.partialorder %v264_v26, 0.0 }
  0xda   :  { %v654_v37 = vpop.f32.mrf.mxu0  ;;  %v818_v38 = vsel %vm290_vm2, %v274_v21, %v306_v31  ;;  %v820_v39 = vsel %vm282_vm3, %v266_v20, %v298_v32  ;;  %v296_v40 = vmul.f32 0.01, %v264_v26  ;;  %v662_v41 = vpop.f32.mrf.mxu1  ;;  %v275_v42 = vadd.f32 %v803_v14, %v252_v28 }
  0xdb   :  { %v359_v43 = vsel %vm328_vm1, %v818_v38, 0.0  ;;  %v335_v44 = vsel %vm328_vm1, %v820_v39, 0.0  ;;  %vm283_vm5 = vcmp.ge.f32.partialorder %v267_v34, 0.0  ;;  %v299_v47 = vmul.f32 0.01, %v267_v34 }
  0xdc   :  { %360 = vadd.xlane.f32.xlu0 %v359_v43  ;;  %v187_v45 = vpop.f32.mrf.mxu0  ;;  %v827_v46 = vsel %vm280_vm4, %v264_v26, %v296_v40  ;;  %v219_v48 = vpop.f32.mrf.mxu1  ;;  %v265_v49 = vadd.f32 %v803_v14, %v242_v35  ;;  %v247_v50 = vmul.f32 %v654_v37, %v798_v12  ;;  %336 = vadd.xlane.f32.xlu1 %v335_v44  ;;  %vm288_vm6 = vcmp.ge.f32.partialorder %v272_v33, 0.0 }
  0xdd   :  { %v273_v51 = vadd.f32 %v803_v14, %v250_v36  ;;  %v832_v53 = vsel %vm283_vm5, %v267_v34, %v299_v47  ;;  %v304_v54 = vmul.f32 0.01, %v272_v33  ;;  %v245_v56 = vmul.f32 %v798_v12, %v187_v45 }
  0xde   :  { %v655_v52 = vpop.f32.mrf.mxu0  ;;  %v663_v55 = vpop.f32.mrf.mxu1  ;;  %v329_v58 = vsel %vm328_vm1, %v827_v46, 0.0  ;;  %v338_v59 = vsel %vm328_vm1, %v832_v53, 0.0  ;;  %vm291_vm7 = vcmp.ge.f32.partialorder %v275_v42, 0.0  ;;  %v307_v62 = vmul.f32 0.01, %v275_v42 }
  0xdf   :  { %v248_v57 = vmul.f32 %v655_v52, %v798_v12  ;;  %v840_v61 = vsel %vm288_vm6, %v272_v33, %v304_v54  ;;  %v270_v63 = vadd.f32 %v803_v14, %v247_v50  ;;  %vm289_vm8 = vcmp.ge.f32.partialorder %v273_v51, 0.0 }
  0xe0   :  { %330 = vadd.xlane.f32.xlu0 %v329_v58  ;;  %v190_v60 = vpop.f32.mrf.mxu0  ;;  %339 = vadd.xlane.f32.xlu1 %v338_v59  ;;  %v222_v2 = vpop.f32.mrf.mxu1  ;;  %v845_v3 = vsel %vm291_vm7, %v275_v42, %v307_v62  ;;  %v305_v4 = vmul.f32 0.01, %v273_v51  ;;  %v268_v5 = vadd.f32 %v803_v14, %v245_v56  ;;  %v253_v6 = vmul.f32 %v798_v12, %v219_v48 }
  0xe1   :  { %v271_v0 = vadd.f32 %v803_v14, %v248_v57  ;;  %v246_v1 = vmul.f32 %v798_v12, %v190_v60  ;;  %v353_v7 = vsel %vm328_vm1, %v840_v61, 0.0  ;;  %vm281_vm9 = vcmp.ge.f32.partialorder %v265_v49, 0.0 }
  0xe2   :  { %v362_v9 = vsel %vm328_vm1, %v845_v3, 0.0  ;;  %v254_v10 = vmul.f32 %v798_v12, %v222_v2  ;;  %v297_v11 = vmul.f32 0.01, %v265_v49  ;;  %v855_v13 = vsel %vm289_vm8, %v273_v51, %v305_v4 }
  0xe3   :  { %v269_v8 = vadd.f32 %v803_v14, %v246_v1  ;;  %vm286_vm10 = vcmp.ge.f32.partialorder %v270_v63, 0.0  ;;  %v302_v15 = vmul.f32 0.01, %v270_v63  ;;  %v303_v16 = vmul.f32 0.01, %v271_v0 }
  0xe4   :  { %354 = vadd.xlane.f32.xlu0 %v353_v7  ;;  %363 = vadd.xlane.f32.xlu1 %v362_v9  ;;  %v857_v17 = vsel %vm281_vm9, %v265_v49, %v297_v11  ;;  %vm287_vm11 = vcmp.ge.f32.partialorder %v271_v0, 0.0  ;;  %v255_v18 = vmul.f32 %v662_v41, %v798_v12  ;;  %v276_v19 = vadd.f32 %v803_v14, %v253_v6 }
  0xe5   :  { %v332_v20 = vsel %vm328_vm1, %v857_v17, 0.0  ;;  %v256_v21 = vmul.f32 %v663_v55, %v798_v12  ;;  %v356_v22 = vsel %vm328_vm1, %v855_v13, 0.0  ;;  %v866_v23 = vsel %vm286_vm10, %v270_v63, %v302_v15 }
  0xe6   :  { %v300_v24 = vmul.f32 0.01, %v268_v5  ;;  %v277_v25 = vadd.f32 %v803_v14, %v254_v10  ;;  %v869_v26 = vsel %vm287_vm11, %v271_v0, %v303_v16  ;;  %vm284_vm12 = vcmp.ge.f32.partialorder %v268_v5, 0.0 }
  0xe7   :  { %v301_v27 = vmul.f32 0.01, %v269_v8  ;;  %vm285_vm13 = vcmp.ge.f32.partialorder %v269_v8, 0.0  ;;  %v347_v28 = vsel %vm328_vm1, %v866_v23, 0.0  ;;  %v278_v12 = vadd.f32 %v803_v14, %v255_v18 }
  0xe8   :  { %333 = vadd.xlane.f32.xlu0 %v332_v20  ;;  %357 = vadd.xlane.f32.xlu1 %v356_v22  ;;  %v350_v29 = vsel %vm328_vm1, %v869_v26, 0.0  ;;  %v876_v30 = vsel %vm284_vm12, %v268_v5, %v300_v24  ;;  %v308_v31 = vmul.f32 0.01, %v276_v19  ;;  %v279_v32 = vadd.f32 %v803_v14, %v256_v21 }
  0xe9   :  { %v879_v33 = vsel %vm285_vm13, %v269_v8, %v301_v27  ;;  %vm292_vm14 = vcmp.ge.f32.partialorder %v276_v19, 0.0  ;;  %v309_v34 = vmul.f32 0.01, %v277_v25  ;;  %vm293_vm15 = vcmp.ge.f32.partialorder %v277_v25, 0.0 }
  0xea   :  { %v341_v35 = vsel %vm328_vm1, %v876_v30, 0.0  ;;  %v344_v36 = vsel %vm328_vm1, %v879_v33, 0.0  ;;  %v885_v37 = vsel %vm292_vm14, %v276_v19, %v308_v31  ;;  %v310_v40 = vmul.f32 0.01, %v278_v12 }
  0xeb   :  { %v887_v41 = vsel %vm293_vm15, %v277_v25, %v309_v34  ;;  %vm294_vm0 = vcmp.ge.f32.partialorder %v278_v12, 0.0  ;;  %v311_v14 = vmul.f32 0.01, %v279_v32  ;;  %vm295_vm2 = vcmp.ge.f32.partialorder %v279_v32, 0.0 }
  0xec   :  { %348 = vadd.xlane.f32.xlu0 %v347_v28  ;;  %351 = vadd.xlane.f32.xlu1 %v350_v29  ;;  %v365_v42 = vsel %vm328_vm1, %v885_v37, 0.0  ;;  %v368_v43 = vsel %vm328_vm1, %v887_v41, 0.0  ;;  %v893_v44 = vsel %vm294_vm0, %v278_v12, %v310_v40 }
  0xed   :  { %v895_v45 = vsel %vm295_vm2, %v279_v32, %v311_v14  ;;  %v371_v47 = vsel %vm328_vm1, %v893_v44, 0.0 }
  0xee   :  { %v374_v48 = vsel %vm328_vm1, %v895_v45, 0.0 }
  0xf0   :  { %342 = vadd.xlane.f32.xlu0 %v341_v35  ;;  %345 = vadd.xlane.f32.xlu1 %v344_v36 }
  0xf4   :  { %366 = vadd.xlane.f32.xlu0 %v365_v42  ;;  %369 = vadd.xlane.f32.xlu1 %v368_v43 }
  0xf8   :  { %372 = vadd.xlane.f32.xlu0 %v371_v47  ;;  %375 = vadd.xlane.f32.xlu1 %v374_v48 }
 0x165   :  { %v361_v49 = vpop.xlane.xlu0 %360  ;;  %v337_v51 = vpop.xlane.xlu1 %336 }
 0x166   :  { %v388_v50 = vmul.f32 0.03125, %v361_v49  ;;  %v380_v52 = vmul.f32 0.03125, %v337_v51 }
 0x168   :  { %v902_v54 = vsub.f32 %v818_v38, %v388_v50  ;;  %v905_v55 = vsub.f32 %v820_v39, %v380_v52 }
 0x169   :  { %v331_v56 = vpop.xlane.xlu0 %330  ;;  %v340_v58 = vpop.xlane.xlu1 %339 }
 0x16a   :  { %v378_v57 = vmul.f32 0.03125, %v331_v56  ;;  %v381_v59 = vmul.f32 0.03125, %v340_v58  ;;  %v412_v60 = vmul.f32 %v905_v55, %v905_v55  ;;  %v420_v62 = vmul.f32 %v902_v54, %v902_v54 }
 0x16c   :  { %v912_v63 = vsub.f32 %v827_v46, %v378_v57  ;;  %v915_v0 = vsub.f32 %v832_v53, %v381_v59  ;;  %v432_v39 = vsel %vm328_vm1, %v412_v60, 0.0  ;;  %v456_v6 = vsel %vm328_vm1, %v420_v62, 0.0 }
 0x16d   :  { %v355_v38 = vpop.xlane.xlu0 %354  ;;  %v364_v2 = vpop.xlane.xlu1 %363  ;;  %433 = vadd.xlane.f32.xlu0 %v432_v39 }
 0x16e   :  { %v386_v1 = vmul.f32 0.03125, %v355_v38  ;;  %v389_v4 = vmul.f32 0.03125, %v364_v2  ;;  %v413_v5 = vmul.f32 %v915_v0, %v915_v0  ;;  %v410_v9 = vmul.f32 %v912_v63, %v912_v63 }
 0x170   :  { %v922_v7 = vsub.f32 %v840_v61, %v386_v1  ;;  %v925_v46 = vsub.f32 %v845_v3, %v389_v4  ;;  %v435_v8 = vsel %vm328_vm1, %v413_v5, 0.0  ;;  %v426_v19 = vsel %vm328_vm1, %v410_v9, 0.0 }
 0x171   :  { %v334_v53 = vpop.xlane.xlu0 %333  ;;  %v358_v10 = vpop.xlane.xlu1 %357  ;;  %457 = vadd.xlane.f32.xlu0 %v456_v6  ;;  %436 = vadd.xlane.f32.xlu1 %v435_v8 }
 0x172   :  { %v379_v11 = vmul.f32 0.03125, %v334_v53  ;;  %v387_v15 = vmul.f32 0.03125, %v358_v10  ;;  %v421_v16 = vmul.f32 %v925_v46, %v925_v46  ;;  %v418_v21 = vmul.f32 %v922_v7, %v922_v7 }
 0x174   :  { %v933_v61 = vsub.f32 %v857_v17, %v379_v11  ;;  %v936_v3 = vsub.f32 %v855_v13, %v387_v15  ;;  %v459_v20 = vsel %vm328_vm1, %v421_v16, 0.0  ;;  %v450_v12 = vsel %vm328_vm1, %v418_v21, 0.0 }
 0x175   :  { %v349_v18 = vpop.xlane.xlu0 %348  ;;  %427 = vadd.xlane.f32.xlu0 %v426_v19  ;;  %v352_v24 = vpop.xlane.xlu1 %351  ;;  %460 = vadd.xlane.f32.xlu1 %v459_v20 }
 0x176   :  { %v384_v22 = vmul.f32 0.03125, %v349_v18  ;;  %v411_v25 = vmul.f32 %v933_v61, %v933_v61  ;;  %v385_v17 = vmul.f32 0.03125, %v352_v24  ;;  %v419_v31 = vmul.f32 %v936_v3, %v936_v3 }
 0x178   :  { %v945_v27 = vsub.f32 %v866_v23, %v384_v22  ;;  %v429_v13 = vsel %vm328_vm1, %v411_v25, 0.0  ;;  %v949_v28 = vsub.f32 %v869_v26, %v385_v17  ;;  %v453_v42 = vsel %vm328_vm1, %v419_v31, 0.0 }
 0x179   :  { %v343_v29 = vpop.xlane.xlu0 %342  ;;  %451 = vadd.xlane.f32.xlu0 %v450_v12  ;;  %430 = vadd.xlane.f32.xlu1 %v429_v13  ;;  %v346_v34 = vpop.xlane.xlu1 %345 }
 0x17a   :  { %v382_v32 = vmul.f32 0.03125, %v343_v29  ;;  %v416_v35 = vmul.f32 %v945_v27, %v945_v27  ;;  %v383_v23 = vmul.f32 0.03125, %v346_v34  ;;  %v417_v43 = vmul.f32 %v949_v28, %v949_v28 }
 0x17c   :  { %v957_v36 = vsub.f32 %v876_v30, %v382_v32  ;;  %v444_v26 = vsel %vm328_vm1, %v416_v35, 0.0  ;;  %v961_v40 = vsub.f32 %v879_v33, %v383_v23  ;;  %v447_v56 = vsel %vm328_vm1, %v417_v43, 0.0 }
 0x17d   :  { %v367_v14 = vpop.xlane.xlu0 %366  ;;  %445 = vadd.xlane.f32.xlu0 %v444_v26  ;;  %454 = vadd.xlane.f32.xlu1 %v453_v42  ;;  %v370_v48 = vpop.xlane.xlu1 %369  ;;  %v1000_v42 = vld [vmem:[%s1123_s4] ss:$0 sm:$0xff] }
 0x17e   :  { %v390_v47 = vmul.f32 0.03125, %v367_v14  ;;  %v414_v49 = vmul.f32 %v957_v36, %v957_v36  ;;  %v391_v30 = vmul.f32 0.03125, %v370_v48  ;;  %v415_v57 = vmul.f32 %v961_v40, %v961_v40 }
 0x180   :  { %v969_v50 = vsub.f32 %v885_v37, %v390_v47  ;;  %v438_v33 = vsel %vm328_vm1, %v414_v49, 0.0  ;;  %v973_v51 = vsub.f32 %v887_v41, %v391_v30  ;;  %v441_v39 = vsel %vm328_vm1, %v415_v57, 0.0  ;;  %v1006_v49 = vld [vmem:[%s1124_s5] ss:$0 sm:$0xff] }
 0x181   :  { %v373_v52 = vpop.xlane.xlu0 %372  ;;  %439 = vadd.xlane.f32.xlu0 %v438_v33  ;;  %448 = vadd.xlane.f32.xlu1 %v447_v56  ;;  %v376_v59 = vpop.xlane.xlu1 %375 }
 0x182   :  { %v392_v58 = vmul.f32 0.03125, %v373_v52  ;;  %v422_v60 = vmul.f32 %v969_v50, %v969_v50  ;;  %v393_v37 = vmul.f32 0.03125, %v376_v59  ;;  %v423_v1 = vmul.f32 %v973_v51, %v973_v51 }
 0x184   :  { %v981_v62 = vsub.f32 %v893_v44, %v392_v58  ;;  %v462_v41 = vsel %vm328_vm1, %v422_v60, 0.0  ;;  %v985_v38 = vsub.f32 %v895_v45, %v393_v37  ;;  %v465_v44 = vsel %vm328_vm1, %v423_v1, 0.0 }
 0x185   :  { %463 = vadd.xlane.f32.xlu0 %v462_v41  ;;  %442 = vadd.xlane.f32.xlu1 %v441_v39 }
 0x186   :  { %v424_v2 = vmul.f32 %v981_v62, %v981_v62  ;;  %v425_v5 = vmul.f32 %v985_v38, %v985_v38 }
 0x188   :  { %v468_v4 = vsel %vm328_vm1, %v424_v2, 0.0  ;;  %v471_v45 = vsel %vm328_vm1, %v425_v5, 0.0 }
 0x189   :  { %469 = vadd.xlane.f32.xlu0 %v468_v4  ;;  %466 = vadd.xlane.f32.xlu1 %v465_v44 }
 0x18d   :  { %472 = vadd.xlane.f32.xlu1 %v471_v45 }
 0x1f6   :  { %v434_v6 = vpop.xlane.xlu0 %433 }
 0x1f7   :  { %v476_v53 = vmul.f32 0.03125, %v434_v6 }
 0x1f9   :  { %v492_v8 = vadd.f32 1e-05, %v476_v53 }
 0x1fa   :  { %v458_v9 = vpop.xlane.xlu0 %457  ;;  %v437_v10 = vpop.xlane.xlu1 %436 }
 0x1fb   :  { %684 = vrsqrt.f32 %v492_v8  ;;  %v484_v11 = vmul.f32 0.03125, %v458_v9  ;;  %v477_v15 = vmul.f32 0.03125, %v437_v10 }
 0x1fd   :  { %v500_v16 = vadd.f32 1e-05, %v484_v11  ;;  %v493_v18 = vadd.f32 1e-05, %v477_v15 }
 0x1fe   :  { %v428_v19 = vpop.xlane.xlu0 %427  ;;  %v461_v20 = vpop.xlane.xlu1 %460 }
 0x1ff   :  { %686 = vrsqrt.f32 %v500_v16  ;;  %v474_v21 = vmul.f32 0.03125, %v428_v19  ;;  %v485_v22 = vmul.f32 0.03125, %v461_v20 }
 0x200   :  { %688 = vrsqrt.f32 %v493_v18 }
 0x201   :  { %v490_v24 = vadd.f32 1e-05, %v474_v21  ;;  %v501_v25 = vadd.f32 1e-05, %v485_v22 }
 0x202   :  { %v452_v17 = vpop.xlane.xlu0 %451  ;;  %v431_v13 = vpop.xlane.xlu1 %430 }
 0x203   :  { %690 = vrsqrt.f32 %v490_v24  ;;  %v482_v12 = vmul.f32 0.03125, %v452_v17  ;;  %v475_v29 = vmul.f32 0.03125, %v431_v13 }
 0x204   :  { %692 = vrsqrt.f32 %v501_v25 }
 0x205   :  { %v498_v31 = vadd.f32 1e-05, %v482_v12  ;;  %v491_v32 = vadd.f32 1e-05, %v475_v29 }
 0x206   :  { %v446_v34 = vpop.xlane.xlu0 %445  ;;  %v455_v35 = vpop.xlane.xlu1 %454 }
 0x207   :  { %694 = vrsqrt.f32 %v498_v31  ;;  %v480_v23 = vmul.f32 0.03125, %v446_v34  ;;  %v483_v26 = vmul.f32 0.03125, %v455_v35 }
 0x208   :  { %v685_v14 = vpop.eup %684  ;;  %696 = vrsqrt.f32 %v491_v32 }
 0x209   :  { %v524_v43 = vmul.f32 %v685_v14, %v905_v55  ;;  %v496_v47 = vadd.f32 1e-05, %v480_v23  ;;  %v499_v48 = vadd.f32 1e-05, %v483_v26 }
 0x20a   :  { %v440_v30 = vpop.xlane.xlu0 %439  ;;  %v449_v33 = vpop.xlane.xlu1 %448 }
 0x20b   :  { %v547_v52 = vmul.f32 %v1000_v42, %v524_v43  ;;  %698 = vrsqrt.f32 %v496_v47  ;;  %v478_v56 = vmul.f32 0.03125, %v440_v30  ;;  %v481_v57 = vmul.f32 0.03125, %v449_v33 }
 0x20c   :  { %v687_v58 = vpop.eup %686  ;;  %700 = vrsqrt.f32 %v499_v48 }
 0x20d   :  { %v689_v59 = vpop.eup %688  ;;  %v570_v60 = vadd.f32 %v1006_v49, %v547_v52  ;;  %v532_v55 = vmul.f32 %v687_v58, %v902_v54  ;;  %v494_v37 = vadd.f32 1e-05, %v478_v56  ;;  %v497_v41 = vadd.f32 1e-05, %v481_v57 }
 0x20e   :  { %v525_v39 = vmul.f32 %v689_v59, %v915_v0  ;;  %v464_v1 = vpop.xlane.xlu0 %463  ;;  %v443_v2 = vpop.xlane.xlu1 %442 }
 0x20f   :  { %586 = vst.msk [vmem:[%s1125_s6 + $0x10] sm:$0xff] %vm328_vm1, %v570_v60  ;;  %v555_v4 = vmul.f32 %v1000_v42, %v532_v55  ;;  %702 = vrsqrt.f32 %v494_v37  ;;  %v486_v44 = vmul.f32 0.03125, %v464_v1  ;;  %v479_v5 = vmul.f32 0.03125, %v443_v2 }
 0x210   :  { %v691_v45 = vpop.eup %690  ;;  %v548_v6 = vmul.f32 %v1000_v42, %v525_v39  ;;  %704 = vrsqrt.f32 %v497_v41 }
 0x211   :  { %v693_v54 = vpop.eup %692  ;;  %v578_v53 = vadd.f32 %v1006_v49, %v555_v4  ;;  %v522_v0 = vmul.f32 %v691_v45, %v912_v63  ;;  %v502_v8 = vadd.f32 1e-05, %v486_v44  ;;  %v495_v9 = vadd.f32 1e-05, %v479_v5 }
 0x212   :  { %v571_v10 = vadd.f32 %v1006_v49, %v548_v6  ;;  %v533_v11 = vmul.f32 %v693_v54, %v925_v46  ;;  %v470_v15 = vpop.xlane.xlu0 %469  ;;  %v467_v16 = vpop.xlane.xlu1 %466 }
 0x213   :  { %594 = vst.msk [vmem:[%s1125_s6 + $0x50] sm:$0xff] %vm328_vm1, %v578_v53  ;;  %v545_v18 = vmul.f32 %v1000_v42, %v522_v0  ;;  %706 = vrsqrt.f32 %v502_v8  ;;  %v488_v19 = vmul.f32 0.03125, %v470_v15  ;;  %v487_v20 = vmul.f32 0.03125, %v467_v16 }
 0x214   :  { %v695_v21 = vpop.eup %694  ;;  %587 = vst.msk [vmem:[%s1125_s6 + $0x18] sm:$0xff] %vm328_vm1, %v571_v10  ;;  %v556_v63 = vmul.f32 %v1000_v42, %v533_v11  ;;  %708 = vrsqrt.f32 %v495_v9 }
 0x215   :  { %v697_v46 = vpop.eup %696  ;;  %v568_v22 = vadd.f32 %v1006_v49, %v545_v18  ;;  %v530_v24 = vmul.f32 %v695_v21, %v922_v7  ;;  %v504_v25 = vadd.f32 1e-05, %v488_v19  ;;  %v503_v17 = vadd.f32 1e-05, %v487_v20 }
 0x216   :  { %v579_v13 = vadd.f32 %v1006_v49, %v556_v63  ;;  %v523_v12 = vmul.f32 %v697_v46, %v933_v61  ;;  %v473_v29 = vpop.xlane.xlu1 %472 }
 0x217   :  { %584 = vst.msk [vmem:[%s1125_s6] sm:$0xff] %vm328_vm1, %v568_v22  ;;  %v553_v31 = vmul.f32 %v1000_v42, %v530_v24  ;;  %710 = vrsqrt.f32 %v504_v25  ;;  %v489_v32 = vmul.f32 0.03125, %v473_v29 }
 0x218   :  { %v699_v34 = vpop.eup %698  ;;  %595 = vst.msk [vmem:[%s1125_s6 + $0x58] sm:$0xff] %vm328_vm1, %v579_v13  ;;  %v546_v7 = vmul.f32 %v1000_v42, %v523_v12  ;;  %712 = vrsqrt.f32 %v503_v17 }
 0x219   :  { %v701_v61 = vpop.eup %700  ;;  %v576_v35 = vadd.f32 %v1006_v49, %v553_v31  ;;  %v528_v23 = vmul.f32 %v699_v34, %v945_v27  ;;  %v505_v26 = vadd.f32 1e-05, %v489_v32 }
 0x21a   :  { %v569_v14 = vadd.f32 %v1006_v49, %v546_v7  ;;  %v531_v43 = vmul.f32 %v701_v61, %v936_v3 }
 0x21b   :  { %592 = vst.msk [vmem:[%s1125_s6 + $0x40] sm:$0xff] %vm328_vm1, %v576_v35  ;;  %v551_v47 = vmul.f32 %v1000_v42, %v528_v23  ;;  %714 = vrsqrt.f32 %v505_v26 }
 0x21c   :  { %v703_v48 = vpop.eup %702  ;;  %585 = vst.msk [vmem:[%s1125_s6 + $0x8] sm:$0xff] %vm328_vm1, %v569_v14  ;;  %v554_v27 = vmul.f32 %v1000_v42, %v531_v43 }
 0x21d   :  { %v705_v30 = vpop.eup %704  ;;  %v574_v33 = vadd.f32 %v1006_v49, %v551_v47  ;;  %v526_v3 = vmul.f32 %v703_v48, %v957_v36 }
 0x21e   :  { %v577_v52 = vadd.f32 %v1006_v49, %v554_v27  ;;  %v529_v56 = vmul.f32 %v705_v30, %v949_v28 }
 0x21f   :  { %590 = vst.msk [vmem:[%s1125_s6 + $0x30] sm:$0xff] %vm328_vm1, %v574_v33  ;;  %v549_v57 = vmul.f32 %v1000_v42, %v526_v3 }
 0x220   :  { %v707_v58 = vpop.eup %706  ;;  %593 = vst.msk [vmem:[%s1125_s6 + $0x48] sm:$0xff] %vm328_vm1, %v577_v52  ;;  %v552_v59 = vmul.f32 %v1000_v42, %v529_v56 }
 0x221   :  { %v709_v36 = vpop.eup %708  ;;  %v572_v60 = vadd.f32 %v1006_v49, %v549_v57  ;;  %v534_v28 = vmul.f32 %v707_v58, %v969_v50 }
 0x222   :  { %v575_v55 = vadd.f32 %v1006_v49, %v552_v59  ;;  %v527_v37 = vmul.f32 %v709_v36, %v961_v40 }
 0x223   :  { %588 = vst.msk [vmem:[%s1125_s6 + $0x20] sm:$0xff] %vm328_vm1, %v572_v60  ;;  %v557_v41 = vmul.f32 %v1000_v42, %v534_v28 }
 0x224   :  { %v711_v39 = vpop.eup %710  ;;  %591 = vst.msk [vmem:[%s1125_s6 + $0x38] sm:$0xff] %vm328_vm1, %v575_v55  ;;  %v550_v1 = vmul.f32 %v1000_v42, %v527_v37 }
 0x225   :  { %v713_v50 = vpop.eup %712  ;;  %v580_v2 = vadd.f32 %v1006_v49, %v557_v41  ;;  %v536_v40 = vmul.f32 %v711_v39, %v981_v62 }
 0x226   :  { %v573_v4 = vadd.f32 %v1006_v49, %v550_v1  ;;  %v535_v44 = vmul.f32 %v713_v50, %v973_v51 }
 0x227   :  { %596 = vst.msk [vmem:[%s1125_s6 + $0x60] sm:$0xff] %vm328_vm1, %v580_v2  ;;  %v559_v5 = vmul.f32 %v1000_v42, %v536_v40 }
 0x228   :  { %v715_v45 = vpop.eup %714  ;;  %589 = vst.msk [vmem:[%s1125_s6 + $0x28] sm:$0xff] %vm328_vm1, %v573_v4  ;;  %v558_v6 = vmul.f32 %v1000_v42, %v535_v44 }
 0x229   :  { %v582_v62 = vadd.f32 %v1006_v49, %v559_v5  ;;  %v537_v54 = vmul.f32 %v715_v45, %v985_v38 }
 0x22a   :  { %v581_v51 = vadd.f32 %v1006_v49, %v558_v6 }
 0x22b   :  { %598 = vst.msk [vmem:[%s1125_s6 + $0x70] sm:$0xff] %vm328_vm1, %v582_v62  ;;  %v560_v53 = vmul.f32 %v1000_v42, %v537_v54 }
 0x22c   :  { %597 = vst.msk [vmem:[%s1125_s6 + $0x68] sm:$0xff] %vm328_vm1, %v581_v51 }
 0x22d   :  { %v583_v0 = vadd.f32 %v1006_v49, %v560_v53 }
 0x22f   :  { %599 = vst.msk [vmem:[%s1125_s6 + $0x78] sm:$0xff] %vm328_vm1, %v583_v0 }

</bundles_post_ra>
